<compile_context>
chip_gen: v7x
topology: tpu7x:2x2x1
jax: 0.10.0
libtpu: 0.0.40
codegen_flags: <defaults>
</compile_context>

<pallas_src>
import functools

import jax
import jax.numpy as jnp
from jax.experimental import pallas as pl
from jax.experimental.pallas import tpu as pltpu

VMEM_LIMIT = 48 * 1024 * 1024  # explicit budget (v7x physical VMEM is 64 MiB)


def _compiler_params(dims):
    return pltpu.CompilerParams(dimension_semantics=dims,
                                vmem_limit_bytes=VMEM_LIMIT)


# ----------------------------- Pallas kernels ------------------------------ #

def _matmul_affine_kernel(x_ref, w_ref, scale_ref, shift_ref, o_ref, *, relu):
    # y = relu?( (x @ w) * scale_col + shift_col ), f32 accumulation on the MXU.
    acc = jnp.dot(x_ref[...], w_ref[...], preferred_element_type=jnp.float32)
    y = acc * scale_ref[...] + shift_ref[...]
    if relu:
        y = jnp.maximum(y, 0.0)
    o_ref[...] = y.astype(o_ref.dtype)


def _maxpool3x3s2_kernel(xp_ref, o_ref):
    # 3x3 stride-2 max pool for one sample; input already padded with -inf.
    #   xp_ref: (Hop, Wop, C) with Hop = 2*Hp + 2, Wop = 2*Wp + 2
    #   o_ref : (Hp, Wp, C)
    Hp, Wp, C = o_ref.shape
    # W direction: strided (sublane) reads of the three window columns.
    w0 = xp_ref[:, pl.ds(0, Wp, stride=2), :]
    w1 = xp_ref[:, pl.ds(1, Wp, stride=2), :]
    w2 = xp_ref[:, pl.ds(2, Wp, stride=2), :]
    wmax = jnp.maximum(jnp.maximum(w0, w1), w2)              # (Hop, Wp, C)
    # H direction: split rows into (pairs, parity) -- layout-preserving reshape of
    # the major axis -- then max over {even[p], odd[p], even[p+1]}.
    wr = wmax.reshape(Hp + 1, 2, Wp, C)
    ev = wr[:, 0]
    od = wr[:, 1]
    res = jnp.maximum(jnp.maximum(ev[:Hp], od[:Hp]), ev[1:Hp + 1])
    o_ref[...] = res.astype(o_ref.dtype)


def _proj_pool_kernel(x_ref, w_ref, scale_ref, shift_ref, o_ref, *, inv_spatial):
    # Fused 1x1 conv (Cin->tn) + BN + ReLU + global average pool.
    # Grid = (Cout//tn, S//ts); last ("arbitrary") axis accumulates the pooled sum
    # into the resident output block.
    s = pl.program_id(1)

    @pl.when(s == 0)
    def _init():
        o_ref[...] = jnp.zeros_like(o_ref)

    n, ts, cin = x_ref.shape
    x2 = x_ref[...].reshape(n * ts, cin)                           # layout-preserving
    y = jnp.dot(x2, w_ref[...], preferred_element_type=jnp.float32)   # (n*ts, tn)
    y = jnp.maximum(y * scale_ref[...] + shift_ref[...], 0.0)
    y = y.reshape(n, ts, -1)
    o_ref[...] += jnp.sum(y, axis=1) * inv_spatial                 # (n, tn)


# ----------------------------- Pallas wrappers ----------------------------- #

def pallas_matmul_affine(x, w, scale, shift, *, relu, tm, out_dtype=jnp.float32):
    M, K = x.shape
    Kw, Nc = w.shape
    assert K == Kw
    tm = min(tm, M)
    Mp = -(-M // tm) * tm
    if Mp != M:
        x = jnp.pad(x, ((0, Mp - M), (0, 0)))
    kern = functools.partial(_matmul_affine_kernel, relu=relu)
    out = pl.pallas_call(
        kern,
        out_shape=jax.ShapeDtypeStruct((Mp, Nc), out_dtype),
        grid=(Mp // tm,),
        in_specs=[
            pl.BlockSpec((tm, K), lambda i: (i, 0)),
            pl.BlockSpec((K, Nc), lambda i: (0, 0)),
            pl.BlockSpec((1, Nc), lambda i: (0, 0)),
            pl.BlockSpec((1, Nc), lambda i: (0, 0)),
        ],
        out_specs=pl.BlockSpec((tm, Nc), lambda i: (i, 0)),
        compiler_params=_compiler_params(("parallel",)),
    )(x, w, scale, shift)
    return out[:M]


def pallas_maxpool3x3s2(y, *, out_dtype=jnp.bfloat16):
    # y: (N, Ho, Wo, C) f32 -> (N, Ho//2, Wo//2, C)
    N, Ho, Wo, C = y.shape
    assert Ho % 2 == 0 and Wo % 2 == 0, "kernel assumes even conv1 output size"
    Hp, Wp = Ho // 2, Wo // 2
    yp = jnp.pad(y, ((0, 0), (1, 1), (1, 1), (0, 0)), constant_values=-jnp.inf)
    Hop, Wop = Ho + 2, Wo + 2
    return pl.pallas_call(
        _maxpool3x3s2_kernel,
        out_shape=jax.ShapeDtypeStruct((N, Hp, Wp, C), out_dtype),
        grid=(N,),
        in_specs=[pl.BlockSpec((None, Hop, Wop, C), lambda n: (n, 0, 0, 0))],
        out_specs=pl.BlockSpec((None, Hp, Wp, C), lambda n: (n, 0, 0, 0)),
        compiler_params=_compiler_params(("parallel",)),
    )(yp)


def _pick_spatial_tile(S, max_t=512):
    if S <= max_t:
        return S
    best = 0
    for t in range(8, max_t + 1, 8):
        if S % t == 0:
            best = t
    return best if best else S


def pallas_proj_avgpool(x3, w, scale, shift, *, tn=512):
    # x3: (N, S, Cin) bf16; w: (Cin, Cout) bf16 -> pooled (N, Cout) f32
    N, S, Cin = x3.shape
    Cin2, Cout = w.shape
    assert Cin == Cin2
    if Cout % tn:
        tn = Cout
    ts = _pick_spatial_tile(S)
    kern = functools.partial(_proj_pool_kernel, inv_spatial=1.0 / S)
    return pl.pallas_call(
        kern,
        out_shape=jax.ShapeDtypeStruct((N, Cout), jnp.float32),
        grid=(Cout // tn, S // ts),
        in_specs=[
            pl.BlockSpec((N, ts, Cin), lambda j, s: (0, s, 0)),
            pl.BlockSpec((Cin, tn), lambda j, s: (0, j)),
            pl.BlockSpec((1, tn), lambda j, s: (0, j)),
            pl.BlockSpec((1, tn), lambda j, s: (0, j)),
        ],
        out_specs=pl.BlockSpec((N, tn), lambda j, s: (0, j)),
        compiler_params=_compiler_params(("parallel", "arbitrary")),
    )(x3, w, scale, shift)


# ------------------------------ glue (plain JAX) --------------------------- #

def bn_fold(gamma, beta, mean, var, eps=1e-5):
    scale = gamma / jnp.sqrt(var + eps)
    shift = beta - mean * scale
    return scale, shift


def im2col_nhwc(xpad, kh, kw, stride):
    """xpad already spatially padded; returns (N*Ho*Wo, kh*kw*C), patch order (kh,kw,C)."""
    N, Hpd, Wpd, C = xpad.shape
    Ho = (Hpd - kh) // stride + 1
    Wo = (Wpd - kw) // stride + 1
    cols = []
    for i in range(kh):
        for j in range(kw):
            cols.append(xpad[:, i:i + stride * Ho:stride, j:j + stride * Wo:stride, :])
    patches = jnp.concatenate(cols, axis=-1)                    # (N, Ho, Wo, kh*kw*C)
    return patches.reshape(N * Ho * Wo, kh * kw * C), (Ho, Wo)


# ------------------------------ model params ------------------------------- #

def init_params(key, num_class, in_channels=2, feat_dim=2048):
    ks = jax.random.split(key, 16)
    p = {}
    # data_bn (BatchNorm2d(in_channels)), eval-mode running stats
    p["data_bn_gamma"] = 1.0 + 0.1 * jax.random.normal(ks[0], (in_channels,), jnp.float32)
    p["data_bn_beta"] = 0.1 * jax.random.normal(ks[1], (in_channels,), jnp.float32)
    p["data_bn_mean"] = 0.1 * jax.random.normal(ks[2], (in_channels,), jnp.float32)
    p["data_bn_var"] = 1.0 + jnp.abs(jax.random.normal(ks[3], (in_channels,), jnp.float32))
    # conv1: Conv2d(in_channels, 64, 7, stride=2, padding=3, bias=False), (kh,kw,Cin,Cout)
    p["conv1_w"] = 0.05 * jax.random.normal(ks[4], (7, 7, in_channels, 64), jnp.float32)
    # bn1 (BatchNorm2d(64))
    p["bn1_gamma"] = 1.0 + 0.1 * jax.random.normal(ks[5], (64,), jnp.float32)
    p["bn1_beta"] = 0.1 * jax.random.normal(ks[6], (64,), jnp.float32)
    p["bn1_mean"] = 0.1 * jax.random.normal(ks[7], (64,), jnp.float32)
    p["bn1_var"] = 1.0 + jnp.abs(jax.random.normal(ks[8], (64,), jnp.float32))
    # stand-in projection for layer1..layer4: 1x1 conv 64 -> 2048 + BN + ReLU
    p["proj_w"] = 0.05 * jax.random.normal(ks[9], (64, feat_dim), jnp.float32)
    p["projbn_gamma"] = 1.0 + 0.1 * jax.random.normal(ks[10], (feat_dim,), jnp.float32)
    p["projbn_beta"] = 0.1 * jax.random.normal(ks[11], (feat_dim,), jnp.float32)
    p["projbn_mean"] = 0.1 * jax.random.normal(ks[12], (feat_dim,), jnp.float32)
    p["projbn_var"] = 1.0 + jnp.abs(jax.random.normal(ks[13], (feat_dim,), jnp.float32))
    # fc: Linear(feat_dim, num_class)
    p["fc_w"] = 0.05 * jax.random.normal(ks[14], (feat_dim, num_class), jnp.float32)
    p["fc_b"] = 0.05 * jax.random.normal(ks[15], (num_class,), jnp.float32)
    return p


# ------------------------------- forward pass ------------------------------ #

def model_forward(x, params, num_class):
    """x: (B, T, Cin, H, W) NCHW frames, representation='mv' -> logits (B*T, num_class)."""
    B, T, C, H, W = x.shape
    N = B * T
    x = x.reshape(N, C, H, W)                    # input.view((-1,) + input.size()[-3:])

    # ---- data_bn folded into conv1 (no standalone HBM pass) -----------------
    s_bn, b_bn = bn_fold(params["data_bn_gamma"], params["data_bn_beta"],
                         params["data_bn_mean"], params["data_bn_var"])
    pad_val = -b_bn / s_bn                       # BN preimage of 0 -> exact zero-pad semantics

    x_nhwc = jnp.transpose(x, (0, 2, 3, 1)).astype(jnp.bfloat16)
    Hpd, Wpd = H + 6, W + 6
    xpad = jnp.broadcast_to(pad_val.astype(jnp.bfloat16), (N, Hpd, Wpd, C))
    xpad = xpad.at[:, 3:3 + H, 3:3 + W, :].set(x_nhwc)

    # ---- conv1 7x7/2 (with folded data_bn) + bn1 + relu --------------- Pallas
    # TODO(synk): the im2col patch matrix is still materialized by XLA in HBM; a fully
    # fused halo-conv Pallas kernel would remove that round trip.
    patches, (Ho, Wo) = im2col_nhwc(xpad, 7, 7, 2)           # (N*Ho*Wo, 98) bf16
    K = patches.shape[1]
    Kp = -(-K // 128) * 128
    patches = jnp.pad(patches, ((0, 0), (0, Kp - K)))        # lane-aligned contraction

    w1 = params["conv1_w"]                                   # (7,7,C,64)
    w1_fold = (w1 * s_bn[None, None, :, None]).reshape(K, 64)
    bias0 = jnp.sum(w1 * b_bn[None, None, :, None], axis=(0, 1, 2))     # (64,)
    w1p = jnp.pad(w1_fold, ((0, Kp - K), (0, 0))).astype(jnp.bfloat16)

    s1, sh1 = bn_fold(params["bn1_gamma"], params["bn1_beta"],
                      params["bn1_mean"], params["bn1_var"])
    scale1 = s1[None, :]
    shift1 = (bias0 * s1 + sh1)[None, :]
    y = pallas_matmul_affine(patches, w1p, scale1, shift1,
                             relu=True, tm=512, out_dtype=jnp.float32)
    y = y.reshape(N, Ho, Wo, 64)

    # ---- maxpool 3x3/2 pad 1 (single fused kernel per sample) --------- Pallas
    y = pallas_maxpool3x3s2(y, out_dtype=jnp.bfloat16)       # (N, Hp, Wp, 64) bf16
    _, Hp, Wp, _ = y.shape

    # ---- stand-in for layer1..layer4 + global average pool (fused) ---- Pallas
    # TODO(synk): resnet152 layer1-4 (50 bottlenecks) replaced by one fused
    # 1x1-conv 64->2048 + BN + ReLU so fc.in_features matches resnet152.
    sp, shp = bn_fold(params["projbn_gamma"], params["projbn_beta"],
                      params["projbn_mean"], params["projbn_var"])
    pooled = pallas_proj_avgpool(y.reshape(N, Hp * Wp, 64),
                                 params["proj_w"].astype(jnp.bfloat16),
                                 sp[None, :], shp[None, :], tn=512)     # (N, 2048) f32

    # ---- fc (num_class padded to 128 lanes for dense stores) ---------- Pallas
    feat_dim, nc = params["fc_w"].shape
    NCP = -(-nc // 128) * 128
    fc_w = jnp.zeros((feat_dim, NCP), jnp.float32).at[:, :nc].set(params["fc_w"])
    fc_b = jnp.zeros((1, NCP), jnp.float32).at[0, :nc].set(params["fc_b"])
    ones = jnp.ones((1, NCP), jnp.float32)
    logits = pallas_matmul_affine(pooled, fc_w, ones, fc_b,
                                  relu=False, tm=8, out_dtype=jnp.float32)
    return logits[:, :num_class]                             # (B*T, num_class)


# ----------------------------------- main ----------------------------------- #

if __name__ == "__main__":
    num_class = 8
    num_segments = 2          # T
    batch = 2                 # B
    in_channels = 2           # representation='mv'
    H = W = 32                # small spatial size (resnet crop_size would be 224)

    key = jax.random.PRNGKey(0)
    pkey, xkey = jax.random.split(key)
    params = init_params(pkey, num_class, in_channels=in_channels)
    x = jax.random.normal(xkey, (batch, num_segments, in_channels, H, W), jnp.float32)

    fwd = jax.jit(functools.partial(model_forward, num_class=num_class))
    out = jax.block_until_ready(fwd(x, params))

    assert out.shape == (batch * num_segments, num_class), out.shape
    assert bool(jnp.all(jnp.isfinite(out)))
    print("KERNEL_OK")
</pallas_src>

<mosaic_0001>
module attributes {stable_mosaic.version = 11 : i64} {
  func.func @_matmul_affine_kernel(%arg0: i32, %arg1: memref<512x128xbf16, #tpu.memory_space<vmem>>, %arg2: memref<128x64xbf16, #tpu.memory_space<vmem>>, %arg3: memref<1x64xf32, #tpu.memory_space<vmem>>, %arg4: memref<1x64xf32, #tpu.memory_space<vmem>>, %arg5: memref<512x64xf32, #tpu.memory_space<vmem>>) attributes {dimension_semantics = [#tpu.dimension_semantics<parallel>], iteration_bounds = array<i64: 2>, scalar_prefetch = 0 : i64, scratch_operands = 0 : i64, tpu.core_type = #tpu.core_type<tc>, window_params = [{transform_indices = @transform_0, window_bounds = array<i64: 512, 128>}, {pipeline_mode = #tpu.pipeline_mode<synchronous>, transform_indices = @transform_1, window_bounds = array<i64: 128, 64>}, {pipeline_mode = #tpu.pipeline_mode<synchronous>, transform_indices = @transform_2, window_bounds = array<i64: 1, 64>}, {pipeline_mode = #tpu.pipeline_mode<synchronous>, transform_indices = @transform_3, window_bounds = array<i64: 1, 64>}, {transform_indices = @transform_4, window_bounds = array<i64: 512, 64>}]} {
    %c0 = arith.constant 0 : index
    %c0_0 = arith.constant 0 : index
    %0 = vector.load %arg1[%c0, %c0_0] : memref<512x128xbf16, #tpu.memory_space<vmem>>, vector<512x128xbf16>
    %c0_1 = arith.constant 0 : index
    %c0_2 = arith.constant 0 : index
    %1 = vector.load %arg2[%c0_1, %c0_2] : memref<128x64xbf16, #tpu.memory_space<vmem>>, vector<128x64xbf16>
    %cst = arith.constant dense<0.000000e+00> : vector<512x64xf32>
    %2 = tpu.matmul %0, %1, %cst {dimension_numbers = #tpu.dot_dimension_numbers<[1], [0], [0], [1], [0, 0, 1, 1], [], []>} : vector<512x128xbf16>, vector<128x64xbf16>, vector<512x64xf32> -> vector<512x64xf32>
    %c0_3 = arith.constant 0 : index
    %c0_4 = arith.constant 0 : index
    %3 = vector.load %arg3[%c0_3, %c0_4] : memref<1x64xf32, #tpu.memory_space<vmem>>, vector<1x64xf32>
    %4 = vector.broadcast %3 : vector<1x64xf32> to vector<512x64xf32>
    %5 = arith.mulf %2, %4 : vector<512x64xf32>
    %c0_5 = arith.constant 0 : index
    %c0_6 = arith.constant 0 : index
    %6 = vector.load %arg4[%c0_5, %c0_6] : memref<1x64xf32, #tpu.memory_space<vmem>>, vector<1x64xf32>
    %7 = vector.broadcast %6 : vector<1x64xf32> to vector<512x64xf32>
    %8 = arith.addf %5, %7 : vector<512x64xf32>
    %cst_7 = arith.constant 0.000000e+00 : f32
    %9 = vector.broadcast %cst_7 : f32 to vector<512x64xf32>
    %10 = arith.maximumf %8, %9 : vector<512x64xf32>
    %c0_8 = arith.constant 0 : index
    %c0_9 = arith.constant 0 : index
    %11 = vector.load %arg5[%c0_8, %c0_9] : memref<512x64xf32, #tpu.memory_space<vmem>>, vector<512x64xf32>
    tpu.vector_store %arg5[%c0_8, %c0_9], %10 {strides = array<i32>} : memref<512x64xf32, #tpu.memory_space<vmem>>, vector<512x64xf32>,
    return
  }
  func.func @transform_0(%arg0: i32) -> (i32, i32) {
    %c0_i32 = arith.constant 0 : i32
    %c0_i32_0 = arith.constant 0 : i32
    return %arg0, %c0_i32 : i32, i32
  }
  func.func @transform_1(%arg0: i32) -> (i32, i32) {
    %c0_i32 = arith.constant 0 : i32
    %c0_i32_0 = arith.constant 0 : i32
    %c0_i32_1 = arith.constant 0 : i32
    return %c0_i32, %c0_i32_0 : i32, i32
  }
  func.func @transform_2(%arg0: i32) -> (i32, i32) {
    %c0_i32 = arith.constant 0 : i32
    %c0_i32_0 = arith.constant 0 : i32
    %c0_i32_1 = arith.constant 0 : i32
    return %c0_i32, %c0_i32_0 : i32, i32
  }
  func.func @transform_3(%arg0: i32) -> (i32, i32) {
    %c0_i32 = arith.constant 0 : i32
    %c0_i32_0 = arith.constant 0 : i32
    %c0_i32_1 = arith.constant 0 : i32
    return %c0_i32, %c0_i32_0 : i32, i32
  }
  func.func @transform_4(%arg0: i32) -> (i32, i32) {
    %c0_i32 = arith.constant 0 : i32
    %c0_i32_0 = arith.constant 0 : i32
    return %arg0, %c0_i32 : i32, i32
  }
}

module attributes {stable_mosaic.version = 11 : i64} {
  func.func @_maxpool3x3s2_kernel(%arg0: i32, %arg1: memref<1x18x18x64xf32, #tpu.memory_space<vmem>>, %arg2: memref<1x8x8x64xbf16, #tpu.memory_space<vmem>>) attributes {dimension_semantics = [#tpu.dimension_semantics<parallel>], iteration_bounds = array<i64: 4>, scalar_prefetch = 0 : i64, scratch_operands = 0 : i64, tpu.core_type = #tpu.core_type<tc>, window_params = [{transform_indices = @transform_0, window_bounds = array<i64: 1, 18, 18, 64>}, {transform_indices = @transform_1, window_bounds = array<i64: 1, 8, 8, 64>}]} {
    %c0 = arith.constant 0 : index
    %c0_0 = arith.constant 0 : index
    %c0_1 = arith.constant 0 : index
    %c0_2 = arith.constant 0 : index
    %0 = tpu.strided_load %arg1[%c0, %c0_0, %c0_1, %c0_2] {strides = array<i32: 1, 1, 2, 1>} : memref<1x18x18x64xf32, #tpu.memory_space<vmem>>, vector<1x18x8x64xf32>
    %1 = vector.shape_cast %0 : vector<1x18x8x64xf32> to vector<18x8x64xf32>
    %c0_3 = arith.constant 0 : index
    %c0_4 = arith.constant 0 : index
    %c1 = arith.constant 1 : index
    %c0_5 = arith.constant 0 : index
    %2 = tpu.strided_load %arg1[%c0_3, %c0_4, %c1, %c0_5] {strides = array<i32: 1, 1, 2, 1>} : memref<1x18x18x64xf32, #tpu.memory_space<vmem>>, vector<1x18x8x64xf32>
    %3 = vector.shape_cast %2 : vector<1x18x8x64xf32> to vector<18x8x64xf32>
    %c0_6 = arith.constant 0 : index
    %c0_7 = arith.constant 0 : index
    %c2 = arith.constant 2 : index
    %c0_8 = arith.constant 0 : index
    %4 = tpu.strided_load %arg1[%c0_6, %c0_7, %c2, %c0_8] {strides = array<i32: 1, 1, 2, 1>} : memref<1x18x18x64xf32, #tpu.memory_space<vmem>>, vector<1x18x8x64xf32>
    %5 = vector.shape_cast %4 : vector<1x18x8x64xf32> to vector<18x8x64xf32>
    %6 = arith.maximumf %1, %3 : vector<18x8x64xf32>
    %7 = arith.maximumf %6, %5 : vector<18x8x64xf32>
    %8 = vector.shape_cast %7 : vector<18x8x64xf32> to vector<9x2x8x64xf32>
    %9 = vector.extract_strided_slice %8 {offsets = [0, 0, 0, 0], sizes = [9, 1, 8, 64], strides = [1, 1, 1, 1]} : vector<9x2x8x64xf32> to vector<9x1x8x64xf32>
    %10 = vector.shape_cast %9 : vector<9x1x8x64xf32> to vector<9x8x64xf32>
    %11 = vector.extract_strided_slice %8 {offsets = [0, 1, 0, 0], sizes = [9, 1, 8, 64], strides = [1, 1, 1, 1]} : vector<9x2x8x64xf32> to vector<9x1x8x64xf32>
    %12 = vector.shape_cast %11 : vector<9x1x8x64xf32> to vector<9x8x64xf32>
    %13 = vector.extract_strided_slice %10 {offsets = [0, 0, 0], sizes = [8, 8, 64], strides = [1, 1, 1]} : vector<9x8x64xf32> to vector<8x8x64xf32>
    %14 = vector.extract_strided_slice %12 {offsets = [0, 0, 0], sizes = [8, 8, 64], strides = [1, 1, 1]} : vector<9x8x64xf32> to vector<8x8x64xf32>
    %15 = arith.maximumf %13, %14 : vector<8x8x64xf32>
    %16 = vector.extract_strided_slice %10 {offsets = [1, 0, 0], sizes = [8, 8, 64], strides = [1, 1, 1]} : vector<9x8x64xf32> to vector<8x8x64xf32>
    %17 = arith.maximumf %15, %16 : vector<8x8x64xf32>
    %18 = arith.truncf %17 : vector<8x8x64xf32> to vector<8x8x64xbf16>
    %c0_9 = arith.constant 0 : index
    %c0_10 = arith.constant 0 : index
    %c0_11 = arith.constant 0 : index
    %c0_12 = arith.constant 0 : index
    %19 = vector.load %arg2[%c0_9, %c0_10, %c0_11, %c0_12] : memref<1x8x8x64xbf16, #tpu.memory_space<vmem>>, vector<1x8x8x64xbf16>
    %20 = vector.shape_cast %19 : vector<1x8x8x64xbf16> to vector<8x8x64xbf16>
    %21 = vector.shape_cast %18 : vector<8x8x64xbf16> to vector<1x8x8x64xbf16>
    tpu.vector_store %arg2[%c0_9, %c0_10, %c0_11, %c0_12], %21 {strides = array<i32>} : memref<1x8x8x64xbf16, #tpu.memory_space<vmem>>, vector<1x8x8x64xbf16>,
    return
  }
  func.func @transform_0(%arg0: i32) -> (i32, i32, i32, i32) {
    %c0_i32 = arith.constant 0 : i32
    %c0_i32_0 = arith.constant 0 : i32
    %c0_i32_1 = arith.constant 0 : i32
    %c0_i32_2 = arith.constant 0 : i32
    return %arg0, %c0_i32, %c0_i32_0, %c0_i32_1 : i32, i32, i32, i32
  }
  func.func @transform_1(%arg0: i32) -> (i32, i32, i32, i32) {
    %c0_i32 = arith.constant 0 : i32
    %c0_i32_0 = arith.constant 0 : i32
    %c0_i32_1 = arith.constant 0 : i32
    %c0_i32_2 = arith.constant 0 : i32
    return %arg0, %c0_i32, %c0_i32_0, %c0_i32_1 : i32, i32, i32, i32
  }
}

module attributes {stable_mosaic.version = 11 : i64} {
  func.func @_proj_pool_kernel(%arg0: i32, %arg1: i32, %arg2: memref<4x64x64xbf16, #tpu.memory_space<vmem>>, %arg3: memref<64x512xbf16, #tpu.memory_space<vmem>>, %arg4: memref<1x512xf32, #tpu.memory_space<vmem>>, %arg5: memref<1x512xf32, #tpu.memory_space<vmem>>, %arg6: memref<4x512xf32, #tpu.memory_space<vmem>>) attributes {dimension_semantics = [#tpu.dimension_semantics<parallel>, #tpu.dimension_semantics<arbitrary>], iteration_bounds = array<i64: 4, 1>, scalar_prefetch = 0 : i64, scratch_operands = 0 : i64, tpu.core_type = #tpu.core_type<tc>, window_params = [{transform_indices = @transform_0, window_bounds = array<i64: 4, 64, 64>}, {transform_indices = @transform_1, window_bounds = array<i64: 64, 512>}, {transform_indices = @transform_2, window_bounds = array<i64: 1, 512>}, {transform_indices = @transform_3, window_bounds = array<i64: 1, 512>}, {transform_indices = @transform_4, window_bounds = array<i64: 4, 512>}]} {
    %c0_i32 = arith.constant 0 : i32
    %0 = arith.cmpi eq, %arg1, %c0_i32 : i32
    %1 = arith.extui %0 : i1 to i32
    %c0_i32_0 = arith.constant 0 : i32
    %2 = arith.cmpi ne, %1, %c0_i32_0 : i32
    scf.if %2 {
      %cst_16 = arith.constant 0.000000e+00 : f32
      %22 = vector.broadcast %cst_16 : f32 to vector<4x512xf32>
      %c0_17 = arith.constant 0 : index
      %c0_18 = arith.constant 0 : index
      %23 = vector.load %arg6[%c0_17, %c0_18] : memref<4x512xf32, #tpu.memory_space<vmem>>, vector<4x512xf32>
      tpu.vector_store %arg6[%c0_17, %c0_18], %22 {strides = array<i32>} : memref<4x512xf32, #tpu.memory_space<vmem>>, vector<4x512xf32>,
    } else {
    }
    %c0 = arith.constant 0 : index
    %c0_1 = arith.constant 0 : index
    %c0_2 = arith.constant 0 : index
    %3 = vector.load %arg2[%c0, %c0_1, %c0_2] : memref<4x64x64xbf16, #tpu.memory_space<vmem>>, vector<4x64x64xbf16>
    %4 = vector.shape_cast %3 : vector<4x64x64xbf16> to vector<256x64xbf16>
    %c0_3 = arith.constant 0 : index
    %c0_4 = arith.constant 0 : index
    %5 = vector.load %arg3[%c0_3, %c0_4] : memref<64x512xbf16, #tpu.memory_space<vmem>>, vector<64x512xbf16>
    %cst = arith.constant dense<0.000000e+00> : vector<256x512xf32>
    %6 = tpu.matmul %4, %5, %cst {dimension_numbers = #tpu.dot_dimension_numbers<[1], [0], [0], [1], [0, 0, 1, 1], [], []>} : vector<256x64xbf16>, vector<64x512xbf16>, vector<256x512xf32> -> vector<256x512xf32>
    %c0_5 = arith.constant 0 : index
    %c0_6 = arith.constant 0 : index
    %7 = vector.load %arg4[%c0_5, %c0_6] : memref<1x512xf32, #tpu.memory_space<vmem>>, vector<1x512xf32>
    %8 = vector.broadcast %7 : vector<1x512xf32> to vector<256x512xf32>
    %9 = arith.mulf %6, %8 : vector<256x512xf32>
    %c0_7 = arith.constant 0 : index
    %c0_8 = arith.constant 0 : index
    %10 = vector.load %arg5[%c0_7, %c0_8] : memref<1x512xf32, #tpu.memory_space<vmem>>, vector<1x512xf32>
    %11 = vector.broadcast %10 : vector<1x512xf32> to vector<256x512xf32>
    %12 = arith.addf %9, %11 : vector<256x512xf32>
    %cst_9 = arith.constant 0.000000e+00 : f32
    %13 = vector.broadcast %cst_9 : f32 to vector<256x512xf32>
    %14 = arith.maximumf %12, %13 : vector<256x512xf32>
    %15 = vector.shape_cast %14 : vector<256x512xf32> to vector<4x64x512xf32>
    %c0_10 = arith.constant 0 : index
    %c0_11 = arith.constant 0 : index
    %16 = vector.load %arg6[%c0_10, %c0_11] : memref<4x512xf32, #tpu.memory_space<vmem>>, vector<4x512xf32>
    %cst_12 = arith.constant dense<0.000000e+00> : vector<4x512xf32>
    %17 = vector.multi_reduction <add>, %15, %cst_12 [1] : vector<4x64x512xf32> to vector<4x512xf32>
    %cst_13 = arith.constant 1.562500e-02 : f32
    %18 = vector.broadcast %cst_13 : f32 to vector<4x512xf32>
    %19 = arith.mulf %17, %18 : vector<4x512xf32>
    %20 = arith.addf %16, %19 : vector<4x512xf32>
    %c0_14 = arith.constant 0 : index
    %c0_15 = arith.constant 0 : index
    %21 = vector.load %arg6[%c0_14, %c0_15] : memref<4x512xf32, #tpu.memory_space<vmem>>, vector<4x512xf32>
    tpu.vector_store %arg6[%c0_14, %c0_15], %20 {strides = array<i32>} : memref<4x512xf32, #tpu.memory_space<vmem>>, vector<4x512xf32>,
    return
  }
  func.func @transform_0(%arg0: i32, %arg1: i32) -> (i32, i32, i32) {
    %c0_i32 = arith.constant 0 : i32
    %c0_i32_0 = arith.constant 0 : i32
    %c0_i32_1 = arith.constant 0 : i32
    return %c0_i32, %arg1, %c0_i32_0 : i32, i32, i32
  }
  func.func @transform_1(%arg0: i32, %arg1: i32) -> (i32, i32) {
    %c0_i32 = arith.constant 0 : i32
    %c0_i32_0 = arith.constant 0 : i32
    return %c0_i32, %arg0 : i32, i32
  }
  func.func @transform_2(%arg0: i32, %arg1: i32) -> (i32, i32) {
    %c0_i32 = arith.constant 0 : i32
    %c0_i32_0 = arith.constant 0 : i32
    return %c0_i32, %arg0 : i32, i32
  }
  func.func @transform_3(%arg0: i32, %arg1: i32) -> (i32, i32) {
    %c0_i32 = arith.constant 0 : i32
    %c0_i32_0 = arith.constant 0 : i32
    return %c0_i32, %arg0 : i32, i32
  }
  func.func @transform_4(%arg0: i32, %arg1: i32) -> (i32, i32) {
    %c0_i32 = arith.constant 0 : i32
    %c0_i32_0 = arith.constant 0 : i32
    return %c0_i32, %arg0 : i32, i32
  }
}

module attributes {stable_mosaic.version = 11 : i64} {
  func.func @_matmul_affine_kernel(%arg0: i32, %arg1: memref<4x2048xf32, #tpu.memory_space<vmem>>, %arg2: memref<2048x128xf32, #tpu.memory_space<vmem>>, %arg3: memref<1x128xf32, #tpu.memory_space<vmem>>, %arg4: memref<1x128xf32, #tpu.memory_space<vmem>>, %arg5: memref<4x128xf32, #tpu.memory_space<vmem>>) attributes {dimension_semantics = [#tpu.dimension_semantics<parallel>], iteration_bounds = array<i64: 1>, scalar_prefetch = 0 : i64, scratch_operands = 0 : i64, tpu.core_type = #tpu.core_type<tc>, window_params = [{transform_indices = @transform_0, window_bounds = array<i64: 4, 2048>}, {pipeline_mode = #tpu.pipeline_mode<synchronous>, transform_indices = @transform_1, window_bounds = array<i64: 2048, 128>}, {pipeline_mode = #tpu.pipeline_mode<synchronous>, transform_indices = @transform_2, window_bounds = array<i64: 1, 128>}, {pipeline_mode = #tpu.pipeline_mode<synchronous>, transform_indices = @transform_3, window_bounds = array<i64: 1, 128>}, {transform_indices = @transform_4, window_bounds = array<i64: 4, 128>}]} {
    %c0 = arith.constant 0 : index
    %c0_0 = arith.constant 0 : index
    %0 = vector.load %arg1[%c0, %c0_0] : memref<4x2048xf32, #tpu.memory_space<vmem>>, vector<4x2048xf32>
    %c0_1 = arith.constant 0 : index
    %c0_2 = arith.constant 0 : index
    %1 = vector.load %arg2[%c0_1, %c0_2] : memref<2048x128xf32, #tpu.memory_space<vmem>>, vector<2048x128xf32>
    %cst = arith.constant dense<0.000000e+00> : vector<4x128xf32>
    %2 = tpu.matmul %0, %1, %cst {dimension_numbers = #tpu.dot_dimension_numbers<[1], [0], [0], [1], [0, 0, 1, 1], [], []>} : vector<4x2048xf32>, vector<2048x128xf32>, vector<4x128xf32> -> vector<4x128xf32>
    %c0_3 = arith.constant 0 : index
    %c0_4 = arith.constant 0 : index
    %3 = vector.load %arg3[%c0_3, %c0_4] : memref<1x128xf32, #tpu.memory_space<vmem>>, vector<1x128xf32>
    %4 = vector.broadcast %3 : vector<1x128xf32> to vector<4x128xf32>
    %5 = arith.mulf %2, %4 : vector<4x128xf32>
    %c0_5 = arith.constant 0 : index
    %c0_6 = arith.constant 0 : index
    %6 = vector.load %arg4[%c0_5, %c0_6] : memref<1x128xf32, #tpu.memory_space<vmem>>, vector<1x128xf32>
    %7 = vector.broadcast %6 : vector<1x128xf32> to vector<4x128xf32>
    %8 = arith.addf %5, %7 : vector<4x128xf32>
    %c0_7 = arith.constant 0 : index
    %c0_8 = arith.constant 0 : index
    %9 = vector.load %arg5[%c0_7, %c0_8] : memref<4x128xf32, #tpu.memory_space<vmem>>, vector<4x128xf32>
    tpu.vector_store %arg5[%c0_7, %c0_8], %8 {strides = array<i32>} : memref<4x128xf32, #tpu.memory_space<vmem>>, vector<4x128xf32>,
    return
  }
  func.func @transform_0(%arg0: i32) -> (i32, i32) {
    %c0_i32 = arith.constant 0 : i32
    %c0_i32_0 = arith.constant 0 : i32
    return %arg0, %c0_i32 : i32, i32
  }
  func.func @transform_1(%arg0: i32) -> (i32, i32) {
    %c0_i32 = arith.constant 0 : i32
    %c0_i32_0 = arith.constant 0 : i32
    %c0_i32_1 = arith.constant 0 : i32
    return %c0_i32, %c0_i32_0 : i32, i32
  }
  func.func @transform_2(%arg0: i32) -> (i32, i32) {
    %c0_i32 = arith.constant 0 : i32
    %c0_i32_0 = arith.constant 0 : i32
    %c0_i32_1 = arith.constant 0 : i32
    return %c0_i32, %c0_i32_0 : i32, i32
  }
  func.func @transform_3(%arg0: i32) -> (i32, i32) {
    %c0_i32 = arith.constant 0 : i32
    %c0_i32_0 = arith.constant 0 : i32
    %c0_i32_1 = arith.constant 0 : i32
    return %c0_i32, %c0_i32_0 : i32, i32
  }
  func.func @transform_4(%arg0: i32) -> (i32, i32) {
    %c0_i32 = arith.constant 0 : i32
    %c0_i32_0 = arith.constant 0 : i32
    return %arg0, %c0_i32 : i32, i32
  }
}

</mosaic_0001>

<bundles_post_ra>
// kernel: model_forward.5
= control target key start
LH: loop header
LB: loop body
LE: loop exit
PB: predicated region body
PF: predicated region fallthrough
CT: control target
= control target key end

     0   :  { %s428_s6 = smov 0   ;;  %s522_s0 = inlined_call_operand.vmem [shape: f32[4,18,18,64], index: 0, kind: input, shape index: {}]   ;;  %s523_s1 = inlined_call_operand.vmem [shape: bf16[4,8,8,64], index: 1, kind: output, shape index: {}]  }
   0x1 LB: > { %s340_s7 = sadd.s32 4294967295, %s416_s6   ;;  %p344_p0 = scmp.ge.s32.totalorder %s416_s6, 1  ;;  %s416_s6 = sphi %s428_s6, %s11_s6  }
   0x2   : > { %p87_p1 = scmp.lt.s32.totalorder %s416_s6, 5 }
   0x4   : > { %p88_p2 = pnand %p344_p0, %p87_p1 }
   0x5   : > { %p107_p3 = scmp.lt.s32.totalorder (!%p88_p2), %s340_s7, 3  ;;  %vm276_vm0 = vcmask (!%p88_p2), 519168  }
   0x6   : > { %91 = sbr.rel (%p88_p2) target bundleno = 46 (0x2e), region = 24 }
   0xd   : > { %s525_s7 = smov (!%p107_p3, %s340_s7), 3 }
   0xe   : > { %s401_s8 = smul.u32 432, %s525_s7  ;;  %s400_s12 = sshll.u32 %s525_s7, 5 }
   0xf   : > { %s477_s15 = scalar_lea.vmem %s523_s1, %s400_s12 }
  0x10   : > { %s442_s11 = scalar_lea.vmem %s522_s0, %s401_s8 }
  0x11   : > { %v117_v0 = vld [vmem:[%s442_s11] ss:$2 sm:$0xff]  ;;  %v349_v2 = vld [vmem:[%s442_s11 + $0x30] ss:$2 sm:$0xff]  ;;  %v364_v3 = vld [vmem:[%s442_s11 + $0x1] ss:$2 sm:$0xff] }
  0x12   : > { %v348_v1 = vld [vmem:[%s442_s11 + $0x18] ss:$2 sm:$0xff]  ;;  %v365_v4 = vld [vmem:[%s442_s11 + $0x19] ss:$2 sm:$0xff]  ;;  %v218_v9 = vmax.f32 %v117_v0, %v364_v3  ;;  %v350_v12 = vld [vmem:[%s442_s11 + $0x48] ss:$2 sm:$0xff] }
  0x13   : > { %v366_v5 = vld [vmem:[%s442_s11 + $0x31] ss:$2 sm:$0xff]  ;;  %v381_v6 = vld [vmem:[%s442_s11 + $0x2] ss:$2 sm:$0xff]  ;;  %v383_v8 = vld [vmem:[%s442_s11 + $0x32] ss:$2 sm:$0xff]  ;;  %v219_v10 = vmax.f32 %v348_v1, %v365_v4 }
  0x14   : > { %v382_v7 = vld [vmem:[%s442_s11 + $0x1a] ss:$2 sm:$0xff]  ;;  %v220_v11 = vmax.f32 %v349_v2, %v366_v5  ;;  %v367_v14 = vld [vmem:[%s442_s11 + $0x49] ss:$2 sm:$0xff]  ;;  %v235_v15 = vmax.f32 %v218_v9, %v381_v6  ;;  %v384_v19 = vld [vmem:[%s442_s11 + $0x4a] ss:$2 sm:$0xff] }
  0x15   : > { %v351_v13 = vld [vmem:[%s442_s11 + $0x60] ss:$2 sm:$0xff]  ;;  %v236_v16 = vmax.f32 %v219_v10, %v382_v7  ;;  %v368_v18 = vld [vmem:[%s442_s11 + $0x61] ss:$2 sm:$0xff]  ;;  %v221_v21 = vmax.f32 %v350_v12, %v367_v14  ;;  %v353_v24 = vld [vmem:[%s442_s11 + $0x90] ss:$2 sm:$0xff] }
  0x16   : > { %v237_v17 = vmax.f32 %v220_v11, %v383_v8  ;;  %v385_v20 = vld [vmem:[%s442_s11 + $0x62] ss:$2 sm:$0xff]  ;;  %v222_v22 = vmax.f32 %v351_v13, %v368_v18  ;;  %v369_v25 = vld [vmem:[%s442_s11 + $0x79] ss:$2 sm:$0xff]  ;;  %v387_v30 = vld [vmem:[%s442_s11 + $0x92] ss:$2 sm:$0xff] }
  0x17   : > { %v352_v23 = vld [vmem:[%s442_s11 + $0x78] ss:$2 sm:$0xff]  ;;  %v252_v26 = vmax.f32 %v235_v15, %v236_v16  ;;  %v238_v27 = vmax.f32 %v221_v21, %v384_v19  ;;  %v370_v28 = vld [vmem:[%s442_s11 + $0x91] ss:$2 sm:$0xff]  ;;  %v354_v34 = vld [vmem:[%s442_s11 + $0xa8] ss:$2 sm:$0xff] }
  0x18   : > { %v386_v29 = vld [vmem:[%s442_s11 + $0x7a] ss:$2 sm:$0xff]  ;;  %v223_v31 = vmax.f32 %v352_v23, %v369_v25  ;;  %v239_v32 = vmax.f32 %v222_v22, %v385_v20  ;;  %v224_v33 = vmax.f32 %v353_v24, %v370_v28  ;;  %v371_v36 = vld [vmem:[%s442_s11 + $0xa9] ss:$2 sm:$0xff]  ;;  %v388_v41 = vld [vmem:[%s442_s11 + $0xaa] ss:$2 sm:$0xff] }
  0x19   : > { %v355_v35 = vld [vmem:[%s442_s11 + $0xc0] ss:$2 sm:$0xff]  ;;  %v260_v37 = vmax.f32 %v252_v26, %v237_v17  ;;  %v253_v38 = vmax.f32 %v237_v17, %v238_v27  ;;  %v372_v40 = vld [vmem:[%s442_s11 + $0xc1] ss:$2 sm:$0xff]  ;;  %v225_v43 = vmax.f32 %v354_v34, %v371_v36  ;;  %v357_v47 = vld [vmem:[%s442_s11 + $0xf0] ss:$2 sm:$0xff] }
  0x1a   : > { %v240_v39 = vmax.f32 %v223_v31, %v386_v29  ;;  %v389_v42 = vld [vmem:[%s442_s11 + $0xc2] ss:$2 sm:$0xff]  ;;  %v241_v44 = vmax.f32 %v224_v33, %v387_v30  ;;  %v226_v45 = vmax.f32 %v355_v35, %v372_v40  ;;  %v373_v48 = vld [vmem:[%s442_s11 + $0xd9] ss:$2 sm:$0xff]  ;;  %v391_v55 = vld [vmem:[%s442_s11 + $0xf2] ss:$2 sm:$0xff] }
  0x1b   : > { %v356_v46 = vld [vmem:[%s442_s11 + $0xd8] ss:$2 sm:$0xff]  ;;  %v268_v49 = vpack.c.bf16 %v260_v37, %v260_v37  ;;  %v261_v50 = vmax.f32 %v253_v38, %v239_v32  ;;  %v242_v52 = vmax.f32 %v225_v43, %v388_v41  ;;  %v374_v53 = vld [vmem:[%s442_s11 + $0xf1] ss:$2 sm:$0xff]  ;;  %v358_v59 = vld [vmem:[%s442_s11 + $0x108] ss:$2 sm:$0xff] }
  0x1c   : > { %v254_v51 = vmax.f32 %v239_v32, %v240_v39  ;;  %v390_v54 = vld [vmem:[%s442_s11 + $0xda] ss:$2 sm:$0xff]  ;;  %v243_v56 = vmax.f32 %v226_v45, %v389_v42  ;;  %v227_v57 = vmax.f32 %v356_v46, %v373_v48  ;;  %v228_v58 = vmax.f32 %v357_v47, %v374_v53  ;;  %v375_v61 = vld [vmem:[%s442_s11 + $0x109] ss:$2 sm:$0xff]  ;;  %v392_v2 = vld [vmem:[%s442_s11 + $0x10a] ss:$2 sm:$0xff] }
  0x1d   : > { %v359_v60 = vld [vmem:[%s442_s11 + $0x120] ss:$2 sm:$0xff]  ;;  %277 = vst.msk [vmem:[%s477_s15] sm:$0xf] %vm276_vm0, %v268_v49  ;;  %v269_v62 = vpack.c.bf16 %v261_v50, %v261_v50  ;;  %v255_v0 = vmax.f32 %v241_v44, %v242_v52  ;;  %v376_v1 = vld [vmem:[%s442_s11 + $0x121] ss:$2 sm:$0xff]  ;;  %v229_v4 = vmax.f32 %v358_v59, %v375_v61 }
  0x1e   : > { %v262_v63 = vmax.f32 %v254_v51, %v241_v44  ;;  %v393_v3 = vld [vmem:[%s442_s11 + $0x122] ss:$2 sm:$0xff]  ;;  %v244_v5 = vmax.f32 %v227_v57, %v390_v54  ;;  %v245_v6 = vmax.f32 %v228_v58, %v391_v55  ;;  %v230_v7 = vmax.f32 %v359_v60, %v376_v1  ;;  %v377_v10 = vld [vmem:[%s442_s11 + $0x139] ss:$2 sm:$0xff]  ;;  %v395_v16 = vld [vmem:[%s442_s11 + $0x152] ss:$2 sm:$0xff] }
  0x1f   : > { %v360_v8 = vld [vmem:[%s442_s11 + $0x138] ss:$2 sm:$0xff]  ;;  %278 = vst.msk [vmem:[%s477_s15 + $0x4] sm:$0xf] %vm276_vm0, %v269_v62  ;;  %v263_v12 = vmax.f32 %v255_v0, %v243_v56  ;;  %v246_v13 = vmax.f32 %v229_v4, %v392_v2  ;;  %v378_v14 = vld [vmem:[%s442_s11 + $0x151] ss:$2 sm:$0xff] }
  0x20   : > { %v361_v9 = vld [vmem:[%s442_s11 + $0x150] ss:$2 sm:$0xff]  ;;  %v270_v11 = vpack.c.bf16 %v262_v63, %v262_v63  ;;  %v231_v17 = vmax.f32 %v360_v8, %v377_v10  ;;  %v256_v18 = vmax.f32 %v243_v56, %v244_v5  ;;  %v247_v19 = vmax.f32 %v230_v7, %v393_v3  ;;  %v363_v22 = vld [vmem:[%s442_s11 + $0x180] ss:$2 sm:$0xff]  ;;  %v379_v23 = vld [vmem:[%s442_s11 + $0x169] ss:$2 sm:$0xff] }
  0x21   : > { %v394_v15 = vld [vmem:[%s442_s11 + $0x13a] ss:$2 sm:$0xff]  ;;  %v232_v20 = vmax.f32 %v361_v9, %v378_v14  ;;  %v271_v24 = vpack.c.bf16 %v263_v12, %v263_v12  ;;  %v257_v25 = vmax.f32 %v245_v6, %v246_v13  ;;  %v380_v27 = vld [vmem:[%s442_s11 + $0x181] ss:$2 sm:$0xff]  ;;  %v396_v28 = vld [vmem:[%s442_s11 + $0x16a] ss:$2 sm:$0xff] }
  0x22   : > { %v362_v21 = vld [vmem:[%s442_s11 + $0x168] ss:$2 sm:$0xff]  ;;  %279 = vst.msk [vmem:[%s477_s15 + $0x8] sm:$0xf] %vm276_vm0, %v270_v11  ;;  %v248_v26 = vmax.f32 %v231_v17, %v394_v15  ;;  %v264_v31 = vmax.f32 %v256_v18, %v245_v6  ;;  %v234_v33 = vmax.f32 %v363_v22, %v380_v27 }
  0x23   : > { %v397_v29 = vld [vmem:[%s442_s11 + $0x182] ss:$2 sm:$0xff]  ;;  %v233_v30 = vmax.f32 %v362_v21, %v379_v23  ;;  %v249_v32 = vmax.f32 %v232_v20, %v395_v16  ;;  %280 = vst.msk [vmem:[%s477_s15 + $0xc] sm:$0xf] %vm276_vm0, %v271_v24  ;;  %v265_v34 = vmax.f32 %v257_v25, %v247_v19 }
  0x24   : > { %v258_v35 = vmax.f32 %v247_v19, %v248_v26  ;;  %v272_v37 = vpack.c.bf16 %v264_v31, %v264_v31  ;;  %v251_v38 = vmax.f32 %v234_v33, %v397_v29 }
  0x25   : > { %v250_v36 = vmax.f32 %v233_v30, %v396_v28  ;;  %v273_v39 = vpack.c.bf16 %v265_v34, %v265_v34 }
  0x26   : > { %v266_v40 = vmax.f32 %v258_v35, %v249_v32  ;;  %281 = vst.msk [vmem:[%s477_s15 + $0x10] sm:$0xf] %vm276_vm0, %v272_v37 }
  0x27   : > { %v259_v41 = vmax.f32 %v249_v32, %v250_v36  ;;  %282 = vst.msk [vmem:[%s477_s15 + $0x14] sm:$0xf] %vm276_vm0, %v273_v39 }
  0x28   : > { %v274_v42 = vpack.c.bf16 %v266_v40, %v266_v40 }
  0x29   : > { %v267_v43 = vmax.f32 %v259_v41, %v251_v38 }
  0x2a   : > { %283 = vst.msk [vmem:[%s477_s15 + $0x18] sm:$0xf] %vm276_vm0, %v274_v42 }
  0x2b   : > { %v275_v44 = vpack.c.bf16 %v267_v43, %v267_v43 }
  0x2d   : > { %284 = vst.msk [vmem:[%s477_s15 + $0x1c] sm:$0xf] %vm276_vm0, %v275_v44 }
  0x2e PF: > { %s11_s6 = sadd.s32 1, %s416_s6  }
  0x2f   : > { %p8_p4 = scmp.ge.s32.totalorder %s11_s6, 6  }
  0x31   :  { %10 = sbr.rel (!%p8_p4) target bundleno = 1 (0x1), region = 104 }

// kernel: model_forward.4
= control target key start
LH: loop header
LB: loop body
LE: loop exit
PB: predicated region body
PF: predicated region fallthrough
CT: control target
= control target key end

     0   :  { %s1408_s15 = smov 0   ;;  %s1755_s0 = inlined_call_operand.vmem [shape: bf16[1024,128], index: 0, kind: input, shape index: {}]   ;;  %s1756_s1 = inlined_call_operand.vmem [shape: bf16[128,64], index: 1, kind: input, shape index: {}]   ;;  %s1757_s2 = inlined_call_operand.vmem [shape: f32[1,64], index: 2, kind: input, shape index: {}]   ;;  %s1758_s3 = inlined_call_operand.vmem [shape: f32[1,64], index: 3, kind: input, shape index: {}]   ;;  %s1759_s4 = inlined_call_operand.vmem [shape: f32[1024,64], index: 4, kind: output, shape index: {}]  }
   0x1 LB: > { %s1138_s16 = sadd.s32 4294967295, %s1381_s15   ;;  %p1142_p0 = scmp.ge.s32.totalorder %s1381_s15, 1  ;;  %s1381_s15 = sphi %s1408_s15, %s14_s15  }
   0x2   : > { %p163_p1 = scmp.lt.s32.totalorder %s1381_s15, 3 }
   0x4   : > { %p164_p2 = pnand %p1142_p0, %p163_p1 }
   0x5   : > { %v1335_v0 = vld [vmem:[%s1756_s1] sm:$0xff] (!%p164_p2)   ;;  %s1143_s19 = sshll.u32 (!%p164_p2), %s1138_s16, 6  ;;  %v1336_v1 = vld [vmem:[%s1756_s1 + $0x8] sm:$0xff] (!%p164_p2)   ;;  %v1337_v2 = vld [vmem:[%s1756_s1 + $0x10] sm:$0xff] (!%p164_p2)   ;;  %vm1017_vm0 = vcmask (!%p164_p2), 523264  }
   0x6   : > { %167 = sbr.rel (%p164_p2) target bundleno = 316 (0x13c), region = 36  ;;  %p190_p3 = scmp.lt.s32.totalorder (!%p164_p2), %s1143_s19, 127  ;;  %1231 = vmatprep.subr.bf16.mxu0 (!%p164_p2), %v1335_v0  ;;  %1311 = vmatprep.subr.bf16.mxu1 (!%p164_p2), %v1335_v0  ;;  %v1338_v3 = vld [vmem:[%s1756_s1 + $0x18] sm:$0xff] (!%p164_p2)   ;;  %v1339_v6 = vld [vmem:[%s1756_s1 + $0x20] sm:$0xff] (!%p164_p2)   ;;  %v1340_v7 = vld [vmem:[%s1756_s1 + $0x28] sm:$0xff] (!%p164_p2)  }
   0x7   : > { %1232 = vmatpush3.bf16.msra.mxu0 (!%p164_p2), %v1335_v0  ;;  %1319 = vmatpush3.bf16.msra.mxu1 (!%p164_p2), %v1335_v0  ;;  %v1341_v8 = vld [vmem:[%s1756_s1 + $0x30] sm:$0xff] (!%p164_p2)   ;;  %v1342_v9 = vld [vmem:[%s1756_s1 + $0x38] sm:$0xff] (!%p164_p2)   ;;  %v1483_v40 = vld [vmem:[%s1757_s2] ss:$0 sm:$0xff] (!%p164_p2) }
   0x8   : > { %1233 = vmatprep.subr.bf16.mxu0 (!%p164_p2), %v1336_v1  ;;  %1312 = vmatprep.subr.bf16.mxu1 (!%p164_p2), %v1336_v1  ;;  %v1488_v42 = vld [vmem:[%s1758_s3] ss:$0 sm:$0xff] (!%p164_p2) }
   0xb   : > { %1234 = vmatpush3.bf16.msra.mxu0 (!%p164_p2), %v1336_v1  ;;  %1320 = vmatpush3.bf16.msra.mxu1 (!%p164_p2), %v1336_v1 }
   0xc   : > { %1235 = vmatprep.subr.bf16.mxu0 (!%p164_p2), %v1337_v2  ;;  %1313 = vmatprep.subr.bf16.mxu1 (!%p164_p2), %v1337_v2 }
   0xd   : > { %s1761_s19 = smov (!%p190_p3, %s1143_s19), 127 }
   0xe   : > { %s1144_s24 = sshll.u32 %s1761_s19, 2  ;;  %s1146_s17 = sshll.u32 %s1761_s19, 3 }
   0xf   : > { %s1431_s27 = scalar_lea.vmem %s1755_s0, %s1144_s24  ;;  %1236 = vmatpush3.bf16.msra.mxu0 %v1337_v2  ;;  %1321 = vmatpush3.bf16.msra.mxu1 %v1337_v2  ;;  %s1502_s20 = scalar_lea.vmem %s1759_s4, %s1146_s17 }
  0x10   : > { %v1343_v4 = vld [vmem:[%s1431_s27] sm:$0xff]   ;;  %1237 = vmatprep.subr.bf16.mxu0 %v1338_v3  ;;  %1314 = vmatprep.subr.bf16.mxu1 %v1338_v3  ;;  %v1345_v10 = vld [vmem:[%s1431_s27 + $0x8] sm:$0xff]   ;;  %v1347_v12 = vld [vmem:[%s1431_s27 + $0x10] sm:$0xff]  }
  0x11   : > { %v1344_v5 = vld [vmem:[%s1431_s27 + $0x80] sm:$0xff]   ;;  %1247 = vmatprep.mubr.bf16.mxu0 %v1343_v4  ;;  %v1346_v11 = vld [vmem:[%s1431_s27 + $0x88] sm:$0xff]   ;;  %v1348_v13 = vld [vmem:[%s1431_s27 + $0x90] sm:$0xff]  }
  0x12   : > { %1279 = vmatprep.mubr.bf16.mxu1 %v1344_v5  ;;  %v1349_v14 = vld [vmem:[%s1431_s27 + $0x18] sm:$0xff]   ;;  %v1351_v16 = vld [vmem:[%s1431_s27 + $0x20] sm:$0xff]   ;;  %v1353_v18 = vld [vmem:[%s1431_s27 + $0x28] sm:$0xff]  }
  0x13   : > { %1238 = vmatpush3.bf16.msra.mxu0 %v1338_v3  ;;  %1322 = vmatpush3.bf16.msra.mxu1 %v1338_v3  ;;  %v1350_v15 = vld [vmem:[%s1431_s27 + $0x98] sm:$0xff]   ;;  %v1352_v17 = vld [vmem:[%s1431_s27 + $0xa0] sm:$0xff]   ;;  %v1354_v19 = vld [vmem:[%s1431_s27 + $0xa8] sm:$0xff]  }
  0x14   : > { %1239 = vmatprep.subr.bf16.mxu0 %v1339_v6  ;;  %1315 = vmatprep.subr.bf16.mxu1 %v1339_v6  ;;  %v1355_v20 = vld [vmem:[%s1431_s27 + $0x30] sm:$0xff]   ;;  %v1357_v22 = vld [vmem:[%s1431_s27 + $0x38] sm:$0xff]   ;;  %v1359_v24 = vld [vmem:[%s1431_s27 + $0x40] sm:$0xff]  }
  0x15   : > { %v1356_v21 = vld [vmem:[%s1431_s27 + $0xb0] sm:$0xff]   ;;  %v1358_v23 = vld [vmem:[%s1431_s27 + $0xb8] sm:$0xff]   ;;  %v1360_v25 = vld [vmem:[%s1431_s27 + $0xc0] sm:$0xff]  }
  0x16   : > { %v1361_v26 = vld [vmem:[%s1431_s27 + $0x48] sm:$0xff]   ;;  %v1363_v28 = vld [vmem:[%s1431_s27 + $0x50] sm:$0xff]   ;;  %v1365_v30 = vld [vmem:[%s1431_s27 + $0x58] sm:$0xff]  }
  0x17   : > { %1240 = vmatpush3.bf16.msra.mxu0 %v1339_v6  ;;  %1323 = vmatpush3.bf16.msra.mxu1 %v1339_v6  ;;  %v1362_v27 = vld [vmem:[%s1431_s27 + $0xc8] sm:$0xff]   ;;  %v1364_v29 = vld [vmem:[%s1431_s27 + $0xd0] sm:$0xff]   ;;  %v1366_v31 = vld [vmem:[%s1431_s27 + $0xd8] sm:$0xff]  }
  0x18   : > { %1241 = vmatprep.subr.bf16.mxu0 %v1340_v7  ;;  %1316 = vmatprep.subr.bf16.mxu1 %v1340_v7  ;;  %v1367_v32 = vld [vmem:[%s1431_s27 + $0x60] sm:$0xff]   ;;  %v1369_v34 = vld [vmem:[%s1431_s27 + $0x68] sm:$0xff]   ;;  %v1371_v36 = vld [vmem:[%s1431_s27 + $0x70] sm:$0xff]  }
  0x19   : > { %v1368_v33 = vld [vmem:[%s1431_s27 + $0xe0] sm:$0xff]   ;;  %v1370_v35 = vld [vmem:[%s1431_s27 + $0xe8] sm:$0xff]   ;;  %v1372_v37 = vld [vmem:[%s1431_s27 + $0xf0] sm:$0xff]  }
  0x1a   : > { %v1373_v38 = vld [vmem:[%s1431_s27 + $0x78] sm:$0xff]  }
  0x1b   : > { %1242 = vmatpush3.bf16.msra.mxu0 %v1340_v7  ;;  %1324 = vmatpush3.bf16.msra.mxu1 %v1340_v7  ;;  %v1374_v39 = vld [vmem:[%s1431_s27 + $0xf8] sm:$0xff]  }
  0x1c   : > { %1243 = vmatprep.subr.bf16.mxu0 %v1341_v8  ;;  %1317 = vmatprep.subr.bf16.mxu1 %v1341_v8 }
  0x1f   : > { %1244 = vmatpush3.bf16.msra.mxu0 %v1341_v8  ;;  %1325 = vmatpush3.bf16.msra.mxu1 %v1341_v8 }
  0x20   : > { %1245 = vmatprep.subr.bf16.mxu0 %v1342_v9  ;;  %1318 = vmatprep.subr.bf16.mxu1 %v1342_v9 }
  0x23   : > { %1246 = vmatpush3.bf16.msra.mxu0 %v1342_v9  ;;  %1326 = vmatpush3.bf16.msra.mxu1 %v1342_v9 }
  0x26   : > { %1248 = vmatmul.mubr.bf16.vlgmr.msra.gmra.mrb[0].mxu0 %v1345_v10  ;;  %1280 = vmatmul.mubr.bf16.vlgmr.msra.gmra.mrb[0].mxu1 %v1346_v11 }
  0x27   : > { %1251 = vmatprep.mubr.bf16.mxu0 %v1347_v12  ;;  %1283 = vmatprep.mubr.bf16.mxu1 %v1348_v13 }
  0x2e   : > { %1252 = vmatmul.mubr.bf16.gmra.mrb[4].mxu0 %v1349_v14  ;;  %1284 = vmatmul.mubr.bf16.gmra.mrb[4].mxu1 %v1350_v15 }
  0x2f   : > { %1255 = vmatprep.mubr.bf16.mxu0 %v1351_v16  ;;  %1287 = vmatprep.mubr.bf16.mxu1 %v1352_v17 }
  0x36   : > { %1256 = vmatmul.mubr.bf16.gmra.mrb[8].mxu0 %v1353_v18  ;;  %1288 = vmatmul.mubr.bf16.gmra.mrb[8].mxu1 %v1354_v19 }
  0x37   : > { %1259 = vmatprep.mubr.bf16.mxu0 %v1355_v20  ;;  %1291 = vmatprep.mubr.bf16.mxu1 %v1356_v21 }
  0x3e   : > { %1260 = vmatmul.mubr.bf16.gmra.mrb[12].mxu0 %v1357_v22  ;;  %1292 = vmatmul.mubr.bf16.gmra.mrb[12].mxu1 %v1358_v23 }
  0x3f   : > { %1263 = vmatprep.mubr.bf16.mxu0 %v1359_v24  ;;  %1295 = vmatprep.mubr.bf16.mxu1 %v1360_v25 }
  0x46   : > { %1264 = vmatmul.mubr.bf16.gmra.mrb[16].mxu0 %v1361_v26  ;;  %1296 = vmatmul.mubr.bf16.gmra.mrb[16].mxu1 %v1362_v27 }
  0x47   : > { %1267 = vmatprep.mubr.bf16.mxu0 %v1363_v28  ;;  %1299 = vmatprep.mubr.bf16.mxu1 %v1364_v29 }
  0x4e   : > { %1268 = vmatmul.mubr.bf16.gmra.mrb[20].mxu0 %v1365_v30  ;;  %1300 = vmatmul.mubr.bf16.gmra.mrb[20].mxu1 %v1366_v31 }
  0x4f   : > { %1271 = vmatprep.mubr.bf16.mxu0 %v1367_v32  ;;  %1303 = vmatprep.mubr.bf16.mxu1 %v1368_v33 }
  0x56   : > { %1272 = vmatmul.mubr.bf16.gmra.mrb[24].mxu0 %v1369_v34  ;;  %1304 = vmatmul.mubr.bf16.gmra.mrb[24].mxu1 %v1370_v35 }
  0x57   : > { %1275 = vmatprep.mubr.bf16.mxu0 %v1371_v36  ;;  %1307 = vmatprep.mubr.bf16.mxu1 %v1372_v37 }
  0x5e   : > { %1276 = vmatmul.mubr.bf16.gmra.mrb[28].mxu0 %v1373_v38  ;;  %1308 = vmatmul.mubr.bf16.gmra.mrb[28].mxu1 %v1374_v39 }
  0xf9   : > { %v1249_v41 = vpop.f32.mrb[0].mxu0  ;;  %v1281_v43 = vpop.f32.mrb[0].mxu1 }
  0xfa   : > { %v820_v44 = vmul.f32 %v1249_v41, %v1483_v40  ;;  %v852_v45 = vmul.f32 %v1281_v43, %v1483_v40  ;;  %v556_v46 = vpop.f32.mrb[1].mxu0  ;;  %v684_v47 = vpop.f32.mrb[1].mxu1 }
  0xfb   : > { %v818_v48 = vmul.f32 %v1483_v40, %v556_v46  ;;  %v850_v49 = vmul.f32 %v1483_v40, %v684_v47  ;;  %v1250_v50 = vpop.f32.mrb[2].mxu0  ;;  %v1282_v51 = vpop.f32.mrb[2].mxu1 }
  0xfc   : > { %v891_v52 = vadd.f32 %v1488_v42, %v820_v44  ;;  %v923_v53 = vadd.f32 %v1488_v42, %v852_v45  ;;  %v821_v54 = vmul.f32 %v1250_v50, %v1483_v40  ;;  %v853_v55 = vmul.f32 %v1282_v51, %v1483_v40  ;;  %v559_v56 = vpop.f32.mrb[3].mxu0  ;;  %v687_v57 = vpop.f32.mrb[3].mxu1 }
  0xfd   : > { %v889_v58 = vadd.f32 %v1488_v42, %v818_v48  ;;  %v921_v59 = vadd.f32 %v1488_v42, %v850_v49  ;;  %v819_v60 = vmul.f32 %v1483_v40, %v559_v56  ;;  %v851_v61 = vmul.f32 %v1483_v40, %v687_v57 }
  0xfe   : > { %v955_v62 = vmax.f32 %v891_v52, 0.0  ;;  %v987_v63 = vmax.f32 %v923_v53, 0.0  ;;  %v892_v0 = vadd.f32 %v1488_v42, %v821_v54  ;;  %v924_v1 = vadd.f32 %v1488_v42, %v853_v55 }
  0xff   : > { %v953_v2 = vmax.f32 %v889_v58, 0.0  ;;  %v985_v3 = vmax.f32 %v921_v59, 0.0  ;;  %v890_v4 = vadd.f32 %v1488_v42, %v819_v60  ;;  %v922_v5 = vadd.f32 %v1488_v42, %v851_v61 }
 0x100   : > { %1020 = vst.msk [vmem:[%s1502_s20 + $0x10] sm:$0xff] %vm1017_vm0, %v955_v62  ;;  %1052 = vst.msk [vmem:[%s1502_s20 + $0x110] sm:$0xff] %vm1017_vm0, %v987_v63  ;;  %v956_v6 = vmax.f32 %v892_v0, 0.0  ;;  %v988_v7 = vmax.f32 %v924_v1, 0.0 }
 0x101   : > { %1018 = vst.msk [vmem:[%s1502_s20] sm:$0xff] %vm1017_vm0, %v953_v2  ;;  %1050 = vst.msk [vmem:[%s1502_s20 + $0x100] sm:$0xff] %vm1017_vm0, %v985_v3  ;;  %v954_v8 = vmax.f32 %v890_v4, 0.0  ;;  %v986_v9 = vmax.f32 %v922_v5, 0.0  ;;  %v1253_v10 = vpop.f32.mrb[4].mxu0  ;;  %v1285_v11 = vpop.f32.mrb[4].mxu1 }
 0x102   : > { %1021 = vst.msk [vmem:[%s1502_s20 + $0x18] sm:$0xff] %vm1017_vm0, %v956_v6  ;;  %1053 = vst.msk [vmem:[%s1502_s20 + $0x118] sm:$0xff] %vm1017_vm0, %v988_v7  ;;  %v824_v12 = vmul.f32 %v1253_v10, %v1483_v40  ;;  %v856_v13 = vmul.f32 %v1285_v11, %v1483_v40  ;;  %v572_v14 = vpop.f32.mrb[5].mxu0  ;;  %v700_v15 = vpop.f32.mrb[5].mxu1 }
 0x103   : > { %1019 = vst.msk [vmem:[%s1502_s20 + $0x8] sm:$0xff] %vm1017_vm0, %v954_v8  ;;  %1051 = vst.msk [vmem:[%s1502_s20 + $0x108] sm:$0xff] %vm1017_vm0, %v986_v9  ;;  %v822_v16 = vmul.f32 %v1483_v40, %v572_v14  ;;  %v854_v17 = vmul.f32 %v1483_v40, %v700_v15  ;;  %v1254_v18 = vpop.f32.mrb[6].mxu0  ;;  %v1286_v19 = vpop.f32.mrb[6].mxu1 }
 0x104   : > { %v895_v20 = vadd.f32 %v1488_v42, %v824_v12  ;;  %v927_v21 = vadd.f32 %v1488_v42, %v856_v13  ;;  %v825_v22 = vmul.f32 %v1254_v18, %v1483_v40  ;;  %v857_v23 = vmul.f32 %v1286_v19, %v1483_v40  ;;  %v575_v24 = vpop.f32.mrb[7].mxu0  ;;  %v703_v25 = vpop.f32.mrb[7].mxu1 }
 0x105   : > { %v893_v26 = vadd.f32 %v1488_v42, %v822_v16  ;;  %v925_v27 = vadd.f32 %v1488_v42, %v854_v17  ;;  %v823_v28 = vmul.f32 %v1483_v40, %v575_v24  ;;  %v855_v29 = vmul.f32 %v1483_v40, %v703_v25 }
 0x106   : > { %v959_v30 = vmax.f32 %v895_v20, 0.0  ;;  %v991_v31 = vmax.f32 %v927_v21, 0.0  ;;  %v896_v32 = vadd.f32 %v1488_v42, %v825_v22  ;;  %v928_v33 = vadd.f32 %v1488_v42, %v857_v23 }
 0x107   : > { %v957_v34 = vmax.f32 %v893_v26, 0.0  ;;  %v989_v35 = vmax.f32 %v925_v27, 0.0  ;;  %v894_v36 = vadd.f32 %v1488_v42, %v823_v28  ;;  %v926_v37 = vadd.f32 %v1488_v42, %v855_v29 }
 0x108   : > { %1024 = vst.msk [vmem:[%s1502_s20 + $0x30] sm:$0xff] %vm1017_vm0, %v959_v30  ;;  %1056 = vst.msk [vmem:[%s1502_s20 + $0x130] sm:$0xff] %vm1017_vm0, %v991_v31  ;;  %v960_v38 = vmax.f32 %v896_v32, 0.0  ;;  %v992_v39 = vmax.f32 %v928_v33, 0.0 }
 0x109   : > { %1022 = vst.msk [vmem:[%s1502_s20 + $0x20] sm:$0xff] %vm1017_vm0, %v957_v34  ;;  %1054 = vst.msk [vmem:[%s1502_s20 + $0x120] sm:$0xff] %vm1017_vm0, %v989_v35  ;;  %v958_v41 = vmax.f32 %v894_v36, 0.0  ;;  %v990_v43 = vmax.f32 %v926_v37, 0.0  ;;  %v1257_v44 = vpop.f32.mrb[8].mxu0  ;;  %v1289_v45 = vpop.f32.mrb[8].mxu1 }
 0x10a   : > { %1025 = vst.msk [vmem:[%s1502_s20 + $0x38] sm:$0xff] %vm1017_vm0, %v960_v38  ;;  %1057 = vst.msk [vmem:[%s1502_s20 + $0x138] sm:$0xff] %vm1017_vm0, %v992_v39  ;;  %v828_v46 = vmul.f32 %v1257_v44, %v1483_v40  ;;  %v860_v47 = vmul.f32 %v1289_v45, %v1483_v40  ;;  %v588_v48 = vpop.f32.mrb[9].mxu0  ;;  %v716_v49 = vpop.f32.mrb[9].mxu1 }
 0x10b   : > { %1023 = vst.msk [vmem:[%s1502_s20 + $0x28] sm:$0xff] %vm1017_vm0, %v958_v41  ;;  %1055 = vst.msk [vmem:[%s1502_s20 + $0x128] sm:$0xff] %vm1017_vm0, %v990_v43  ;;  %v826_v50 = vmul.f32 %v1483_v40, %v588_v48  ;;  %v858_v51 = vmul.f32 %v1483_v40, %v716_v49  ;;  %v1258_v52 = vpop.f32.mrb[10].mxu0  ;;  %v1290_v53 = vpop.f32.mrb[10].mxu1 }
 0x10c   : > { %v899_v54 = vadd.f32 %v1488_v42, %v828_v46  ;;  %v931_v55 = vadd.f32 %v1488_v42, %v860_v47  ;;  %v829_v56 = vmul.f32 %v1258_v52, %v1483_v40  ;;  %v861_v57 = vmul.f32 %v1290_v53, %v1483_v40  ;;  %v591_v58 = vpop.f32.mrb[11].mxu0  ;;  %v719_v59 = vpop.f32.mrb[11].mxu1 }
 0x10d   : > { %v897_v60 = vadd.f32 %v1488_v42, %v826_v50  ;;  %v929_v61 = vadd.f32 %v1488_v42, %v858_v51  ;;  %v827_v62 = vmul.f32 %v1483_v40, %v591_v58  ;;  %v859_v63 = vmul.f32 %v1483_v40, %v719_v59 }
 0x10e   : > { %v963_v0 = vmax.f32 %v899_v54, 0.0  ;;  %v995_v1 = vmax.f32 %v931_v55, 0.0  ;;  %v900_v2 = vadd.f32 %v1488_v42, %v829_v56  ;;  %v932_v3 = vadd.f32 %v1488_v42, %v861_v57 }
 0x10f   : > { %v961_v4 = vmax.f32 %v897_v60, 0.0  ;;  %v993_v5 = vmax.f32 %v929_v61, 0.0  ;;  %v898_v6 = vadd.f32 %v1488_v42, %v827_v62  ;;  %v930_v7 = vadd.f32 %v1488_v42, %v859_v63 }
 0x110   : > { %1028 = vst.msk [vmem:[%s1502_s20 + $0x50] sm:$0xff] %vm1017_vm0, %v963_v0  ;;  %1060 = vst.msk [vmem:[%s1502_s20 + $0x150] sm:$0xff] %vm1017_vm0, %v995_v1  ;;  %v964_v8 = vmax.f32 %v900_v2, 0.0  ;;  %v996_v9 = vmax.f32 %v932_v3, 0.0 }
 0x111   : > { %1026 = vst.msk [vmem:[%s1502_s20 + $0x40] sm:$0xff] %vm1017_vm0, %v961_v4  ;;  %1058 = vst.msk [vmem:[%s1502_s20 + $0x140] sm:$0xff] %vm1017_vm0, %v993_v5  ;;  %v962_v10 = vmax.f32 %v898_v6, 0.0  ;;  %v994_v11 = vmax.f32 %v930_v7, 0.0  ;;  %v1261_v12 = vpop.f32.mrb[12].mxu0  ;;  %v1293_v13 = vpop.f32.mrb[12].mxu1 }
 0x112   : > { %1029 = vst.msk [vmem:[%s1502_s20 + $0x58] sm:$0xff] %vm1017_vm0, %v964_v8  ;;  %1061 = vst.msk [vmem:[%s1502_s20 + $0x158] sm:$0xff] %vm1017_vm0, %v996_v9  ;;  %v832_v14 = vmul.f32 %v1261_v12, %v1483_v40  ;;  %v864_v15 = vmul.f32 %v1293_v13, %v1483_v40  ;;  %v604_v16 = vpop.f32.mrb[13].mxu0  ;;  %v732_v17 = vpop.f32.mrb[13].mxu1 }
 0x113   : > { %1027 = vst.msk [vmem:[%s1502_s20 + $0x48] sm:$0xff] %vm1017_vm0, %v962_v10  ;;  %1059 = vst.msk [vmem:[%s1502_s20 + $0x148] sm:$0xff] %vm1017_vm0, %v994_v11  ;;  %v830_v18 = vmul.f32 %v1483_v40, %v604_v16  ;;  %v862_v19 = vmul.f32 %v1483_v40, %v732_v17  ;;  %v1262_v20 = vpop.f32.mrb[14].mxu0  ;;  %v1294_v21 = vpop.f32.mrb[14].mxu1 }
 0x114   : > { %v903_v22 = vadd.f32 %v1488_v42, %v832_v14  ;;  %v935_v23 = vadd.f32 %v1488_v42, %v864_v15  ;;  %v833_v24 = vmul.f32 %v1262_v20, %v1483_v40  ;;  %v865_v25 = vmul.f32 %v1294_v21, %v1483_v40  ;;  %v607_v26 = vpop.f32.mrb[15].mxu0  ;;  %v735_v27 = vpop.f32.mrb[15].mxu1 }
 0x115   : > { %v901_v28 = vadd.f32 %v1488_v42, %v830_v18  ;;  %v933_v29 = vadd.f32 %v1488_v42, %v862_v19  ;;  %v831_v30 = vmul.f32 %v1483_v40, %v607_v26  ;;  %v863_v31 = vmul.f32 %v1483_v40, %v735_v27 }
 0x116   : > { %v967_v32 = vmax.f32 %v903_v22, 0.0  ;;  %v999_v33 = vmax.f32 %v935_v23, 0.0  ;;  %v904_v34 = vadd.f32 %v1488_v42, %v833_v24  ;;  %v936_v35 = vadd.f32 %v1488_v42, %v865_v25 }
 0x117   : > { %v965_v36 = vmax.f32 %v901_v28, 0.0  ;;  %v997_v37 = vmax.f32 %v933_v29, 0.0  ;;  %v902_v38 = vadd.f32 %v1488_v42, %v831_v30  ;;  %v934_v39 = vadd.f32 %v1488_v42, %v863_v31 }
 0x118   : > { %1032 = vst.msk [vmem:[%s1502_s20 + $0x70] sm:$0xff] %vm1017_vm0, %v967_v32  ;;  %1064 = vst.msk [vmem:[%s1502_s20 + $0x170] sm:$0xff] %vm1017_vm0, %v999_v33  ;;  %v968_v41 = vmax.f32 %v904_v34, 0.0  ;;  %v1000_v43 = vmax.f32 %v936_v35, 0.0 }
 0x119   : > { %1030 = vst.msk [vmem:[%s1502_s20 + $0x60] sm:$0xff] %vm1017_vm0, %v965_v36  ;;  %1062 = vst.msk [vmem:[%s1502_s20 + $0x160] sm:$0xff] %vm1017_vm0, %v997_v37  ;;  %v966_v44 = vmax.f32 %v902_v38, 0.0  ;;  %v998_v45 = vmax.f32 %v934_v39, 0.0  ;;  %v1265_v46 = vpop.f32.mrb[16].mxu0  ;;  %v1297_v47 = vpop.f32.mrb[16].mxu1 }
 0x11a   : > { %1033 = vst.msk [vmem:[%s1502_s20 + $0x78] sm:$0xff] %vm1017_vm0, %v968_v41  ;;  %1065 = vst.msk [vmem:[%s1502_s20 + $0x178] sm:$0xff] %vm1017_vm0, %v1000_v43  ;;  %v836_v48 = vmul.f32 %v1265_v46, %v1483_v40  ;;  %v868_v49 = vmul.f32 %v1297_v47, %v1483_v40  ;;  %v620_v50 = vpop.f32.mrb[17].mxu0  ;;  %v748_v51 = vpop.f32.mrb[17].mxu1 }
 0x11b   : > { %1031 = vst.msk [vmem:[%s1502_s20 + $0x68] sm:$0xff] %vm1017_vm0, %v966_v44  ;;  %1063 = vst.msk [vmem:[%s1502_s20 + $0x168] sm:$0xff] %vm1017_vm0, %v998_v45  ;;  %v834_v52 = vmul.f32 %v1483_v40, %v620_v50  ;;  %v866_v53 = vmul.f32 %v1483_v40, %v748_v51  ;;  %v1266_v54 = vpop.f32.mrb[18].mxu0  ;;  %v1298_v55 = vpop.f32.mrb[18].mxu1 }
 0x11c   : > { %v907_v56 = vadd.f32 %v1488_v42, %v836_v48  ;;  %v939_v57 = vadd.f32 %v1488_v42, %v868_v49  ;;  %v837_v58 = vmul.f32 %v1266_v54, %v1483_v40  ;;  %v869_v59 = vmul.f32 %v1298_v55, %v1483_v40  ;;  %v623_v60 = vpop.f32.mrb[19].mxu0  ;;  %v751_v61 = vpop.f32.mrb[19].mxu1 }
 0x11d   : > { %v905_v62 = vadd.f32 %v1488_v42, %v834_v52  ;;  %v937_v63 = vadd.f32 %v1488_v42, %v866_v53  ;;  %v835_v0 = vmul.f32 %v1483_v40, %v623_v60  ;;  %v867_v1 = vmul.f32 %v1483_v40, %v751_v61 }
 0x11e   : > { %v971_v2 = vmax.f32 %v907_v56, 0.0  ;;  %v1003_v3 = vmax.f32 %v939_v57, 0.0  ;;  %v908_v4 = vadd.f32 %v1488_v42, %v837_v58  ;;  %v940_v5 = vadd.f32 %v1488_v42, %v869_v59 }
 0x11f   : > { %v969_v6 = vmax.f32 %v905_v62, 0.0  ;;  %v1001_v7 = vmax.f32 %v937_v63, 0.0  ;;  %v906_v8 = vadd.f32 %v1488_v42, %v835_v0  ;;  %v938_v9 = vadd.f32 %v1488_v42, %v867_v1 }
 0x120   : > { %1036 = vst.msk [vmem:[%s1502_s20 + $0x90] sm:$0xff] %vm1017_vm0, %v971_v2  ;;  %1068 = vst.msk [vmem:[%s1502_s20 + $0x190] sm:$0xff] %vm1017_vm0, %v1003_v3  ;;  %v972_v10 = vmax.f32 %v908_v4, 0.0  ;;  %v1004_v11 = vmax.f32 %v940_v5, 0.0 }
 0x121   : > { %1034 = vst.msk [vmem:[%s1502_s20 + $0x80] sm:$0xff] %vm1017_vm0, %v969_v6  ;;  %1066 = vst.msk [vmem:[%s1502_s20 + $0x180] sm:$0xff] %vm1017_vm0, %v1001_v7  ;;  %v970_v12 = vmax.f32 %v906_v8, 0.0  ;;  %v1002_v13 = vmax.f32 %v938_v9, 0.0  ;;  %v1269_v14 = vpop.f32.mrb[20].mxu0  ;;  %v1301_v15 = vpop.f32.mrb[20].mxu1 }
 0x122   : > { %1037 = vst.msk [vmem:[%s1502_s20 + $0x98] sm:$0xff] %vm1017_vm0, %v972_v10  ;;  %1069 = vst.msk [vmem:[%s1502_s20 + $0x198] sm:$0xff] %vm1017_vm0, %v1004_v11  ;;  %v840_v16 = vmul.f32 %v1269_v14, %v1483_v40  ;;  %v872_v17 = vmul.f32 %v1301_v15, %v1483_v40  ;;  %v636_v18 = vpop.f32.mrb[21].mxu0  ;;  %v764_v19 = vpop.f32.mrb[21].mxu1 }
 0x123   : > { %1035 = vst.msk [vmem:[%s1502_s20 + $0x88] sm:$0xff] %vm1017_vm0, %v970_v12  ;;  %1067 = vst.msk [vmem:[%s1502_s20 + $0x188] sm:$0xff] %vm1017_vm0, %v1002_v13  ;;  %v838_v20 = vmul.f32 %v1483_v40, %v636_v18  ;;  %v870_v21 = vmul.f32 %v1483_v40, %v764_v19  ;;  %v1270_v22 = vpop.f32.mrb[22].mxu0  ;;  %v1302_v23 = vpop.f32.mrb[22].mxu1 }
 0x124   : > { %v911_v24 = vadd.f32 %v1488_v42, %v840_v16  ;;  %v943_v25 = vadd.f32 %v1488_v42, %v872_v17  ;;  %v841_v26 = vmul.f32 %v1270_v22, %v1483_v40  ;;  %v873_v27 = vmul.f32 %v1302_v23, %v1483_v40  ;;  %v639_v28 = vpop.f32.mrb[23].mxu0  ;;  %v767_v29 = vpop.f32.mrb[23].mxu1 }
 0x125   : > { %v909_v30 = vadd.f32 %v1488_v42, %v838_v20  ;;  %v941_v31 = vadd.f32 %v1488_v42, %v870_v21  ;;  %v839_v32 = vmul.f32 %v1483_v40, %v639_v28  ;;  %v871_v33 = vmul.f32 %v1483_v40, %v767_v29 }
 0x126   : > { %v975_v34 = vmax.f32 %v911_v24, 0.0  ;;  %v1007_v35 = vmax.f32 %v943_v25, 0.0  ;;  %v912_v36 = vadd.f32 %v1488_v42, %v841_v26  ;;  %v944_v37 = vadd.f32 %v1488_v42, %v873_v27 }
 0x127   : > { %v973_v38 = vmax.f32 %v909_v30, 0.0  ;;  %v1005_v39 = vmax.f32 %v941_v31, 0.0  ;;  %v910_v41 = vadd.f32 %v1488_v42, %v839_v32  ;;  %v942_v43 = vadd.f32 %v1488_v42, %v871_v33 }
 0x128   : > { %1040 = vst.msk [vmem:[%s1502_s20 + $0xb0] sm:$0xff] %vm1017_vm0, %v975_v34  ;;  %1072 = vst.msk [vmem:[%s1502_s20 + $0x1b0] sm:$0xff] %vm1017_vm0, %v1007_v35  ;;  %v976_v44 = vmax.f32 %v912_v36, 0.0  ;;  %v1008_v45 = vmax.f32 %v944_v37, 0.0 }
 0x129   : > { %1038 = vst.msk [vmem:[%s1502_s20 + $0xa0] sm:$0xff] %vm1017_vm0, %v973_v38  ;;  %1070 = vst.msk [vmem:[%s1502_s20 + $0x1a0] sm:$0xff] %vm1017_vm0, %v1005_v39  ;;  %v974_v46 = vmax.f32 %v910_v41, 0.0  ;;  %v1006_v47 = vmax.f32 %v942_v43, 0.0  ;;  %v1273_v48 = vpop.f32.mrb[24].mxu0  ;;  %v1305_v49 = vpop.f32.mrb[24].mxu1 }
 0x12a   : > { %1041 = vst.msk [vmem:[%s1502_s20 + $0xb8] sm:$0xff] %vm1017_vm0, %v976_v44  ;;  %1073 = vst.msk [vmem:[%s1502_s20 + $0x1b8] sm:$0xff] %vm1017_vm0, %v1008_v45  ;;  %v844_v50 = vmul.f32 %v1273_v48, %v1483_v40  ;;  %v876_v51 = vmul.f32 %v1305_v49, %v1483_v40  ;;  %v652_v52 = vpop.f32.mrb[25].mxu0  ;;  %v780_v53 = vpop.f32.mrb[25].mxu1 }
 0x12b   : > { %1039 = vst.msk [vmem:[%s1502_s20 + $0xa8] sm:$0xff] %vm1017_vm0, %v974_v46  ;;  %1071 = vst.msk [vmem:[%s1502_s20 + $0x1a8] sm:$0xff] %vm1017_vm0, %v1006_v47  ;;  %v842_v54 = vmul.f32 %v1483_v40, %v652_v52  ;;  %v874_v55 = vmul.f32 %v1483_v40, %v780_v53  ;;  %v1274_v56 = vpop.f32.mrb[26].mxu0  ;;  %v1306_v57 = vpop.f32.mrb[26].mxu1 }
 0x12c   : > { %v915_v58 = vadd.f32 %v1488_v42, %v844_v50  ;;  %v947_v59 = vadd.f32 %v1488_v42, %v876_v51  ;;  %v845_v60 = vmul.f32 %v1274_v56, %v1483_v40  ;;  %v877_v61 = vmul.f32 %v1306_v57, %v1483_v40  ;;  %v655_v62 = vpop.f32.mrb[27].mxu0  ;;  %v783_v63 = vpop.f32.mrb[27].mxu1 }
 0x12d   : > { %v913_v0 = vadd.f32 %v1488_v42, %v842_v54  ;;  %v945_v1 = vadd.f32 %v1488_v42, %v874_v55  ;;  %v843_v2 = vmul.f32 %v1483_v40, %v655_v62  ;;  %v875_v3 = vmul.f32 %v1483_v40, %v783_v63 }
 0x12e   : > { %v979_v4 = vmax.f32 %v915_v58, 0.0  ;;  %v1011_v5 = vmax.f32 %v947_v59, 0.0  ;;  %v916_v6 = vadd.f32 %v1488_v42, %v845_v60  ;;  %v948_v7 = vadd.f32 %v1488_v42, %v877_v61 }
 0x12f   : > { %v977_v8 = vmax.f32 %v913_v0, 0.0  ;;  %v1009_v9 = vmax.f32 %v945_v1, 0.0  ;;  %v914_v10 = vadd.f32 %v1488_v42, %v843_v2  ;;  %v946_v11 = vadd.f32 %v1488_v42, %v875_v3 }
 0x130   : > { %1044 = vst.msk [vmem:[%s1502_s20 + $0xd0] sm:$0xff] %vm1017_vm0, %v979_v4  ;;  %1076 = vst.msk [vmem:[%s1502_s20 + $0x1d0] sm:$0xff] %vm1017_vm0, %v1011_v5  ;;  %v980_v12 = vmax.f32 %v916_v6, 0.0  ;;  %v1012_v13 = vmax.f32 %v948_v7, 0.0 }
 0x131   : > { %1042 = vst.msk [vmem:[%s1502_s20 + $0xc0] sm:$0xff] %vm1017_vm0, %v977_v8  ;;  %1074 = vst.msk [vmem:[%s1502_s20 + $0x1c0] sm:$0xff] %vm1017_vm0, %v1009_v9  ;;  %v978_v14 = vmax.f32 %v914_v10, 0.0  ;;  %v1010_v15 = vmax.f32 %v946_v11, 0.0  ;;  %v1277_v16 = vpop.f32.mrb[28].mxu0  ;;  %v1309_v17 = vpop.f32.mrb[28].mxu1 }
 0x132   : > { %1045 = vst.msk [vmem:[%s1502_s20 + $0xd8] sm:$0xff] %vm1017_vm0, %v980_v12  ;;  %1077 = vst.msk [vmem:[%s1502_s20 + $0x1d8] sm:$0xff] %vm1017_vm0, %v1012_v13  ;;  %v848_v18 = vmul.f32 %v1277_v16, %v1483_v40  ;;  %v880_v19 = vmul.f32 %v1309_v17, %v1483_v40  ;;  %v668_v20 = vpop.f32.mrb[29].mxu0  ;;  %v796_v21 = vpop.f32.mrb[29].mxu1 }
 0x133   : > { %1043 = vst.msk [vmem:[%s1502_s20 + $0xc8] sm:$0xff] %vm1017_vm0, %v978_v14  ;;  %1075 = vst.msk [vmem:[%s1502_s20 + $0x1c8] sm:$0xff] %vm1017_vm0, %v1010_v15  ;;  %v846_v22 = vmul.f32 %v1483_v40, %v668_v20  ;;  %v878_v23 = vmul.f32 %v1483_v40, %v796_v21  ;;  %v1278_v24 = vpop.f32.mrb[30].mxu0  ;;  %v1310_v25 = vpop.f32.mrb[30].mxu1 }
 0x134   : > { %v919_v26 = vadd.f32 %v1488_v42, %v848_v18  ;;  %v951_v27 = vadd.f32 %v1488_v42, %v880_v19  ;;  %v849_v28 = vmul.f32 %v1278_v24, %v1483_v40  ;;  %v881_v29 = vmul.f32 %v1310_v25, %v1483_v40  ;;  %v671_v30 = vpop.f32.mrb[31].mxu0  ;;  %v799_v31 = vpop.f32.mrb[31].mxu1 }
 0x135   : > { %v917_v32 = vadd.f32 %v1488_v42, %v846_v22  ;;  %v949_v33 = vadd.f32 %v1488_v42, %v878_v23  ;;  %v847_v34 = vmul.f32 %v1483_v40, %v671_v30  ;;  %v879_v35 = vmul.f32 %v1483_v40, %v799_v31 }
 0x136   : > { %v983_v36 = vmax.f32 %v919_v26, 0.0  ;;  %v1015_v37 = vmax.f32 %v951_v27, 0.0  ;;  %v920_v38 = vadd.f32 %v1488_v42, %v849_v28  ;;  %v952_v39 = vadd.f32 %v1488_v42, %v881_v29 }
 0x137   : > { %v981_v41 = vmax.f32 %v917_v32, 0.0  ;;  %v1013_v43 = vmax.f32 %v949_v33, 0.0  ;;  %v918_v44 = vadd.f32 %v1488_v42, %v847_v34  ;;  %v950_v45 = vadd.f32 %v1488_v42, %v879_v35 }
 0x138   : > { %1048 = vst.msk [vmem:[%s1502_s20 + $0xf0] sm:$0xff] %vm1017_vm0, %v983_v36  ;;  %1080 = vst.msk [vmem:[%s1502_s20 + $0x1f0] sm:$0xff] %vm1017_vm0, %v1015_v37  ;;  %v984_v40 = vmax.f32 %v920_v38, 0.0  ;;  %v1016_v46 = vmax.f32 %v952_v39, 0.0 }
 0x139   : > { %1046 = vst.msk [vmem:[%s1502_s20 + $0xe0] sm:$0xff] %vm1017_vm0, %v981_v41  ;;  %1078 = vst.msk [vmem:[%s1502_s20 + $0x1e0] sm:$0xff] %vm1017_vm0, %v1013_v43  ;;  %v982_v47 = vmax.f32 %v918_v44, 0.0  ;;  %v1014_v48 = vmax.f32 %v950_v45, 0.0 }
 0x13a   : > { %1049 = vst.msk [vmem:[%s1502_s20 + $0xf8] sm:$0xff] %vm1017_vm0, %v984_v40  ;;  %1081 = vst.msk [vmem:[%s1502_s20 + $0x1f8] sm:$0xff] %vm1017_vm0, %v1016_v46 }
 0x13b   : > { %1047 = vst.msk [vmem:[%s1502_s20 + $0xe8] sm:$0xff] %vm1017_vm0, %v982_v47  ;;  %1079 = vst.msk [vmem:[%s1502_s20 + $0x1e8] sm:$0xff] %vm1017_vm0, %v1014_v48 }
 0x13c PF: > { %s14_s15 = sadd.s32 1, %s1381_s15  }
 0x13d   : > { %p11_p4 = scmp.ge.s32.totalorder %s14_s15, 4  }
 0x13f   :  { %13 = sbr.rel (!%p11_p4) target bundleno = 1 (0x1), region = 66 }

// kernel: model_forward.6
= control target key start
LH: loop header
LB: loop body
LE: loop exit
PB: predicated region body
PF: predicated region fallthrough
CT: control target
= control target key end

     0   :  { %s2013_s15 = smov 0   ;;  %s2015_s16 = smov 0   ;;  %s2697_s0 = inlined_call_operand.vmem [shape: bf16[4,64,64], index: 0, kind: input, shape index: {}]   ;;  %s2698_s1 = inlined_call_operand.vmem [shape: bf16[64,2048], index: 1, kind: input, shape index: {}]   ;;  %s2699_s2 = inlined_call_operand.vmem [shape: f32[1,2048], index: 2, kind: input, shape index: {}]   ;;  %s2700_s3 = inlined_call_operand.vmem [shape: f32[1,2048], index: 3, kind: input, shape index: {}]   ;;  %s2701_s4 = inlined_call_operand.vmem [shape: f32[4,2048], index: 4, kind: output, shape index: {}]  }
   0x1   :  { %s2017_s17 = smov 0   ;;  %s2019_s18 = smov 0  }
   0x2   :  { %s2021_s19 = smov 0  }
   0x3 LB: > { %s26_s20 = sadd.s32 1, %s1981_s18  ;;  %p66_p1 = scmp.ne.s32.totalorder %s1973_s16, %s1969_s15  ;;  %s1985_s19 = sphi %s2021_s19, %s14_s19   ;;  %s1981_s18 = sphi %s2019_s18, %s2705_s18   ;;  %s1977_s17 = sphi %s2017_s17, %s2704_s17   ;;  %s1973_s16 = sphi %s2015_s16, %s2703_s16   ;;  %s1969_s15 = sphi %s2013_s15, %s2702_s15  }
   0x4   : > { %p28_p0 = scmp.ge.s32.totalorder %s26_s20, 4  ;;  %p67_p2 = scmp.eq.s32.totalorder %s1985_s19, 0 }
   0x5   : > { %s59_s22 = sadd.s32 1, %s1973_s16  ;;  %p1788_p5 = scmp.ge.s32.totalorder %s1985_s19, 4 }
   0x6   : > { %s2707_s20 = smov (%p28_p0, %s26_s20), 0  ;;  %p68_p3 = por %p67_p2, %p66_p1 }
   0x7   : > { %s56_s21 = ssub.s32 %s1981_s18, %s2707_s20  ;;  %179 = sbr.rel (%p1788_p5) target bundleno = 26 (0x1a), region = 20 }
   0x8   : > { %p57_p4 = scmp.eq.s32.totalorder %s56_s21, 0 }
   0xa   : > { %s2048_s23 = scalar_select %p57_p4, %s1973_s16, %s59_s22  }
   0xe   : > { %182 = sbr.rel (!%p68_p3) target bundleno = 26 (0x1a), region = 24  ;;  %s184_s24 = sand.u32 (%p68_p3), 1, %s1973_s16  }
   0xf   : > { %s1864_s25 = sshll.u32 (%p68_p3), %s1981_s18, 4  ;;  %s1789_s26 = sshll.u32 (%p68_p3), %s184_s24, 7 }
  0x10   : > { %s2056_s29 = scalar_lea.vmem (%p68_p3), %s2698_s1, %s1864_s25  ;;  %s186_s30 = scalar_lea.vmem (%p68_p3), [#allocation2], %s1789_s26 }
  0x11   : > { %v202_v0 = vld [vmem:[%s2056_s29] sm:$0xff] (%p68_p3)  ;;  %v204_v1 = vld [vmem:[%s2056_s29 + $0x8] sm:$0xff] (%p68_p3) }
  0x12   : > { %v206_v2 = vld [vmem:[%s2056_s29 + $0x40] sm:$0xff] (%p68_p3)  ;;  %203 = vst [vmem:[%s186_s30] sm:$0xff] (%p68_p3), %v202_v0  ;;  %205 = vst [vmem:[%s186_s30 + $0x8] sm:$0xff] (%p68_p3), %v204_v1  ;;  %v208_v3 = vld [vmem:[%s2056_s29 + $0x48] sm:$0xff] (%p68_p3) }
  0x13   : > { %207 = vst [vmem:[%s186_s30 + $0x10] sm:$0xff] (%p68_p3), %v206_v2  ;;  %v210_v4 = vld [vmem:[%s2056_s29 + $0x80] sm:$0xff] (%p68_p3)  ;;  %v212_v5 = vld [vmem:[%s2056_s29 + $0x88] sm:$0xff] (%p68_p3)  ;;  %209 = vst [vmem:[%s186_s30 + $0x18] sm:$0xff] (%p68_p3), %v208_v3 }
  0x14   : > { %211 = vst [vmem:[%s186_s30 + $0x20] sm:$0xff] (%p68_p3), %v210_v4  ;;  %213 = vst [vmem:[%s186_s30 + $0x28] sm:$0xff] (%p68_p3), %v212_v5  ;;  %v214_v6 = vld [vmem:[%s2056_s29 + $0xc0] sm:$0xff] (%p68_p3)  ;;  %v216_v7 = vld [vmem:[%s2056_s29 + $0xc8] sm:$0xff] (%p68_p3) }
  0x15   : > { %v218_v8 = vld [vmem:[%s2056_s29 + $0x100] sm:$0xff]  ;;  %215 = vst [vmem:[%s186_s30 + $0x30] sm:$0xff] %v214_v6  ;;  %217 = vst [vmem:[%s186_s30 + $0x38] sm:$0xff] %v216_v7  ;;  %v220_v9 = vld [vmem:[%s2056_s29 + $0x108] sm:$0xff] }
  0x16   : > { %219 = vst [vmem:[%s186_s30 + $0x40] sm:$0xff] %v218_v8  ;;  %v222_v10 = vld [vmem:[%s2056_s29 + $0x140] sm:$0xff]  ;;  %v224_v11 = vld [vmem:[%s2056_s29 + $0x148] sm:$0xff]  ;;  %221 = vst [vmem:[%s186_s30 + $0x48] sm:$0xff] %v220_v9 }
  0x17   : > { %223 = vst [vmem:[%s186_s30 + $0x50] sm:$0xff] %v222_v10  ;;  %225 = vst [vmem:[%s186_s30 + $0x58] sm:$0xff] %v224_v11  ;;  %v226_v12 = vld [vmem:[%s2056_s29 + $0x180] sm:$0xff]  ;;  %v228_v13 = vld [vmem:[%s2056_s29 + $0x188] sm:$0xff] }
  0x18   : > { %v230_v14 = vld [vmem:[%s2056_s29 + $0x1c0] sm:$0xff]  ;;  %227 = vst [vmem:[%s186_s30 + $0x60] sm:$0xff] %v226_v12  ;;  %229 = vst [vmem:[%s186_s30 + $0x68] sm:$0xff] %v228_v13  ;;  %v232_v15 = vld [vmem:[%s2056_s29 + $0x1c8] sm:$0xff] }
  0x19   : > { %231 = vst [vmem:[%s186_s30 + $0x70] sm:$0xff] %v230_v14  ;;  %233 = vst [vmem:[%s186_s30 + $0x78] sm:$0xff] %v232_v15 }
  0x1a PF: > { %p1792_p6 = scmp.ge.s32.totalorder %s1985_s19, 1  ;;  %p254_p7 = scmp.lt.s32.totalorder %s1985_s19, 5 }
  0x1c   : > { %p255_p8 = pnand %p1792_p6, %p254_p7 }
  0x1d   : > { %s261_s5 = sand.u32 (!%p255_p8), 1, %s1969_s15   ;;  %v1987_v16 = vmov (!%p255_p8), 0   ;;  %v1931_v33 = vld [vmem:[%s2697_s0] sm:$0xff] (!%p255_p8)   ;;  %vm537_vm0 = vcmask (!%p255_p8), 523264   ;;  %v1932_v34 = vld [vmem:[%s2697_s0 + $0x8] sm:$0xff] (!%p255_p8)   ;;  %v1933_v35 = vld [vmem:[%s2697_s0 + $0x10] sm:$0xff] (!%p255_p8)   ;;  %v974_v49 = vlaneseq (!%p255_p8) }
  0x1e   : > { %258 = sbr.rel (%p255_p8) target bundleno = 437 (0x1b5), region = 55  ;;  %s1793_s6 = sshll.u32 (!%p255_p8), %s261_s5, 7  ;;  %618 = vmatprep.mubr.bf16.mxu0 (!%p255_p8), %v1987_v16  ;;  %811 = vmatprep.mubr.bf16.mxu1 (!%p255_p8), %v1987_v16  ;;  %v1934_v36 = vld [vmem:[%s2697_s0 + $0x18] sm:$0xff] (!%p255_p8)   ;;  %v1935_v37 = vld [vmem:[%s2697_s0 + $0x20] sm:$0xff] (!%p255_p8)   ;;  %v1936_v38 = vld [vmem:[%s2697_s0 + $0x28] sm:$0xff] (!%p255_p8)   ;;  %vm1651_vm1 = vcmask (!%p255_p8), 1041409  }
  0x1f   : > { %s263_s7 = scalar_lea.vmem (!%p255_p8), [#allocation2], %s1793_s6  ;;  %v1937_v39 = vld [vmem:[%s2697_s0 + $0x30] sm:$0xff] (!%p255_p8)   ;;  %v1938_v40 = vld [vmem:[%s2697_s0 + $0x38] sm:$0xff] (!%p255_p8)   ;;  %v1939_v41 = vld [vmem:[%s2697_s0 + $0x40] sm:$0xff] (!%p255_p8)   ;;  %s1794_s26 = sshll.u32 (!%p255_p8), %s1977_s17, 2  ;;  %v975_v50 = vshrl.u32 (!%p255_p8), %v974_v49, 7 }
  0x20   : > { %v1907_v17 = vld [vmem:[%s263_s7 + $0x4] ss:$16 sps:$4 sm:$0xff] (!%p255_p8)   ;;  %v1909_v18 = vld [vmem:[%s263_s7 + $0xc] ss:$16 sps:$4 sm:$0xff] (!%p255_p8)   ;;  %v1911_v19 = vld [vmem:[%s263_s7] ss:$16 sps:$4 sm:$0xff] (!%p255_p8)  }
  0x21   : > { %586 = vmatprep.subr.bf16.mxu0 (!%p255_p8), %v1907_v17  ;;  %v1912_v20 = vld [vmem:[%s263_s7 + $0x8] ss:$16 sps:$4 sm:$0xff] (!%p255_p8)   ;;  %779 = vmatprep.subr.bf16.mxu1 (!%p255_p8), %v1909_v18  ;;  %v1913_v21 = vld [vmem:[%s263_s7 + $0x24] ss:$16 sps:$4 sm:$0xff] (!%p255_p8)   ;;  %v1915_v22 = vld [vmem:[%s263_s7 + $0x2c] ss:$16 sps:$4 sm:$0xff] (!%p255_p8)  }
  0x22   : > { %587 = vmatpush1.bf16.msra.mxu0 (!%p255_p8), %v1911_v19  ;;  %780 = vmatpush1.bf16.msra.mxu1 (!%p255_p8), %v1912_v20  ;;  %v1917_v23 = vld [vmem:[%s263_s7 + $0x20] ss:$16 sps:$4 sm:$0xff] (!%p255_p8)   ;;  %v1918_v24 = vld [vmem:[%s263_s7 + $0x28] ss:$16 sps:$4 sm:$0xff] (!%p255_p8)   ;;  %v1919_v25 = vld [vmem:[%s263_s7 + $0x44] ss:$16 sps:$4 sm:$0xff] (!%p255_p8)  }
  0x23   : > { %588 = vmatprep.subr.bf16.mxu0 (!%p255_p8), %v1913_v21  ;;  %781 = vmatprep.subr.bf16.mxu1 (!%p255_p8), %v1915_v22  ;;  %v1921_v26 = vld [vmem:[%s263_s7 + $0x4c] ss:$16 sps:$4 sm:$0xff] (!%p255_p8)   ;;  %v1923_v27 = vld [vmem:[%s263_s7 + $0x40] ss:$16 sps:$4 sm:$0xff] (!%p255_p8)   ;;  %v1924_v28 = vld [vmem:[%s263_s7 + $0x48] ss:$16 sps:$4 sm:$0xff] (!%p255_p8)  }
  0x24   : > { %v1925_v29 = vld [vmem:[%s263_s7 + $0x64] ss:$16 sps:$4 sm:$0xff] (!%p255_p8)   ;;  %v1927_v30 = vld [vmem:[%s263_s7 + $0x6c] ss:$16 sps:$4 sm:$0xff] (!%p255_p8)   ;;  %v1929_v31 = vld [vmem:[%s263_s7 + $0x60] ss:$16 sps:$4 sm:$0xff] (!%p255_p8)  }
  0x25   : > { %v1930_v32 = vld [vmem:[%s263_s7 + $0x68] ss:$16 sps:$4 sm:$0xff]   ;;  %v1941_v43 = vld [vmem:[%s2697_s0 + $0x50] sm:$0xff]   ;;  %v1943_v45 = vld [vmem:[%s2697_s0 + $0x60] sm:$0xff]   ;;  %p307_p9 = scmp.lt.s32.totalorder %s1794_s26, 15  ;;  %v976_v51 = vsub.s32 0, %v975_v50 }
  0x26   : > { %589 = vmatpush1.bf16.msra.mxu0 %v1917_v23  ;;  %782 = vmatpush1.bf16.msra.mxu1 %v1918_v24  ;;  %v1940_v42 = vld [vmem:[%s2697_s0 + $0x48] sm:$0xff]   ;;  %v1942_v44 = vld [vmem:[%s2697_s0 + $0x58] sm:$0xff]   ;;  %v1945_v47 = vld [vmem:[%s2697_s0 + $0x70] sm:$0xff]   ;;  %v984_v52 = vsub.s32 2, %v975_v50  ;;  %v980_v54 = vsub.s32 1, %v975_v50  ;;  %v988_v55 = vsub.s32 3, %v975_v50 }
  0x27   : > { %590 = vmatprep.subr.bf16.mxu0 %v1919_v25  ;;  %783 = vmatprep.subr.bf16.mxu1 %v1921_v26  ;;  %v1944_v46 = vld [vmem:[%s2697_s0 + $0x68] sm:$0xff]   ;;  %v1946_v48 = vld [vmem:[%s2697_s0 + $0x78] sm:$0xff]   ;;  %s2709_s26 = smov (!%p307_p9, %s1794_s26), 15  ;;  %vm1653_vm2 = vcmask 1045509   ;;  %vm1656_vm3 = vcmask 1042434   ;;  %vm1658_vm4 = vcmask 1046534  }
  0x28   : > { %s309_s29 = scalar_lea.vmem %s2699_s2, %s2709_s26  ;;  %s314_s6 = scalar_lea.vmem %s2700_s3, %s2709_s26  ;;  %vm1661_vm5 = vcmask 1043459   ;;  %vm1663_vm6 = vcmask 1047559  }
  0x29   : > { %v972_v53 = vld [vmem:[%s309_s29] sm:$0xf]  ;;  %s1797_s17 = sshll.u32 %s2709_s26, 2 }
  0x2a   : > { %591 = vmatpush1.bf16.msra.mxu0 %v1923_v27  ;;  %784 = vmatpush1.bf16.msra.mxu1 %v1924_v28  ;;  %v1122_v56 = vld [vmem:[%s314_s6] sm:$0xf]  ;;  %v2200_v57 = vrot.slane %v972_v53, %v976_v51  ;;  %v2202_v58 = vrot.slane %v972_v53, %v984_v52  ;;  %v2204_v59 = vrot.slane %v972_v53, %v980_v54  ;;  %s320_s9 = scalar_lea.vmem %s2701_s4, %s1797_s17 }
  0x2b   : > { %592 = vmatprep.subr.bf16.mxu0 %v1925_v29  ;;  %785 = vmatprep.subr.bf16.mxu1 %v1927_v30  ;;  %v2206_v60 = vrot.slane %v972_v53, %v988_v55  ;;  %v2208_v61 = vrot.slane %v1122_v56, %v976_v51  ;;  %v2210_v62 = vrot.slane %v1122_v56, %v984_v52 }
  0x2c   : > { %v2212_v1 = vrot.slane %v1122_v56, %v980_v54  ;;  %v2214_v2 = vrot.slane %v1122_v56, %v988_v55 }
  0x2e   : > { %593 = vmatpush1.bf16.msra.mxu0 %v1929_v31  ;;  %786 = vmatpush1.bf16.msra.mxu1 %v1930_v32 }
  0x31   : > { %1830 = vmatmul.mubr.msk.bf16.vlgmr.msra.gmra.mrb[0].mxu0 %vm537_vm0, %v1931_v33  ;;  %1846 = vmatmul.mubr.msk.bf16.vlgmr.msra.gmra.mrb[0].mxu1 %vm537_vm0, %v1931_v33 }
  0x32   : > { %628 = vmatprep.mubr.bf16.mxu0 %v1987_v16  ;;  %821 = vmatprep.mubr.bf16.mxu1 %v1987_v16 }
  0x39   : > { %1831 = vmatmul.mubr.msk.bf16.gmra.mrb[4].mxu0 %vm537_vm0, %v1932_v34  ;;  %1847 = vmatmul.mubr.msk.bf16.gmra.mrb[4].mxu1 %vm537_vm0, %v1932_v34 }
  0x3a   : > { %638 = vmatprep.mubr.bf16.mxu0 %v1987_v16  ;;  %831 = vmatprep.mubr.bf16.mxu1 %v1987_v16 }
  0x41   : > { %1832 = vmatmul.mubr.msk.bf16.gmra.mrb[8].mxu0 %vm537_vm0, %v1933_v35  ;;  %1848 = vmatmul.mubr.msk.bf16.gmra.mrb[8].mxu1 %vm537_vm0, %v1933_v35 }
  0x42   : > { %648 = vmatprep.mubr.bf16.mxu0 %v1987_v16  ;;  %841 = vmatprep.mubr.bf16.mxu1 %v1987_v16 }
  0x49   : > { %1833 = vmatmul.mubr.msk.bf16.gmra.mrb[12].mxu0 %vm537_vm0, %v1934_v36  ;;  %1849 = vmatmul.mubr.msk.bf16.gmra.mrb[12].mxu1 %vm537_vm0, %v1934_v36 }
  0x4a   : > { %658 = vmatprep.mubr.bf16.mxu0 %v1987_v16  ;;  %851 = vmatprep.mubr.bf16.mxu1 %v1987_v16 }
  0x51   : > { %1834 = vmatmul.mubr.msk.bf16.gmra.mrb[16].mxu0 %vm537_vm0, %v1935_v37  ;;  %1850 = vmatmul.mubr.msk.bf16.gmra.mrb[16].mxu1 %vm537_vm0, %v1935_v37 }
  0x52   : > { %668 = vmatprep.mubr.bf16.mxu0 %v1987_v16  ;;  %861 = vmatprep.mubr.bf16.mxu1 %v1987_v16 }
  0x59   : > { %1835 = vmatmul.mubr.msk.bf16.gmra.mrb[20].mxu0 %vm537_vm0, %v1936_v38  ;;  %1851 = vmatmul.mubr.msk.bf16.gmra.mrb[20].mxu1 %vm537_vm0, %v1936_v38 }
  0x5a   : > { %678 = vmatprep.mubr.bf16.mxu0 %v1987_v16  ;;  %871 = vmatprep.mubr.bf16.mxu1 %v1987_v16 }
  0x61   : > { %1836 = vmatmul.mubr.msk.bf16.gmra.mrb[24].mxu0 %vm537_vm0, %v1937_v39  ;;  %1852 = vmatmul.mubr.msk.bf16.gmra.mrb[24].mxu1 %vm537_vm0, %v1937_v39 }
  0x62   : > { %688 = vmatprep.mubr.bf16.mxu0 %v1987_v16  ;;  %881 = vmatprep.mubr.bf16.mxu1 %v1987_v16 }
  0x69   : > { %1837 = vmatmul.mubr.msk.bf16.gmra.mrb[28].mxu0 %vm537_vm0, %v1938_v40  ;;  %1853 = vmatmul.mubr.msk.bf16.gmra.mrb[28].mxu1 %vm537_vm0, %v1938_v40 }
  0x6a   : > { %698 = vmatprep.mubr.bf16.mxu0 %v1987_v16  ;;  %891 = vmatprep.mubr.bf16.mxu1 %v1987_v16 }
  0x71   : > { %1838 = vmatmul.mubr.msk.bf16.gmra.mrb[32].mxu0 %vm537_vm0, %v1939_v41  ;;  %1854 = vmatmul.mubr.msk.bf16.gmra.mrb[32].mxu1 %vm537_vm0, %v1939_v41 }
  0x72   : > { %708 = vmatprep.mubr.bf16.mxu0 %v1987_v16  ;;  %901 = vmatprep.mubr.bf16.mxu1 %v1987_v16 }
  0x79   : > { %1839 = vmatmul.mubr.msk.bf16.gmra.mrb[36].mxu0 %vm537_vm0, %v1940_v42  ;;  %1855 = vmatmul.mubr.msk.bf16.gmra.mrb[36].mxu1 %vm537_vm0, %v1940_v42 }
  0x7a   : > { %718 = vmatprep.mubr.bf16.mxu0 %v1987_v16  ;;  %911 = vmatprep.mubr.bf16.mxu1 %v1987_v16 }
  0x81   : > { %1840 = vmatmul.mubr.msk.bf16.gmra.mrb[40].mxu0 %vm537_vm0, %v1941_v43  ;;  %1856 = vmatmul.mubr.msk.bf16.gmra.mrb[40].mxu1 %vm537_vm0, %v1941_v43 }
  0x82   : > { %728 = vmatprep.mubr.bf16.mxu0 %v1987_v16  ;;  %921 = vmatprep.mubr.bf16.mxu1 %v1987_v16 }
  0x89   : > { %1841 = vmatmul.mubr.msk.bf16.gmra.mrb[44].mxu0 %vm537_vm0, %v1942_v44  ;;  %1857 = vmatmul.mubr.msk.bf16.gmra.mrb[44].mxu1 %vm537_vm0, %v1942_v44 }
  0x8a   : > { %738 = vmatprep.mubr.bf16.mxu0 %v1987_v16  ;;  %931 = vmatprep.mubr.bf16.mxu1 %v1987_v16 }
  0x91   : > { %1842 = vmatmul.mubr.msk.bf16.gmra.mrb[48].mxu0 %vm537_vm0, %v1943_v45  ;;  %1858 = vmatmul.mubr.msk.bf16.gmra.mrb[48].mxu1 %vm537_vm0, %v1943_v45 }
  0x92   : > { %748 = vmatprep.mubr.bf16.mxu0 %v1987_v16  ;;  %941 = vmatprep.mubr.bf16.mxu1 %v1987_v16 }
  0x99   : > { %1843 = vmatmul.mubr.msk.bf16.gmra.mrb[52].mxu0 %vm537_vm0, %v1944_v46  ;;  %1859 = vmatmul.mubr.msk.bf16.gmra.mrb[52].mxu1 %vm537_vm0, %v1944_v46 }
  0x9a   : > { %758 = vmatprep.mubr.bf16.mxu0 %v1987_v16  ;;  %951 = vmatprep.mubr.bf16.mxu1 %v1987_v16 }
  0xa1   : > { %1844 = vmatmul.mubr.msk.bf16.gmra.mrb[56].mxu0 %vm537_vm0, %v1945_v47  ;;  %1860 = vmatmul.mubr.msk.bf16.gmra.mrb[56].mxu1 %vm537_vm0, %v1945_v47 }
  0xa2   : > { %768 = vmatprep.mubr.bf16.mxu0 %v1987_v16  ;;  %961 = vmatprep.mubr.bf16.mxu1 %v1987_v16 }
  0xa9   : > { %1845 = vmatmul.mubr.msk.bf16.gmra.mrb[60].mxu0 %vm537_vm0, %v1946_v48  ;;  %1861 = vmatmul.mubr.msk.bf16.gmra.mrb[60].mxu1 %vm537_vm0, %v1946_v48 }
 0x104   : > { %v620_v63 = vpop.f32.mrb[0].mxu0  ;;  %v813_v0 = vpop.f32.mrb[0].mxu1 }
 0x105   : > { %v994_v3 = vmul.f32 %v2200_v57, %v620_v63  ;;  %v996_v4 = vmul.f32 %v2202_v58, %v813_v0  ;;  %v622_v5 = vpop.f32.mrb[1].mxu0  ;;  %v815_v6 = vpop.f32.mrb[1].mxu1 }
 0x106   : > { %v995_v7 = vmul.f32 %v2204_v59, %v622_v5  ;;  %v997_v8 = vmul.f32 %v2206_v60, %v815_v6  ;;  %v624_v9 = vpop.f32.mrb[2].mxu0  ;;  %v817_v10 = vpop.f32.mrb[2].mxu1 }
 0x107   : > { %v1144_v11 = vadd.f32 %v2208_v61, %v994_v3  ;;  %v1146_v12 = vadd.f32 %v2210_v62, %v996_v4  ;;  %v998_v13 = vmul.f32 %v2200_v57, %v624_v9  ;;  %v1000_v14 = vmul.f32 %v2202_v58, %v817_v10  ;;  %v626_v15 = vpop.f32.mrb[3].mxu0  ;;  %v819_v16 = vpop.f32.mrb[3].mxu1 }
 0x108   : > { %v1145_v17 = vadd.f32 %v2212_v1, %v995_v7  ;;  %v1147_v18 = vadd.f32 %v2214_v2, %v997_v8  ;;  %v999_v19 = vmul.f32 %v2204_v59, %v626_v15  ;;  %v1001_v20 = vmul.f32 %v2206_v60, %v819_v16 }
 0x109   : > { %v1148_v21 = vadd.f32 %v2208_v61, %v998_v13  ;;  %v1150_v22 = vadd.f32 %v2210_v62, %v1000_v14  ;;  %v1272_v25 = vmax.f32 %v1144_v11, 0.0  ;;  %v1274_v26 = vmax.f32 %v1146_v12, 0.0 }
 0x10a   : > { %v1149_v23 = vadd.f32 %v2212_v1, %v999_v19  ;;  %v1151_v24 = vadd.f32 %v2214_v2, %v1001_v20  ;;  %v1273_v29 = vmax.f32 %v1145_v17, 0.0  ;;  %v1275_v30 = vmax.f32 %v1147_v18, 0.0 }
 0x10b   : > { %v1276_v27 = vmax.f32 %v1148_v21, 0.0  ;;  %v1278_v28 = vmax.f32 %v1150_v22, 0.0 }
 0x10c   : > { %v1277_v31 = vmax.f32 %v1149_v23, 0.0  ;;  %v1279_v32 = vmax.f32 %v1151_v24, 0.0  ;;  %v630_v33 = vpop.f32.mrb[4].mxu0  ;;  %v823_v34 = vpop.f32.mrb[4].mxu1 }
 0x10d   : > { %v1402_v35 = vadd.f32 %v1276_v27, %v1272_v25  ;;  %v1428_v36 = vadd.f32 %v1278_v28, %v1274_v26  ;;  %v1002_v37 = vmul.f32 %v2200_v57, %v630_v33  ;;  %v1004_v38 = vmul.f32 %v2202_v58, %v823_v34  ;;  %v632_v39 = vpop.f32.mrb[5].mxu0  ;;  %v825_v40 = vpop.f32.mrb[5].mxu1 }
 0x10e   : > { %v1415_v41 = vadd.f32 %v1277_v31, %v1273_v29  ;;  %v1441_v42 = vadd.f32 %v1279_v32, %v1275_v30  ;;  %v1003_v43 = vmul.f32 %v2204_v59, %v632_v39  ;;  %v1005_v44 = vmul.f32 %v2206_v60, %v825_v40  ;;  %v634_v45 = vpop.f32.mrb[6].mxu0  ;;  %v827_v46 = vpop.f32.mrb[6].mxu1 }
 0x10f   : > { %v1152_v47 = vadd.f32 %v2208_v61, %v1002_v37  ;;  %v1154_v48 = vadd.f32 %v2210_v62, %v1004_v38  ;;  %v1006_v49 = vmul.f32 %v2200_v57, %v634_v45  ;;  %v1008_v50 = vmul.f32 %v2202_v58, %v827_v46  ;;  %v636_v51 = vpop.f32.mrb[7].mxu0  ;;  %v829_v52 = vpop.f32.mrb[7].mxu1 }
 0x110   : > { %v1153_v53 = vadd.f32 %v2212_v1, %v1003_v43  ;;  %v1155_v54 = vadd.f32 %v2214_v2, %v1005_v44  ;;  %v1007_v55 = vmul.f32 %v2204_v59, %v636_v51  ;;  %v1009_v56 = vmul.f32 %v2206_v60, %v829_v52 }
 0x111   : > { %v1280_v63 = vmax.f32 %v1152_v47, 0.0  ;;  %v1282_v0 = vmax.f32 %v1154_v48, 0.0  ;;  %v1156_v3 = vadd.f32 %v2208_v61, %v1006_v49  ;;  %v1158_v4 = vadd.f32 %v2210_v62, %v1008_v50 }
 0x112   : > { %v1281_v5 = vmax.f32 %v1153_v53, 0.0  ;;  %v1283_v6 = vmax.f32 %v1155_v54, 0.0  ;;  %v1157_v7 = vadd.f32 %v2212_v1, %v1007_v55  ;;  %v1159_v8 = vadd.f32 %v2214_v2, %v1009_v56 }
 0x113   : > { %v1403_v9 = vadd.f32 %v1402_v35, %v1280_v63  ;;  %v1429_v10 = vadd.f32 %v1428_v36, %v1282_v0  ;;  %v1284_v11 = vmax.f32 %v1156_v3, 0.0  ;;  %v1286_v12 = vmax.f32 %v1158_v4, 0.0 }
 0x114   : > { %v1416_v13 = vadd.f32 %v1415_v41, %v1281_v5  ;;  %v1442_v14 = vadd.f32 %v1441_v42, %v1283_v6  ;;  %v1285_v15 = vmax.f32 %v1157_v7, 0.0  ;;  %v1287_v16 = vmax.f32 %v1159_v8, 0.0  ;;  %v640_v17 = vpop.f32.mrb[8].mxu0  ;;  %v833_v18 = vpop.f32.mrb[8].mxu1 }
 0x115   : > { %v1404_v19 = vadd.f32 %v1403_v9, %v1284_v11  ;;  %v1430_v20 = vadd.f32 %v1429_v10, %v1286_v12  ;;  %v1010_v21 = vmul.f32 %v2200_v57, %v640_v17  ;;  %v1012_v22 = vmul.f32 %v2202_v58, %v833_v18  ;;  %v642_v23 = vpop.f32.mrb[9].mxu0  ;;  %v835_v24 = vpop.f32.mrb[9].mxu1 }
 0x116   : > { %v1417_v25 = vadd.f32 %v1416_v13, %v1285_v15  ;;  %v1443_v26 = vadd.f32 %v1442_v14, %v1287_v16  ;;  %v1011_v27 = vmul.f32 %v2204_v59, %v642_v23  ;;  %v1013_v28 = vmul.f32 %v2206_v60, %v835_v24  ;;  %v644_v29 = vpop.f32.mrb[10].mxu0  ;;  %v837_v30 = vpop.f32.mrb[10].mxu1 }
 0x117   : > { %v1160_v31 = vadd.f32 %v2208_v61, %v1010_v21  ;;  %v1162_v32 = vadd.f32 %v2210_v62, %v1012_v22  ;;  %v1014_v33 = vmul.f32 %v2200_v57, %v644_v29  ;;  %v1016_v34 = vmul.f32 %v2202_v58, %v837_v30  ;;  %v646_v35 = vpop.f32.mrb[11].mxu0  ;;  %v839_v36 = vpop.f32.mrb[11].mxu1 }
 0x118   : > { %v1161_v37 = vadd.f32 %v2212_v1, %v1011_v27  ;;  %v1163_v38 = vadd.f32 %v2214_v2, %v1013_v28  ;;  %v1015_v39 = vmul.f32 %v2204_v59, %v646_v35  ;;  %v1017_v40 = vmul.f32 %v2206_v60, %v839_v36 }
 0x119   : > { %v1288_v41 = vmax.f32 %v1160_v31, 0.0  ;;  %v1290_v42 = vmax.f32 %v1162_v32, 0.0  ;;  %v1164_v43 = vadd.f32 %v2208_v61, %v1014_v33  ;;  %v1166_v44 = vadd.f32 %v2210_v62, %v1016_v34 }
 0x11a   : > { %v1289_v45 = vmax.f32 %v1161_v37, 0.0  ;;  %v1291_v46 = vmax.f32 %v1163_v38, 0.0  ;;  %v1165_v47 = vadd.f32 %v2212_v1, %v1015_v39  ;;  %v1167_v48 = vadd.f32 %v2214_v2, %v1017_v40 }
 0x11b   : > { %v1405_v49 = vadd.f32 %v1404_v19, %v1288_v41  ;;  %v1431_v50 = vadd.f32 %v1430_v20, %v1290_v42  ;;  %v1292_v51 = vmax.f32 %v1164_v43, 0.0  ;;  %v1294_v52 = vmax.f32 %v1166_v44, 0.0 }
 0x11c   : > { %v1418_v53 = vadd.f32 %v1417_v25, %v1289_v45  ;;  %v1444_v54 = vadd.f32 %v1443_v26, %v1291_v46  ;;  %v1293_v55 = vmax.f32 %v1165_v47, 0.0  ;;  %v1295_v56 = vmax.f32 %v1167_v48, 0.0  ;;  %v650_v63 = vpop.f32.mrb[12].mxu0  ;;  %v843_v0 = vpop.f32.mrb[12].mxu1 }
 0x11d   : > { %v1406_v3 = vadd.f32 %v1405_v49, %v1292_v51  ;;  %v1432_v4 = vadd.f32 %v1431_v50, %v1294_v52  ;;  %v1018_v5 = vmul.f32 %v2200_v57, %v650_v63  ;;  %v1020_v6 = vmul.f32 %v2202_v58, %v843_v0  ;;  %v652_v7 = vpop.f32.mrb[13].mxu0  ;;  %v845_v8 = vpop.f32.mrb[13].mxu1 }
 0x11e   : > { %v1419_v9 = vadd.f32 %v1418_v53, %v1293_v55  ;;  %v1445_v10 = vadd.f32 %v1444_v54, %v1295_v56  ;;  %v1019_v11 = vmul.f32 %v2204_v59, %v652_v7  ;;  %v1021_v12 = vmul.f32 %v2206_v60, %v845_v8  ;;  %v654_v13 = vpop.f32.mrb[14].mxu0  ;;  %v847_v14 = vpop.f32.mrb[14].mxu1 }
 0x11f   : > { %v1168_v15 = vadd.f32 %v2208_v61, %v1018_v5  ;;  %v1170_v16 = vadd.f32 %v2210_v62, %v1020_v6  ;;  %v1022_v17 = vmul.f32 %v2200_v57, %v654_v13  ;;  %v1024_v18 = vmul.f32 %v2202_v58, %v847_v14  ;;  %v656_v19 = vpop.f32.mrb[15].mxu0  ;;  %v849_v20 = vpop.f32.mrb[15].mxu1 }
 0x120   : > { %v1169_v21 = vadd.f32 %v2212_v1, %v1019_v11  ;;  %v1171_v22 = vadd.f32 %v2214_v2, %v1021_v12  ;;  %v1023_v23 = vmul.f32 %v2204_v59, %v656_v19  ;;  %v1025_v24 = vmul.f32 %v2206_v60, %v849_v20 }
 0x121   : > { %v1296_v25 = vmax.f32 %v1168_v15, 0.0  ;;  %v1298_v26 = vmax.f32 %v1170_v16, 0.0  ;;  %v1172_v27 = vadd.f32 %v2208_v61, %v1022_v17  ;;  %v1174_v28 = vadd.f32 %v2210_v62, %v1024_v18 }
 0x122   : > { %v1297_v29 = vmax.f32 %v1169_v21, 0.0  ;;  %v1299_v30 = vmax.f32 %v1171_v22, 0.0  ;;  %v1173_v31 = vadd.f32 %v2212_v1, %v1023_v23  ;;  %v1175_v32 = vadd.f32 %v2214_v2, %v1025_v24 }
 0x123   : > { %v1407_v33 = vadd.f32 %v1406_v3, %v1296_v25  ;;  %v1433_v34 = vadd.f32 %v1432_v4, %v1298_v26  ;;  %v1300_v35 = vmax.f32 %v1172_v27, 0.0  ;;  %v1302_v36 = vmax.f32 %v1174_v28, 0.0 }
 0x124   : > { %v1420_v37 = vadd.f32 %v1419_v9, %v1297_v29  ;;  %v1446_v38 = vadd.f32 %v1445_v10, %v1299_v30  ;;  %v1301_v39 = vmax.f32 %v1173_v31, 0.0  ;;  %v1303_v40 = vmax.f32 %v1175_v32, 0.0  ;;  %v660_v41 = vpop.f32.mrb[16].mxu0  ;;  %v853_v42 = vpop.f32.mrb[16].mxu1 }
 0x125   : > { %v1408_v43 = vadd.f32 %v1407_v33, %v1300_v35  ;;  %v1434_v44 = vadd.f32 %v1433_v34, %v1302_v36  ;;  %v1026_v45 = vmul.f32 %v2200_v57, %v660_v41  ;;  %v1028_v46 = vmul.f32 %v2202_v58, %v853_v42  ;;  %v662_v47 = vpop.f32.mrb[17].mxu0  ;;  %v855_v48 = vpop.f32.mrb[17].mxu1 }
 0x126   : > { %v1421_v49 = vadd.f32 %v1420_v37, %v1301_v39  ;;  %v1447_v50 = vadd.f32 %v1446_v38, %v1303_v40  ;;  %v1027_v51 = vmul.f32 %v2204_v59, %v662_v47  ;;  %v1029_v52 = vmul.f32 %v2206_v60, %v855_v48  ;;  %v664_v53 = vpop.f32.mrb[18].mxu0  ;;  %v857_v54 = vpop.f32.mrb[18].mxu1 }
 0x127   : > { %v1409_v55 = vrot.slane %v1408_v43, 4  ;;  %v1435_v56 = vrot.slane %v1434_v44, 4  ;;  %v1176_v63 = vadd.f32 %v2208_v61, %v1026_v45  ;;  %v1178_v0 = vadd.f32 %v2210_v62, %v1028_v46  ;;  %v666_v3 = vpop.f32.mrb[19].mxu0  ;;  %v859_v4 = vpop.f32.mrb[19].mxu1 }
 0x128   : > { %v1422_v5 = vrot.slane %v1421_v49, 4  ;;  %v1448_v6 = vrot.slane %v1447_v50, 4  ;;  %v1177_v7 = vadd.f32 %v2212_v1, %v1027_v51  ;;  %v1179_v8 = vadd.f32 %v2214_v2, %v1029_v52 }
 0x129   : > { %v1410_v9 = vadd.f32 %v1409_v55, %v1408_v43  ;;  %v1436_v10 = vadd.f32 %v1435_v56, %v1434_v44  ;;  %v1304_v11 = vmax.f32 %v1176_v63, 0.0  ;;  %v1306_v12 = vmax.f32 %v1178_v0, 0.0 }
 0x12a   : > { %v1423_v13 = vadd.f32 %v1422_v5, %v1421_v49  ;;  %v1449_v14 = vadd.f32 %v1448_v6, %v1447_v50  ;;  %v1305_v15 = vmax.f32 %v1177_v7, 0.0  ;;  %v1307_v16 = vmax.f32 %v1179_v8, 0.0 }
 0x12b   : > { %v1411_v17 = vrot.slane %v1410_v9, 2  ;;  %v1437_v18 = vrot.slane %v1436_v10, 2  ;;  %v1030_v19 = vmul.f32 %v2200_v57, %v664_v53  ;;  %v1032_v20 = vmul.f32 %v2202_v58, %v857_v54 }
 0x12c   : > { %v1424_v21 = vrot.slane %v1423_v13, 2  ;;  %v1450_v22 = vrot.slane %v1449_v14, 2  ;;  %v1031_v23 = vmul.f32 %v2204_v59, %v666_v3  ;;  %v1033_v24 = vmul.f32 %v2206_v60, %v859_v4  ;;  %v670_v25 = vpop.f32.mrb[20].mxu0  ;;  %v863_v26 = vpop.f32.mrb[20].mxu1 }
 0x12d   : > { %v1412_v27 = vadd.f32 %v1411_v17, %v1410_v9  ;;  %v1438_v28 = vadd.f32 %v1437_v18, %v1436_v10  ;;  %v1180_v29 = vadd.f32 %v2208_v61, %v1030_v19  ;;  %v1182_v30 = vadd.f32 %v2210_v62, %v1032_v20  ;;  %v672_v31 = vpop.f32.mrb[21].mxu0  ;;  %v865_v32 = vpop.f32.mrb[21].mxu1 }
 0x12e   : > { %v1425_v33 = vadd.f32 %v1424_v21, %v1423_v13  ;;  %v1451_v34 = vadd.f32 %v1450_v22, %v1449_v14  ;;  %v1181_v35 = vadd.f32 %v2212_v1, %v1031_v23  ;;  %v1183_v36 = vadd.f32 %v2214_v2, %v1033_v24  ;;  %v674_v37 = vpop.f32.mrb[22].mxu0  ;;  %v867_v38 = vpop.f32.mrb[22].mxu1 }
 0x12f   : > { %v1413_v39 = vrot.slane %v1412_v27, 1  ;;  %v1439_v40 = vrot.slane %v1438_v28, 1  ;;  %v1308_v41 = vmax.f32 %v1180_v29, 0.0  ;;  %v1310_v42 = vmax.f32 %v1182_v30, 0.0  ;;  %v676_v43 = vpop.f32.mrb[23].mxu0  ;;  %v869_v44 = vpop.f32.mrb[23].mxu1 }
 0x130   : > { %v1426_v45 = vrot.slane %v1425_v33, 1  ;;  %v1452_v46 = vrot.slane %v1451_v34, 1  ;;  %v1309_v47 = vmax.f32 %v1181_v35, 0.0  ;;  %v1311_v48 = vmax.f32 %v1183_v36, 0.0 }
 0x131   : > { %v1414_v49 = vadd.f32 %v1413_v39, %v1412_v27  ;;  %v1440_v50 = vadd.f32 %v1439_v40, %v1438_v28  ;;  %v1454_v51 = vadd.f32 %v1308_v41, %v1304_v11  ;;  %v1480_v52 = vadd.f32 %v1310_v42, %v1306_v12 }
 0x132   : > { %v1427_v53 = vadd.f32 %v1426_v45, %v1425_v33  ;;  %v1453_v54 = vadd.f32 %v1452_v46, %v1451_v34  ;;  %v1467_v55 = vadd.f32 %v1309_v47, %v1305_v15  ;;  %v1493_v56 = vadd.f32 %v1311_v48, %v1307_v16 }
 0x133   : > { %v2296_v63 = vmul.f32 0.015625, %v1414_v49  ;;  %v2298_v0 = vmul.f32 0.015625, %v1440_v50  ;;  %v1034_v3 = vmul.f32 %v2200_v57, %v670_v25  ;;  %v1036_v4 = vmul.f32 %v2202_v58, %v863_v26 }
 0x134   : > { %v2302_v5 = vmul.f32 0.015625, %v1427_v53  ;;  %v2304_v6 = vmul.f32 0.015625, %v1453_v54  ;;  %v1035_v7 = vmul.f32 %v2204_v59, %v672_v31  ;;  %v1037_v8 = vmul.f32 %v2206_v60, %v865_v32  ;;  %v680_v9 = vpop.f32.mrb[24].mxu0  ;;  %v873_v10 = vpop.f32.mrb[24].mxu1 }
 0x135   : > { %v1184_v11 = vadd.f32 %v2208_v61, %v1034_v3  ;;  %v1186_v12 = vadd.f32 %v2210_v62, %v1036_v4  ;;  %v1038_v13 = vmul.f32 %v2200_v57, %v674_v37  ;;  %v1040_v14 = vmul.f32 %v2202_v58, %v867_v38  ;;  %v682_v15 = vpop.f32.mrb[25].mxu0  ;;  %v875_v16 = vpop.f32.mrb[25].mxu1 }
 0x136   : > { %v1642_v17 = vcombine.low %v2296_v63, %v2302_v5  ;;  %v1643_v18 = vcombine.low %v2298_v0, %v2304_v6  ;;  %v1185_v19 = vadd.f32 %v2212_v1, %v1035_v7  ;;  %v1187_v20 = vadd.f32 %v2214_v2, %v1037_v8  ;;  %v684_v21 = vpop.f32.mrb[26].mxu0  ;;  %v877_v22 = vpop.f32.mrb[26].mxu1 }
 0x137   : > { %v1312_v23 = vmax.f32 %v1184_v11, 0.0  ;;  %v1314_v24 = vmax.f32 %v1186_v12, 0.0  ;;  %v1188_v25 = vadd.f32 %v2208_v61, %v1038_v13  ;;  %v1190_v26 = vadd.f32 %v2210_v62, %v1040_v14  ;;  %v686_v27 = vpop.f32.mrb[27].mxu0  ;;  %v879_v28 = vpop.f32.mrb[27].mxu1 }
 0x138   : > { %v1313_v29 = vmax.f32 %v1185_v19, 0.0  ;;  %v1315_v30 = vmax.f32 %v1187_v20, 0.0  ;;  %v1039_v31 = vmul.f32 %v2204_v59, %v676_v43  ;;  %v1041_v32 = vmul.f32 %v2206_v60, %v869_v44 }
 0x139   : > { %v1455_v33 = vadd.f32 %v1454_v51, %v1312_v23  ;;  %v1481_v34 = vadd.f32 %v1480_v52, %v1314_v24  ;;  %v1316_v35 = vmax.f32 %v1188_v25, 0.0  ;;  %v1318_v36 = vmax.f32 %v1190_v26, 0.0 }
 0x13a   : > { %v1468_v37 = vadd.f32 %v1467_v55, %v1313_v29  ;;  %v1494_v38 = vadd.f32 %v1493_v56, %v1315_v30  ;;  %v1189_v39 = vadd.f32 %v2212_v1, %v1039_v31  ;;  %v1191_v40 = vadd.f32 %v2214_v2, %v1041_v32 }
 0x13b   : > { %v1456_v41 = vadd.f32 %v1455_v33, %v1316_v35  ;;  %v1482_v42 = vadd.f32 %v1481_v34, %v1318_v36  ;;  %v1042_v45 = vmul.f32 %v2200_v57, %v680_v9  ;;  %v1044_v46 = vmul.f32 %v2202_v58, %v873_v10 }
 0x13c   : > { %v1317_v47 = vmax.f32 %v1189_v39, 0.0  ;;  %v1319_v43 = vmax.f32 %v1191_v40, 0.0  ;;  %v1043_v44 = vmul.f32 %v2204_v59, %v682_v15  ;;  %v1045_v48 = vmul.f32 %v2206_v60, %v875_v16  ;;  %v690_v49 = vpop.f32.mrb[28].mxu0  ;;  %v883_v50 = vpop.f32.mrb[28].mxu1 }
 0x13d   : > { %v1192_v51 = vadd.f32 %v2208_v61, %v1042_v45  ;;  %v1194_v52 = vadd.f32 %v2210_v62, %v1044_v46  ;;  %v1046_v53 = vmul.f32 %v2200_v57, %v684_v21  ;;  %v1048_v54 = vmul.f32 %v2202_v58, %v877_v22  ;;  %v692_v55 = vpop.f32.mrb[29].mxu0  ;;  %v885_v56 = vpop.f32.mrb[29].mxu1 }
 0x13e   : > { %v1469_v3 = vadd.f32 %v1468_v37, %v1317_v47  ;;  %v1495_v4 = vadd.f32 %v1494_v38, %v1319_v43  ;;  %v1193_v7 = vadd.f32 %v2212_v1, %v1043_v44  ;;  %v1195_v8 = vadd.f32 %v2214_v2, %v1045_v48  ;;  %v694_v9 = vpop.f32.mrb[30].mxu0  ;;  %v887_v10 = vpop.f32.mrb[30].mxu1 }
 0x13f   : > { %v1320_v11 = vmax.f32 %v1192_v51, 0.0  ;;  %v1322_v12 = vmax.f32 %v1194_v52, 0.0  ;;  %v1196_v13 = vadd.f32 %v2208_v61, %v1046_v53  ;;  %v1198_v14 = vadd.f32 %v2210_v62, %v1048_v54  ;;  %v696_v15 = vpop.f32.mrb[31].mxu0  ;;  %v889_v16 = vpop.f32.mrb[31].mxu1 }
 0x140   : > { %v1321_v19 = vmax.f32 %v1193_v7, 0.0  ;;  %v1323_v20 = vmax.f32 %v1195_v8, 0.0  ;;  %v1047_v21 = vmul.f32 %v2204_v59, %v686_v27  ;;  %v1049_v22 = vmul.f32 %v2206_v60, %v879_v28 }
 0x141   : > { %v1457_v23 = vadd.f32 %v1456_v41, %v1320_v11  ;;  %v1483_v24 = vadd.f32 %v1482_v42, %v1322_v12  ;;  %v1324_v25 = vmax.f32 %v1196_v13, 0.0  ;;  %v1326_v26 = vmax.f32 %v1198_v14, 0.0 }
 0x142   : > { %v1470_v29 = vadd.f32 %v1469_v3, %v1321_v19  ;;  %v1496_v30 = vadd.f32 %v1495_v4, %v1323_v20  ;;  %v1197_v31 = vadd.f32 %v2212_v1, %v1047_v21  ;;  %v1199_v32 = vadd.f32 %v2214_v2, %v1049_v22 }
 0x143   : > { %v1458_v33 = vadd.f32 %v1457_v23, %v1324_v25  ;;  %v1484_v34 = vadd.f32 %v1483_v24, %v1326_v26  ;;  %v1050_v35 = vmul.f32 %v2200_v57, %v690_v49  ;;  %v1052_v36 = vmul.f32 %v2202_v58, %v883_v50 }
 0x144   : > { %v1325_v37 = vmax.f32 %v1197_v31, 0.0  ;;  %v1327_v27 = vmax.f32 %v1199_v32, 0.0  ;;  %v1051_v28 = vmul.f32 %v2204_v59, %v692_v55  ;;  %v1053_v38 = vmul.f32 %v2206_v60, %v885_v56  ;;  %v700_v39 = vpop.f32.mrb[32].mxu0  ;;  %v893_v40 = vpop.f32.mrb[32].mxu1 }
 0x145   : > { %v1200_v41 = vadd.f32 %v2208_v61, %v1050_v35  ;;  %v1202_v42 = vadd.f32 %v2210_v62, %v1052_v36  ;;  %v1054_v45 = vmul.f32 %v2200_v57, %v694_v9  ;;  %v1056_v46 = vmul.f32 %v2202_v58, %v887_v10  ;;  %v702_v47 = vpop.f32.mrb[33].mxu0  ;;  %v895_v43 = vpop.f32.mrb[33].mxu1 }
 0x146   : > { %v1471_v44 = vadd.f32 %v1470_v29, %v1325_v37  ;;  %v1497_v48 = vadd.f32 %v1496_v30, %v1327_v27  ;;  %v1201_v49 = vadd.f32 %v2212_v1, %v1051_v28  ;;  %v1203_v50 = vadd.f32 %v2214_v2, %v1053_v38  ;;  %v704_v51 = vpop.f32.mrb[34].mxu0  ;;  %v897_v52 = vpop.f32.mrb[34].mxu1 }
 0x147   : > { %v1328_v53 = vmax.f32 %v1200_v41, 0.0  ;;  %v1330_v54 = vmax.f32 %v1202_v42, 0.0  ;;  %v1204_v55 = vadd.f32 %v2208_v61, %v1054_v45  ;;  %v1206_v56 = vadd.f32 %v2210_v62, %v1056_v46  ;;  %v706_v3 = vpop.f32.mrb[35].mxu0  ;;  %v899_v4 = vpop.f32.mrb[35].mxu1 }
 0x148   : > { %v1329_v7 = vmax.f32 %v1201_v49, 0.0  ;;  %v1331_v8 = vmax.f32 %v1203_v50, 0.0  ;;  %v1055_v9 = vmul.f32 %v2204_v59, %v696_v15  ;;  %v1057_v10 = vmul.f32 %v2206_v60, %v889_v16 }
 0x149   : > { %v1459_v11 = vadd.f32 %v1458_v33, %v1328_v53  ;;  %v1485_v12 = vadd.f32 %v1484_v34, %v1330_v54  ;;  %v1332_v13 = vmax.f32 %v1204_v55, 0.0  ;;  %v1334_v14 = vmax.f32 %v1206_v56, 0.0 }
 0x14a   : > { %v1472_v19 = vadd.f32 %v1471_v44, %v1329_v7  ;;  %v1498_v20 = vadd.f32 %v1497_v48, %v1331_v8  ;;  %v1205_v21 = vadd.f32 %v2212_v1, %v1055_v9  ;;  %v1207_v22 = vadd.f32 %v2214_v2, %v1057_v10 }
 0x14b   : > { %v1460_v23 = vadd.f32 %v1459_v11, %v1332_v13  ;;  %v1486_v24 = vadd.f32 %v1485_v12, %v1334_v14  ;;  %v1058_v25 = vmul.f32 %v2200_v57, %v700_v39  ;;  %v1060_v26 = vmul.f32 %v2202_v58, %v893_v40 }
 0x14c   : > { %v1333_v29 = vmax.f32 %v1205_v21, 0.0  ;;  %v1335_v15 = vmax.f32 %v1207_v22, 0.0  ;;  %v1059_v16 = vmul.f32 %v2204_v59, %v702_v47  ;;  %v1061_v30 = vmul.f32 %v2206_v60, %v895_v43  ;;  %v2360_v31 = vpop.f32.mrb[36].mxu0  ;;  %v2362_v32 = vpop.f32.mrb[36].mxu1 }
 0x14d   : > { %v1461_v33 = vrot.slane %v1460_v23, 4  ;;  %v1487_v34 = vrot.slane %v1486_v24, 4  ;;  %v1208_v35 = vadd.f32 %v2208_v61, %v1058_v25  ;;  %v1210_v36 = vadd.f32 %v2210_v62, %v1060_v26  ;;  %v2366_v37 = vpop.f32.mrb[37].mxu0  ;;  %v2368_v27 = vpop.f32.mrb[37].mxu1 }
 0x14e   : > { %v1473_v28 = vadd.f32 %v1472_v19, %v1333_v29  ;;  %v1499_v38 = vadd.f32 %v1498_v20, %v1335_v15  ;;  %v1209_v39 = vadd.f32 %v2212_v1, %v1059_v16  ;;  %v1211_v40 = vadd.f32 %v2214_v2, %v1061_v30  ;;  %v2372_v41 = vpop.f32.mrb[38].mxu0  ;;  %v2374_v42 = vpop.f32.mrb[38].mxu1 }
 0x14f   : > { %v1462_v45 = vadd.f32 %v1461_v33, %v1460_v23  ;;  %v1488_v46 = vadd.f32 %v1487_v34, %v1486_v24  ;;  %v1336_v47 = vmax.f32 %v1208_v35, 0.0  ;;  %v1338_v43 = vmax.f32 %v1210_v36, 0.0  ;;  %v2376_v44 = vpop.f32.mrb[39].mxu0  ;;  %v2378_v48 = vpop.f32.mrb[39].mxu1 }
 0x150   : > { %v1474_v49 = vrot.slane %v1473_v28, 4  ;;  %v1500_v50 = vrot.slane %v1499_v38, 4  ;;  %v1337_v53 = vmax.f32 %v1209_v39, 0.0  ;;  %v1339_v54 = vmax.f32 %v1211_v40, 0.0 }
 0x151   : > { %v1463_v55 = vrot.slane %v1462_v45, 2  ;;  %v1489_v56 = vrot.slane %v1488_v46, 2  ;;  %v1062_v7 = vmul.f32 %v2200_v57, %v704_v51  ;;  %v1064_v8 = vmul.f32 %v2202_v58, %v897_v52 }
 0x152   : > { %v1475_v9 = vadd.f32 %v1474_v49, %v1473_v28  ;;  %v1501_v10 = vadd.f32 %v1500_v50, %v1499_v38  ;;  %v1063_v11 = vmul.f32 %v2204_v59, %v706_v3  ;;  %v1065_v12 = vmul.f32 %v2206_v60, %v899_v4 }
 0x153   : > { %v1464_v13 = vadd.f32 %v1463_v55, %v1462_v45  ;;  %v1490_v14 = vadd.f32 %v1489_v56, %v1488_v46  ;;  %v1212_v19 = vadd.f32 %v2208_v61, %v1062_v7  ;;  %v1214_v20 = vadd.f32 %v2210_v62, %v1064_v8 }
 0x154   : > { %v1476_v21 = vrot.slane %v1475_v9, 2  ;;  %v1502_v22 = vrot.slane %v1501_v10, 2  ;;  %v1213_v23 = vadd.f32 %v2212_v1, %v1063_v11  ;;  %v1215_v51 = vadd.f32 %v2214_v2, %v1065_v12  ;;  %v2388_v24 = vpop.f32.mrb[40].mxu0  ;;  %v2390_v52 = vpop.f32.mrb[40].mxu1 }
 0x155   : > { %v1465_v25 = vrot.slane %v1464_v13, 1  ;;  %v1491_v3 = vrot.slane %v1490_v14, 1  ;;  %v1340_v26 = vmax.f32 %v1212_v19, 0.0  ;;  %v1342_v4 = vmax.f32 %v1214_v20, 0.0  ;;  %v2392_v29 = vpop.f32.mrb[41].mxu0  ;;  %v2394_v15 = vpop.f32.mrb[41].mxu1 }
 0x156   : > { %v1477_v16 = vadd.f32 %v1476_v21, %v1475_v9  ;;  %v1503_v30 = vadd.f32 %v1502_v22, %v1501_v10  ;;  %v1341_v33 = vmax.f32 %v1213_v23, 0.0  ;;  %v1343_v34 = vmax.f32 %v1215_v51, 0.0  ;;  %v2396_v35 = vpop.f32.mrb[42].mxu0  ;;  %v2398_v36 = vpop.f32.mrb[42].mxu1 }
 0x157   : > { %v1466_v28 = vadd.f32 %v1465_v25, %v1464_v13  ;;  %v1492_v38 = vadd.f32 %v1491_v3, %v1490_v14  ;;  %v1506_v39 = vadd.f32 %v1340_v26, %v1336_v47  ;;  %v1532_v40 = vadd.f32 %v1342_v4, %v1338_v43  ;;  %v2400_v45 = vpop.f32.mrb[43].mxu0  ;;  %v2402_v46 = vpop.f32.mrb[43].mxu1 }
 0x158   : > { %v1478_v49 = vrot.slane %v1477_v16, 1  ;;  %v1504_v50 = vrot.slane %v1503_v30, 1  ;;  %v1519_v55 = vadd.f32 %v1341_v33, %v1337_v53  ;;  %v1545_v56 = vadd.f32 %v1343_v34, %v1339_v54 }
 0x159   : > { %v1614_v7 = vmul.f32 0.015625, %v1466_v28  ;;  %v1616_v8 = vmul.f32 0.015625, %v1492_v38  ;;  %v1066_v9 = vmul.f32 %v2200_v57, %v2360_v31  ;;  %v1068_v10 = vmul.f32 %v2202_v58, %v2362_v32 }
 0x15a   : > { %v1479_v11 = vadd.f32 %v1478_v49, %v1477_v16  ;;  %v1505_v47 = vadd.f32 %v1504_v50, %v1503_v30  ;;  %v1067_v43 = vmul.f32 %v2204_v59, %v2366_v37  ;;  %v1069_v12 = vmul.f32 %v2206_v60, %v2368_v27 }
 0x15b   : > { %v1216_v13 = vadd.f32 %v2208_v61, %v1066_v9  ;;  %v1218_v53 = vadd.f32 %v2210_v62, %v1068_v10  ;;  %v1070_v54 = vmul.f32 %v2200_v57, %v2372_v41  ;;  %v1072_v31 = vmul.f32 %v2202_v58, %v2374_v42 }
 0x15c   : > { %v1615_v14 = vmul.f32 0.015625, %v1479_v11  ;;  %v1617_v32 = vmul.f32 0.015625, %v1505_v47  ;;  %v1217_v19 = vadd.f32 %v2212_v1, %v1067_v43  ;;  %v1219_v20 = vadd.f32 %v2214_v2, %v1069_v12  ;;  %v2420_v37 = vpop.f32.mrb[44].mxu0  ;;  %v2422_v21 = vpop.f32.mrb[44].mxu1 }
 0x15d   : > { %v1344_v27 = vmax.f32 %v1216_v13, 0.0  ;;  %v1346_v22 = vmax.f32 %v1218_v53, 0.0  ;;  %v1220_v23 = vadd.f32 %v2208_v61, %v1070_v54  ;;  %v1222_v51 = vadd.f32 %v2210_v62, %v1072_v31  ;;  %v2426_v41 = vpop.f32.mrb[45].mxu0  ;;  %v2428_v25 = vpop.f32.mrb[45].mxu1 }
 0x15e   : > { %v1644_v42 = vcombine.low %v1614_v7, %v1615_v14  ;;  %v1645_v3 = vcombine.low %v1616_v8, %v1617_v32  ;;  %v1345_v26 = vmax.f32 %v1217_v19, 0.0  ;;  %v1347_v4 = vmax.f32 %v1219_v20, 0.0  ;;  %v2430_v16 = vpop.f32.mrb[46].mxu0  ;;  %v2432_v30 = vpop.f32.mrb[46].mxu1 }
 0x15f   : > { %v1507_v33 = vadd.f32 %v1506_v39, %v1344_v27  ;;  %v1533_v34 = vadd.f32 %v1532_v40, %v1346_v22  ;;  %v1348_v28 = vmax.f32 %v1220_v23, 0.0  ;;  %v1350_v38 = vmax.f32 %v1222_v51, 0.0  ;;  %v2434_v49 = vpop.f32.mrb[47].mxu0  ;;  %v2436_v50 = vpop.f32.mrb[47].mxu1 }
 0x160   : > { %v1650_v9 = vrot.slane %v1644_v42, 7  ;;  %v1665_v10 = vrot.slane %v1645_v3, 7  ;;  %v1520_v11 = vadd.f32 %v1519_v55, %v1345_v26  ;;  %v1546_v47 = vadd.f32 %v1545_v56, %v1347_v4 }
 0x161   : > { %v1508_v7 = vadd.f32 %v1507_v33, %v1348_v28  ;;  %v1534_v8 = vadd.f32 %v1533_v34, %v1350_v38  ;;  %v1071_v43 = vmul.f32 %v2204_v59, %v2376_v44  ;;  %v1073_v12 = vmul.f32 %v2206_v60, %v2378_v48 }
 0x162   : > { %v1652_v39 = vsel %vm1651_vm1, %v1650_v9, %v1642_v17  ;;  %v1666_v40 = vsel %vm1651_vm1, %v1665_v10, %v1643_v18  ;;  %v1074_v55 = vmul.f32 %v2200_v57, %v2388_v24  ;;  %v1076_v56 = vmul.f32 %v2202_v58, %v2390_v52 }
 0x163   : > { %v2455_v44 = vsel %vm1653_vm2, %v1650_v9, %v1652_v39  ;;  %v2458_v48 = vsel %vm1653_vm2, %v1665_v10, %v1666_v40  ;;  %v1221_v63 = vadd.f32 %v2212_v1, %v1071_v43  ;;  %v1223_v5 = vadd.f32 %v2214_v2, %v1073_v12 }
 0x164   : > { %v1224_v0 = vadd.f32 %v2208_v61, %v1074_v55  ;;  %v1226_v6 = vadd.f32 %v2210_v62, %v1076_v56  ;;  %v1075_v17 = vmul.f32 %v2204_v59, %v2392_v29  ;;  %v1077_v18 = vmul.f32 %v2206_v60, %v2394_v15  ;;  %v2468_v24 = vpop.f32.mrb[48].mxu0  ;;  %v2470_v52 = vpop.f32.mrb[48].mxu1 }
 0x165   : > { %v1349_v13 = vmax.f32 %v1221_v63, 0.0  ;;  %v1351_v53 = vmax.f32 %v1223_v5, 0.0  ;;  %v1078_v54 = vmul.f32 %v2200_v57, %v2396_v35  ;;  %v1080_v31 = vmul.f32 %v2202_v58, %v2398_v36  ;;  %v2476_v14 = vpop.f32.mrb[49].mxu0  ;;  %v2478_v32 = vpop.f32.mrb[49].mxu1 }
 0x166   : > { %v1352_v29 = vmax.f32 %v1224_v0, 0.0  ;;  %v1354_v19 = vmax.f32 %v1226_v6, 0.0  ;;  %v1225_v15 = vadd.f32 %v2212_v1, %v1075_v17  ;;  %v1227_v20 = vadd.f32 %v2214_v2, %v1077_v18  ;;  %v2482_v27 = vpop.f32.mrb[50].mxu0  ;;  %v2484_v22 = vpop.f32.mrb[50].mxu1 }
 0x167   : > { %v1521_v23 = vadd.f32 %v1520_v11, %v1349_v13  ;;  %v1547_v51 = vadd.f32 %v1546_v47, %v1351_v53  ;;  %v1228_v35 = vadd.f32 %v2208_v61, %v1078_v54  ;;  %v1230_v36 = vadd.f32 %v2210_v62, %v1080_v31  ;;  %v2488_v42 = vpop.f32.mrb[51].mxu0  ;;  %v2490_v3 = vpop.f32.mrb[51].mxu1 }
 0x168   : > { %v1509_v26 = vadd.f32 %v1508_v7, %v1352_v29  ;;  %v1535_v4 = vadd.f32 %v1534_v8, %v1354_v19  ;;  %v1353_v33 = vmax.f32 %v1225_v15, 0.0  ;;  %v1355_v34 = vmax.f32 %v1227_v20, 0.0 }
 0x169   : > { %v1356_v28 = vmax.f32 %v1228_v35, 0.0  ;;  %v1358_v38 = vmax.f32 %v1230_v36, 0.0  ;;  %v1079_v9 = vmul.f32 %v2204_v59, %v2400_v45  ;;  %v1081_v10 = vmul.f32 %v2206_v60, %v2402_v46 }
 0x16a   : > { %v1522_v11 = vadd.f32 %v1521_v23, %v1353_v33  ;;  %v1548_v47 = vadd.f32 %v1547_v51, %v1355_v34  ;;  %v1082_v43 = vmul.f32 %v2200_v57, %v2420_v37  ;;  %v1084_v12 = vmul.f32 %v2202_v58, %v2422_v21 }
 0x16b   : > { %v1510_v7 = vadd.f32 %v1509_v26, %v1356_v28  ;;  %v1536_v8 = vadd.f32 %v1535_v4, %v1358_v38  ;;  %v1229_v39 = vadd.f32 %v2212_v1, %v1079_v9  ;;  %v1231_v40 = vadd.f32 %v2214_v2, %v1081_v10 }
 0x16c   : > { %v1232_v55 = vadd.f32 %v2208_v61, %v1082_v43  ;;  %v1234_v45 = vadd.f32 %v2210_v62, %v1084_v12  ;;  %v1083_v46 = vmul.f32 %v2204_v59, %v2426_v41  ;;  %v1085_v56 = vmul.f32 %v2206_v60, %v2428_v25  ;;  %v2508_v37 = vpop.f32.mrb[52].mxu0  ;;  %v2510_v63 = vpop.f32.mrb[52].mxu1 }
 0x16d   : > { %v1357_v21 = vmax.f32 %v1229_v39, 0.0  ;;  %v1359_v5 = vmax.f32 %v1231_v40, 0.0  ;;  %v1086_v0 = vmul.f32 %v2200_v57, %v2430_v16  ;;  %v1088_v6 = vmul.f32 %v2202_v58, %v2432_v30  ;;  %v2516_v17 = vpop.f32.mrb[53].mxu0  ;;  %v2518_v18 = vpop.f32.mrb[53].mxu1 }
 0x16e   : > { %v1360_v41 = vmax.f32 %v1232_v55, 0.0  ;;  %v1362_v13 = vmax.f32 %v1234_v45, 0.0  ;;  %v1233_v25 = vadd.f32 %v2212_v1, %v1083_v46  ;;  %v1235_v53 = vadd.f32 %v2214_v2, %v1085_v56  ;;  %v2522_v54 = vpop.f32.mrb[54].mxu0  ;;  %v2524_v31 = vpop.f32.mrb[54].mxu1 }
 0x16f   : > { %v1523_v29 = vadd.f32 %v1522_v11, %v1357_v21  ;;  %v1549_v19 = vadd.f32 %v1548_v47, %v1359_v5  ;;  %v1236_v16 = vadd.f32 %v2208_v61, %v1086_v0  ;;  %v1238_v30 = vadd.f32 %v2210_v62, %v1088_v6  ;;  %v2528_v15 = vpop.f32.mrb[55].mxu0  ;;  %v2530_v20 = vpop.f32.mrb[55].mxu1 }
 0x170   : > { %v1511_v23 = vadd.f32 %v1510_v7, %v1360_v41  ;;  %v1537_v51 = vadd.f32 %v1536_v8, %v1362_v13  ;;  %v1361_v35 = vmax.f32 %v1233_v25, 0.0  ;;  %v1363_v36 = vmax.f32 %v1235_v53, 0.0 }
 0x171   : > { %v1364_v26 = vmax.f32 %v1236_v16, 0.0  ;;  %v1366_v4 = vmax.f32 %v1238_v30, 0.0  ;;  %v1087_v33 = vmul.f32 %v2204_v59, %v2434_v49  ;;  %v1089_v34 = vmul.f32 %v2206_v60, %v2436_v50 }
 0x172   : > { %v1524_v28 = vadd.f32 %v1523_v29, %v1361_v35  ;;  %v1550_v38 = vadd.f32 %v1549_v19, %v1363_v36  ;;  %v1090_v9 = vmul.f32 %v2200_v57, %v2468_v24  ;;  %v1092_v10 = vmul.f32 %v2202_v58, %v2470_v52 }
 0x173   : > { %v1512_v11 = vadd.f32 %v1511_v23, %v1364_v26  ;;  %v1538_v47 = vadd.f32 %v1537_v51, %v1366_v4  ;;  %v1237_v43 = vadd.f32 %v2212_v1, %v1087_v33  ;;  %v1239_v12 = vadd.f32 %v2214_v2, %v1089_v34 }
 0x174   : > { %v1240_v7 = vadd.f32 %v2208_v61, %v1090_v9  ;;  %v1242_v49 = vadd.f32 %v2210_v62, %v1092_v10  ;;  %v1091_v50 = vmul.f32 %v2204_v59, %v2476_v14  ;;  %v1093_v8 = vmul.f32 %v2206_v60, %v2478_v32  ;;  %v2548_v24 = vpop.f32.mrb[56].mxu0  ;;  %v2550_v39 = vpop.f32.mrb[56].mxu1 }
 0x175   : > { %v1513_v52 = vrot.slane %v1512_v11, 4  ;;  %v1539_v40 = vrot.slane %v1538_v47, 4  ;;  %v1365_v55 = vmax.f32 %v1237_v43, 0.0  ;;  %v1367_v45 = vmax.f32 %v1239_v12, 0.0  ;;  %v2552_v46 = vpop.f32.mrb[57].mxu0  ;;  %v2554_v56 = vpop.f32.mrb[57].mxu1 }
 0x176   : > { %v1368_v21 = vmax.f32 %v1240_v7, 0.0  ;;  %v1370_v5 = vmax.f32 %v1242_v49, 0.0  ;;  %v1241_v0 = vadd.f32 %v2212_v1, %v1091_v50  ;;  %v1243_v14 = vadd.f32 %v2214_v2, %v1093_v8  ;;  %v2558_v6 = vpop.f32.mrb[58].mxu0  ;;  %v2560_v32 = vpop.f32.mrb[58].mxu1 }
 0x177   : > { %v1514_v41 = vadd.f32 %v1513_v52, %v1512_v11  ;;  %v1540_v13 = vadd.f32 %v1539_v40, %v1538_v47  ;;  %v1525_v25 = vadd.f32 %v1524_v28, %v1365_v55  ;;  %v1551_v53 = vadd.f32 %v1550_v38, %v1367_v45  ;;  %v2562_v29 = vpop.f32.mrb[59].mxu0  ;;  %v2564_v19 = vpop.f32.mrb[59].mxu1 }
 0x178   : > { %v1369_v16 = vmax.f32 %v1241_v0, 0.0  ;;  %v1371_v30 = vmax.f32 %v1243_v14, 0.0  ;;  %v1094_v23 = vmul.f32 %v2200_v57, %v2482_v27  ;;  %v1096_v51 = vmul.f32 %v2202_v58, %v2484_v22 }
 0x179   : > { %v1515_v35 = vrot.slane %v1514_v41, 2  ;;  %v1541_v36 = vrot.slane %v1540_v13, 2  ;;  %v1526_v26 = vrot.slane %v1525_v25, 4  ;;  %v1552_v4 = vrot.slane %v1551_v53, 4 }
 0x17a   : > { %v1244_v33 = vadd.f32 %v2208_v61, %v1094_v23  ;;  %v1246_v34 = vadd.f32 %v2210_v62, %v1096_v51  ;;  %v1095_v28 = vmul.f32 %v2204_v59, %v2488_v42  ;;  %v1097_v38 = vmul.f32 %v2206_v60, %v2490_v3 }
 0x17b   : > { %v1516_v9 = vadd.f32 %v1515_v35, %v1514_v41  ;;  %v1542_v10 = vadd.f32 %v1541_v36, %v1540_v13  ;;  %v1527_v27 = vadd.f32 %v1526_v26, %v1525_v25  ;;  %v1553_v11 = vadd.f32 %v1552_v4, %v1551_v53 }
 0x17c   : > { %v1372_v47 = vmax.f32 %v1244_v33, 0.0  ;;  %v1374_v22 = vmax.f32 %v1246_v34, 0.0  ;;  %v1245_v43 = vadd.f32 %v2212_v1, %v1095_v28  ;;  %v1247_v12 = vadd.f32 %v2214_v2, %v1097_v38  ;;  %v2578_v7 = vpop.f32.mrb[60].mxu0  ;;  %v2580_v49 = vpop.f32.mrb[60].mxu1 }
 0x17d   : > { %v1517_v50 = vrot.slane %v1516_v9, 1  ;;  %v1543_v8 = vrot.slane %v1542_v10, 1  ;;  %v1528_v42 = vrot.slane %v1527_v27, 2  ;;  %v1554_v52 = vrot.slane %v1553_v11, 2  ;;  %v2582_v40 = vpop.f32.mrb[61].mxu0  ;;  %v2584_v3 = vpop.f32.mrb[61].mxu1 }
 0x17e   : > { %v1558_v55 = vadd.f32 %v1372_v47, %v1368_v21  ;;  %v1584_v45 = vadd.f32 %v1374_v22, %v1370_v5  ;;  %v1373_v0 = vmax.f32 %v1245_v43, 0.0  ;;  %v1375_v14 = vmax.f32 %v1247_v12, 0.0  ;;  %v2586_v41 = vpop.f32.mrb[62].mxu0  ;;  %v2588_v13 = vpop.f32.mrb[62].mxu1 }
 0x17f   : > { %v1518_v25 = vadd.f32 %v1517_v50, %v1516_v9  ;;  %v1544_v53 = vadd.f32 %v1543_v8, %v1542_v10  ;;  %v1529_v23 = vadd.f32 %v1528_v42, %v1527_v27  ;;  %v1555_v51 = vadd.f32 %v1554_v52, %v1553_v11  ;;  %v2590_v35 = vpop.f32.mrb[63].mxu0  ;;  %v2592_v36 = vpop.f32.mrb[63].mxu1 }
 0x180   : > { %v1571_v26 = vadd.f32 %v1373_v0, %v1369_v16  ;;  %v1597_v4 = vadd.f32 %v1375_v14, %v1371_v30  ;;  %v1098_v21 = vmul.f32 %v2200_v57, %v2508_v37  ;;  %v1100_v5 = vmul.f32 %v2202_v58, %v2510_v63 }
 0x181   : > { %v1618_v33 = vmul.f32 0.015625, %v1518_v25  ;;  %v1620_v34 = vmul.f32 0.015625, %v1544_v53  ;;  %v1530_v28 = vrot.slane %v1529_v23, 1  ;;  %v1556_v38 = vrot.slane %v1555_v51, 1 }
 0x182   : > { %v1248_v9 = vadd.f32 %v2208_v61, %v1098_v21  ;;  %v1250_v10 = vadd.f32 %v2210_v62, %v1100_v5  ;;  %v1099_v27 = vmul.f32 %v2204_v59, %v2516_v17  ;;  %v1101_v16 = vmul.f32 %v2206_v60, %v2518_v18 }
 0x183   : > { %v1531_v30 = vadd.f32 %v1530_v28, %v1529_v23  ;;  %v1557_v37 = vadd.f32 %v1556_v38, %v1555_v51  ;;  %v1102_v63 = vmul.f32 %v2200_v57, %v2522_v54  ;;  %v1104_v11 = vmul.f32 %v2202_v58, %v2524_v31 }
 0x184   : > { %v1376_v47 = vmax.f32 %v1248_v9, 0.0  ;;  %v1378_v22 = vmax.f32 %v1250_v10, 0.0  ;;  %v1249_v43 = vadd.f32 %v2212_v1, %v1099_v27  ;;  %v1251_v12 = vadd.f32 %v2214_v2, %v1101_v16 }
 0x185   : > { %v1619_v50 = vmul.f32 0.015625, %v1531_v30  ;;  %v1621_v8 = vmul.f32 0.015625, %v1557_v37  ;;  %v1252_v17 = vadd.f32 %v2208_v61, %v1102_v63  ;;  %v1254_v18 = vadd.f32 %v2210_v62, %v1104_v11 }
 0x186   : > { %v1559_v42 = vadd.f32 %v1558_v55, %v1376_v47  ;;  %v1585_v52 = vadd.f32 %v1584_v45, %v1378_v22  ;;  %v1377_v0 = vmax.f32 %v1249_v43, 0.0  ;;  %v1379_v14 = vmax.f32 %v1251_v12, 0.0 }
 0x187   : > { %v1646_v54 = vcombine.low %v1618_v33, %v1619_v50  ;;  %v1647_v25 = vcombine.low %v1620_v34, %v1621_v8  ;;  %v1380_v53 = vmax.f32 %v1252_v17, 0.0  ;;  %v1382_v31 = vmax.f32 %v1254_v18, 0.0 }
 0x188   : > { %v1572_v23 = vadd.f32 %v1571_v26, %v1377_v0  ;;  %v1598_v51 = vadd.f32 %v1597_v4, %v1379_v14  ;;  %v1103_v21 = vmul.f32 %v2204_v59, %v2528_v15  ;;  %v1105_v5 = vmul.f32 %v2206_v60, %v2530_v20 }
 0x189   : > { %v1655_v28 = vrot.slane %v1646_v54, 6  ;;  %v1668_v38 = vrot.slane %v1647_v25, 6  ;;  %v1560_v9 = vadd.f32 %v1559_v42, %v1380_v53  ;;  %v1586_v10 = vadd.f32 %v1585_v52, %v1382_v31 }
 0x18a   : > { %v1253_v55 = vadd.f32 %v2212_v1, %v1103_v21  ;;  %v1255_v45 = vadd.f32 %v2214_v2, %v1105_v5  ;;  %v1106_v33 = vmul.f32 %v2200_v57, %v2548_v24  ;;  %v1108_v26 = vmul.f32 %v2202_v58, %v2550_v39 }
 0x18b   : > { %v1657_v15 = vsel %vm1656_vm3, %v1655_v28, %v2455_v44  ;;  %v1669_v20 = vsel %vm1656_vm3, %v1668_v38, %v2458_v48  ;;  %v1107_v4 = vmul.f32 %v2204_v59, %v2552_v46  ;;  %v1109_v34 = vmul.f32 %v2206_v60, %v2554_v56 }
 0x18c   : > { %v2631_v27 = vsel %vm1658_vm4, %v1655_v28, %v1657_v15  ;;  %v2634_v24 = vsel %vm1658_vm4, %v1668_v38, %v1669_v20  ;;  %v1381_v16 = vmax.f32 %v1253_v55, 0.0  ;;  %v1383_v39 = vmax.f32 %v1255_v45, 0.0 }
 0x18d   : > { %v1256_v30 = vadd.f32 %v2208_v61, %v1106_v33  ;;  %v1258_v44 = vadd.f32 %v2210_v62, %v1108_v26  ;;  %v1257_v48 = vadd.f32 %v2212_v1, %v1107_v4  ;;  %v1259_v37 = vadd.f32 %v2214_v2, %v1109_v34 }
 0x18e   : > { %v1573_v46 = vadd.f32 %v1572_v23, %v1381_v16  ;;  %v1599_v63 = vadd.f32 %v1598_v51, %v1383_v39  ;;  %v1110_v56 = vmul.f32 %v2200_v57, %v2558_v6  ;;  %v1112_v11 = vmul.f32 %v2202_v58, %v2560_v32 }
 0x18f   : > { %v1384_v47 = vmax.f32 %v1256_v30, 0.0  ;;  %v1386_v22 = vmax.f32 %v1258_v44, 0.0  ;;  %v1385_v43 = vmax.f32 %v1257_v48, 0.0  ;;  %v1387_v12 = vmax.f32 %v1259_v37, 0.0 }
 0x190   : > { %v1260_v50 = vadd.f32 %v2208_v61, %v1110_v56  ;;  %v1262_v8 = vadd.f32 %v2210_v62, %v1112_v11  ;;  %v1111_v17 = vmul.f32 %v2204_v59, %v2562_v29  ;;  %v1113_v18 = vmul.f32 %v2206_v60, %v2564_v19 }
 0x191   : > { %v1561_v42 = vadd.f32 %v1560_v9, %v1384_v47  ;;  %v1587_v52 = vadd.f32 %v1586_v10, %v1386_v22  ;;  %v1574_v6 = vadd.f32 %v1573_v46, %v1385_v43  ;;  %v1600_v0 = vadd.f32 %v1599_v63, %v1387_v12 }
 0x192   : > { %v1388_v14 = vmax.f32 %v1260_v50, 0.0  ;;  %v1390_v32 = vmax.f32 %v1262_v8, 0.0  ;;  %v1261_v54 = vadd.f32 %v2212_v1, %v1111_v17  ;;  %v1263_v25 = vadd.f32 %v2214_v2, %v1113_v18 }
 0x193   : > { %v1114_v53 = vmul.f32 %v2200_v57, %v2578_v7  ;;  %v1116_v31 = vmul.f32 %v2202_v58, %v2580_v49  ;;  %v1115_v29 = vmul.f32 %v2204_v59, %v2582_v40  ;;  %v1117_v19 = vmul.f32 %v2206_v60, %v2584_v3 }
 0x194   : > { %v1562_v23 = vadd.f32 %v1561_v42, %v1388_v14  ;;  %v1588_v51 = vadd.f32 %v1587_v52, %v1390_v32  ;;  %v1389_v21 = vmax.f32 %v1261_v54, 0.0  ;;  %v1391_v5 = vmax.f32 %v1263_v25, 0.0 }
 0x195   : > { %v1264_v28 = vadd.f32 %v2208_v61, %v1114_v53  ;;  %v1266_v38 = vadd.f32 %v2210_v62, %v1116_v31  ;;  %v1265_v9 = vadd.f32 %v2212_v1, %v1115_v29  ;;  %v1267_v7 = vadd.f32 %v2214_v2, %v1117_v19 }
 0x196   : > { %v1575_v10 = vadd.f32 %v1574_v6, %v1389_v21  ;;  %v1601_v49 = vadd.f32 %v1600_v0, %v1391_v5  ;;  %v1118_v40 = vmul.f32 %v2200_v57, %v2586_v41  ;;  %v1120_v3 = vmul.f32 %v2202_v58, %v2588_v13 }
 0x197   : > { %v1392_v55 = vmax.f32 %v1264_v28, 0.0  ;;  %v1394_v45 = vmax.f32 %v1266_v38, 0.0  ;;  %v1393_v33 = vmax.f32 %v1265_v9, 0.0  ;;  %v1395_v26 = vmax.f32 %v1267_v7, 0.0 }
 0x198   : > { %v1268_v15 = vadd.f32 %v2208_v61, %v1118_v40  ;;  %v1270_v20 = vadd.f32 %v2210_v62, %v1120_v3  ;;  %v1119_v4 = vmul.f32 %v2204_v59, %v2590_v35  ;;  %v1121_v58 = vmul.f32 %v2206_v60, %v2592_v36 }
 0x199   : > { %v1563_v34 = vadd.f32 %v1562_v23, %v1392_v55  ;;  %v1589_v16 = vadd.f32 %v1588_v51, %v1394_v45  ;;  %v1576_v39 = vadd.f32 %v1575_v10, %v1393_v33  ;;  %v1602_v30 = vadd.f32 %v1601_v49, %v1395_v26 }
 0x19a   : > { %v1396_v44 = vmax.f32 %v1268_v15, 0.0  ;;  %v1398_v57 = vmax.f32 %v1270_v20, 0.0  ;;  %v1269_v41 = vadd.f32 %v2212_v1, %v1119_v4  ;;  %v1271_v61 = vadd.f32 %v2214_v2, %v1121_v58 }
 0x19c   : > { %v1564_v13 = vadd.f32 %v1563_v34, %v1396_v44  ;;  %v1590_v48 = vadd.f32 %v1589_v16, %v1398_v57  ;;  %v1397_v37 = vmax.f32 %v1269_v41, 0.0  ;;  %v1399_v59 = vmax.f32 %v1271_v61, 0.0 }
 0x19e   : > { %v1565_v62 = vrot.slane %v1564_v13, 4  ;;  %v1591_v46 = vrot.slane %v1590_v48, 4  ;;  %v1577_v63 = vadd.f32 %v1576_v39, %v1397_v37  ;;  %v1603_v47 = vadd.f32 %v1602_v30, %v1399_v59 }
 0x1a0   : > { %v1566_v35 = vadd.f32 %v1565_v62, %v1564_v13  ;;  %v1592_v56 = vadd.f32 %v1591_v46, %v1590_v48  ;;  %v1578_v11 = vrot.slane %v1577_v63, 4  ;;  %v1604_v1 = vrot.slane %v1603_v47, 4 }
 0x1a2   : > { %v1567_v22 = vrot.slane %v1566_v35, 2  ;;  %v1593_v43 = vrot.slane %v1592_v56, 2  ;;  %v1579_v12 = vadd.f32 %v1578_v11, %v1577_v63  ;;  %v1605_v36 = vadd.f32 %v1604_v1, %v1603_v47 }
 0x1a4   : > { %v1568_v50 = vadd.f32 %v1567_v22, %v1566_v35  ;;  %v1594_v8 = vadd.f32 %v1593_v43, %v1592_v56  ;;  %v1580_v60 = vrot.slane %v1579_v12, 2  ;;  %v1606_v42 = vrot.slane %v1605_v36, 2 }
 0x1a6   : > { %v1569_v17 = vrot.slane %v1568_v50, 1  ;;  %v1595_v18 = vrot.slane %v1594_v8, 1  ;;  %v1581_v2 = vadd.f32 %v1580_v60, %v1579_v12  ;;  %v1607_v14 = vadd.f32 %v1606_v42, %v1605_v36 }
 0x1a8   : > { %v1570_v52 = vadd.f32 %v1569_v17, %v1568_v50  ;;  %v1582_v6 = vrot.slane %v1581_v2, 1  ;;  %v1596_v0 = vadd.f32 %v1595_v18, %v1594_v8  ;;  %v1608_v25 = vrot.slane %v1607_v14, 1 }
 0x1aa   : > { %v1622_v32 = vmul.f32 0.015625, %v1570_v52  ;;  %v1583_v54 = vadd.f32 %v1582_v6, %v1581_v2  ;;  %v1624_v31 = vmul.f32 0.015625, %v1596_v0  ;;  %v1609_v29 = vadd.f32 %v1608_v25, %v1607_v14 }
 0x1ac   : > { %v1623_v53 = vmul.f32 0.015625, %v1583_v54  ;;  %v1625_v23 = vmul.f32 0.015625, %v1609_v29 }
 0x1ae   : > { %v1648_v19 = vcombine.low %v1622_v32, %v1623_v53  ;;  %v1649_v21 = vcombine.low %v1624_v31, %v1625_v23 }
 0x1b0   : > { %v1660_v51 = vrot.slane %v1648_v19, 5  ;;  %v1671_v38 = vrot.slane %v1649_v21, 5 }
 0x1b2   : > { %v1662_v5 = vsel %vm1661_vm5, %v1660_v51, %v2631_v27  ;;  %v1672_v9 = vsel %vm1661_vm5, %v1671_v38, %v2634_v24 }
 0x1b3   : > { %v1664_v28 = vsel %vm1663_vm6, %v1660_v51, %v1662_v5  ;;  %v1673_v7 = vsel %vm1663_vm6, %v1671_v38, %v1672_v9 }
 0x1b4   : > { %1678 = vst [vmem:[%s320_s9] sm:$0xff] %v1664_v28  ;;  %1679 = vst [vmem:[%s320_s9 + $0x8] sm:$0xff] %v1673_v7 }
 0x1b5 PF: > { %s14_s19 = sadd.s32 1, %s1985_s19   ;;  %s2702_s15 = smov %s1973_s16 }
 0x1b6   : > { %p11_p10 = scmp.ge.s32.totalorder %s14_s19, 6   ;;  %s2703_s16 = smov %s2048_s23 }
 0x1b7   : > { %s2704_s17 = smov %s1981_s18  ;;  %s2705_s18 = smov %s2707_s20 }
 0x1b8   :  { %13 = sbr.rel (!%p11_p10) target bundleno = 3 (0x3), region = 107 }

// kernel: model_forward.7
= control target key start
LH: loop header
LB: loop body
LE: loop exit
PB: predicated region body
PF: predicated region fallthrough
CT: control target
= control target key end

     0   :  { %s2334_s0 = inlined_call_operand.vmem [shape: f32[4,2048], index: 0, kind: input, shape index: {}]   ;;  %s2335_s1 = inlined_call_operand.vmem [shape: f32[2048,128], index: 1, kind: input, shape index: {}]   ;;  %s2336_s2 = inlined_call_operand.vmem [shape: f32[1,128], index: 2, kind: input, shape index: {}]   ;;  %s2337_s3 = inlined_call_operand.vmem [shape: f32[1,128], index: 3, kind: input, shape index: {}]   ;;  %s2338_s4 = inlined_call_operand.hbm [shape: f32[4,128], index: 4, kind: output, shape index: {}]  }
   0x1   :  { %v42_v0 = vld [vmem:[%s2335_s1 + $0x80] sm:$0xff]  ;;  %v43_v1 = vld [vmem:[%s2335_s1 + $0x88] sm:$0xff]  ;;  %v44_v11 = vld [vmem:[%s2335_s1 + $0x90] sm:$0xff] }
   0x2   :  { %v74_v2 = vld [vmem:[%s2335_s1 + $0x180] sm:$0xff]  ;;  %v1179_v3 = vpack.c.bf16 %v43_v1, %v42_v0  ;;  %v75_v4 = vld [vmem:[%s2335_s1 + $0x188] sm:$0xff]  ;;  %v45_v13 = vld [vmem:[%s2335_s1 + $0x98] sm:$0xff] }
   0x3   :  { %v26_v5 = vld [vmem:[%s2335_s1] sm:$0xff]  ;;  %v27_v6 = vld [vmem:[%s2335_s1 + $0x8] sm:$0xff]  ;;  %v1211_v7 = vpack.c.bf16 %v75_v4, %v74_v2  ;;  %v76_v14 = vld [vmem:[%s2335_s1 + $0x190] sm:$0xff]  ;;  %v1183_v16 = vpack.c.bf16 %v45_v13, %v44_v11 }
   0x4   :  { %v1181_v8 = vpack.c.bf16 %v27_v6, %v26_v5  ;;  %v58_v9 = vld [vmem:[%s2335_s1 + $0x100] sm:$0xff]  ;;  %v59_v10 = vld [vmem:[%s2335_s1 + $0x108] sm:$0xff]  ;;  %1180 = vmatprep.subr.bf16.mxu0 %v1179_v3  ;;  %v77_v15 = vld [vmem:[%s2335_s1 + $0x198] sm:$0xff] }
   0x5   :  { %v1213_v12 = vpack.c.bf16 %v59_v10, %v58_v9  ;;  %1212 = vmatprep.subr.bf16.mxu1 %v1211_v7  ;;  %v1215_v17 = vpack.c.bf16 %v77_v15, %v76_v14  ;;  %v28_v18 = vld [vmem:[%s2335_s1 + $0x10] sm:$0xff]  ;;  %v29_v19 = vld [vmem:[%s2335_s1 + $0x18] sm:$0xff]  ;;  %v46_v23 = vld [vmem:[%s2335_s1 + $0xa0] sm:$0xff] }
   0x6   :  { %1182 = vmatpush3.bf16.msra.mxu0 %v1181_v8  ;;  %v60_v20 = vld [vmem:[%s2335_s1 + $0x110] sm:$0xff]  ;;  %v1185_v21 = vpack.c.bf16 %v29_v19, %v28_v18  ;;  %v61_v22 = vld [vmem:[%s2335_s1 + $0x118] sm:$0xff]  ;;  %v47_v24 = vld [vmem:[%s2335_s1 + $0xa8] sm:$0xff] }
   0x7   :  { %1214 = vmatpush3.bf16.msra.mxu1 %v1213_v12  ;;  %1184 = vmatprep.subr.bf16.mxu0 %v1183_v16  ;;  %v1217_v25 = vpack.c.bf16 %v61_v22, %v60_v20  ;;  %v1187_v26 = vpack.c.bf16 %v47_v24, %v46_v23  ;;  %v78_v27 = vld [vmem:[%s2335_s1 + $0x1a0] sm:$0xff]  ;;  %v79_v28 = vld [vmem:[%s2335_s1 + $0x1a8] sm:$0xff]  ;;  %v48_v35 = vld [vmem:[%s2335_s1 + $0xb0] sm:$0xff] }
   0x8   :  { %1216 = vmatprep.subr.bf16.mxu1 %v1215_v17  ;;  %v30_v29 = vld [vmem:[%s2335_s1 + $0x20] sm:$0xff]  ;;  %v1219_v30 = vpack.c.bf16 %v79_v28, %v78_v27  ;;  %v31_v31 = vld [vmem:[%s2335_s1 + $0x28] sm:$0xff]  ;;  %v49_v36 = vld [vmem:[%s2335_s1 + $0xb8] sm:$0xff] }
   0x9   :  { %v62_v32 = vld [vmem:[%s2335_s1 + $0x120] sm:$0xff]  ;;  %v63_v33 = vld [vmem:[%s2335_s1 + $0x128] sm:$0xff]  ;;  %v1189_v34 = vpack.c.bf16 %v31_v31, %v30_v29  ;;  %v80_v37 = vld [vmem:[%s2335_s1 + $0x1b0] sm:$0xff]  ;;  %v1191_v39 = vpack.c.bf16 %v49_v36, %v48_v35 }
   0xa   :  { %1186 = vmatpush3.bf16.msra.mxu0 %v1185_v21  ;;  %v1221_v38 = vpack.c.bf16 %v63_v33, %v62_v32  ;;  %v81_v40 = vld [vmem:[%s2335_s1 + $0x1b8] sm:$0xff]  ;;  %v32_v41 = vld [vmem:[%s2335_s1 + $0x30] sm:$0xff]  ;;  %v50_v46 = vld [vmem:[%s2335_s1 + $0xc0] sm:$0xff] }
   0xb   :  { %1218 = vmatpush3.bf16.msra.mxu1 %v1217_v25  ;;  %1188 = vmatprep.subr.bf16.mxu0 %v1187_v26  ;;  %v33_v42 = vld [vmem:[%s2335_s1 + $0x38] sm:$0xff]  ;;  %v1223_v43 = vpack.c.bf16 %v81_v40, %v80_v37  ;;  %v64_v44 = vld [vmem:[%s2335_s1 + $0x130] sm:$0xff]  ;;  %v51_v47 = vld [vmem:[%s2335_s1 + $0xc8] sm:$0xff] }
   0xc   :  { %1220 = vmatprep.subr.bf16.mxu1 %v1219_v30  ;;  %v65_v45 = vld [vmem:[%s2335_s1 + $0x138] sm:$0xff]  ;;  %v82_v48 = vld [vmem:[%s2335_s1 + $0x1c0] sm:$0xff]  ;;  %v83_v49 = vld [vmem:[%s2335_s1 + $0x1c8] sm:$0xff]  ;;  %v1193_v50 = vpack.c.bf16 %v33_v42, %v32_v41  ;;  %v1195_v52 = vpack.c.bf16 %v51_v47, %v50_v46 }
   0xd   :  { %v1225_v51 = vpack.c.bf16 %v65_v45, %v64_v44  ;;  %v34_v53 = vld [vmem:[%s2335_s1 + $0x40] sm:$0xff]  ;;  %v35_v54 = vld [vmem:[%s2335_s1 + $0x48] sm:$0xff]  ;;  %v1227_v56 = vpack.c.bf16 %v83_v49, %v82_v48  ;;  %v52_v58 = vld [vmem:[%s2335_s1 + $0xd0] sm:$0xff] }
   0xe   :  { %1190 = vmatpush3.bf16.msra.mxu0 %v1189_v34  ;;  %v66_v55 = vld [vmem:[%s2335_s1 + $0x140] sm:$0xff]  ;;  %v67_v57 = vld [vmem:[%s2335_s1 + $0x148] sm:$0xff]  ;;  %v53_v59 = vld [vmem:[%s2335_s1 + $0xd8] sm:$0xff]  ;;  %v1197_v62 = vpack.c.bf16 %v35_v54, %v34_v53 }
   0xf   :  { %1222 = vmatpush3.bf16.msra.mxu1 %v1221_v38  ;;  %1192 = vmatprep.subr.bf16.mxu0 %v1191_v39  ;;  %v84_v60 = vld [vmem:[%s2335_s1 + $0x1d0] sm:$0xff]  ;;  %v85_v61 = vld [vmem:[%s2335_s1 + $0x1d8] sm:$0xff]  ;;  %v1229_v63 = vpack.c.bf16 %v67_v57, %v66_v55  ;;  %v1199_v0 = vpack.c.bf16 %v53_v59, %v52_v58  ;;  %v54_v6 = vld [vmem:[%s2335_s1 + $0xe0] sm:$0xff] }
  0x10   :  { %1224 = vmatprep.subr.bf16.mxu1 %v1223_v43  ;;  %v36_v1 = vld [vmem:[%s2335_s1 + $0x50] sm:$0xff]  ;;  %v37_v2 = vld [vmem:[%s2335_s1 + $0x58] sm:$0xff]  ;;  %v1231_v4 = vpack.c.bf16 %v85_v61, %v84_v60  ;;  %v55_v7 = vld [vmem:[%s2335_s1 + $0xe8] sm:$0xff] }
  0x11   :  { %v68_v3 = vld [vmem:[%s2335_s1 + $0x150] sm:$0xff]  ;;  %v69_v5 = vld [vmem:[%s2335_s1 + $0x158] sm:$0xff]  ;;  %v86_v8 = vld [vmem:[%s2335_s1 + $0x1e0] sm:$0xff]  ;;  %v1201_v10 = vpack.c.bf16 %v37_v2, %v36_v1  ;;  %v1203_v14 = vpack.c.bf16 %v55_v7, %v54_v6 }
  0x12   :  { %1194 = vmatpush3.bf16.msra.mxu0 %v1193_v50  ;;  %v87_v9 = vld [vmem:[%s2335_s1 + $0x1e8] sm:$0xff]  ;;  %v38_v11 = vld [vmem:[%s2335_s1 + $0x60] sm:$0xff]  ;;  %v1233_v13 = vpack.c.bf16 %v69_v5, %v68_v3  ;;  %v56_v20 = vld [vmem:[%s2335_s1 + $0xf0] sm:$0xff] }
  0x13   :  { %1226 = vmatpush3.bf16.msra.mxu1 %v1225_v51  ;;  %1196 = vmatprep.subr.bf16.mxu0 %v1195_v52  ;;  %v39_v12 = vld [vmem:[%s2335_s1 + $0x68] sm:$0xff]  ;;  %v70_v15 = vld [vmem:[%s2335_s1 + $0x160] sm:$0xff]  ;;  %v1235_v18 = vpack.c.bf16 %v87_v9, %v86_v8  ;;  %v57_v21 = vld [vmem:[%s2335_s1 + $0xf8] sm:$0xff] }
  0x14   :  { %1228 = vmatprep.subr.bf16.mxu1 %v1227_v56  ;;  %v18_v16 = vld [vmem:[%s2334_s0] sm:$0xff]  ;;  %v19_v17 = vld [vmem:[%s2334_s0 + $0x8] sm:$0xff]  ;;  %v88_v24 = vld [vmem:[%s2335_s1 + $0x1f0] sm:$0xff]  ;;  %v1205_v26 = vpack.c.bf16 %v39_v12, %v38_v11  ;;  %v1207_v28 = vpack.c.bf16 %v57_v21, %v56_v20 }
  0x15   :  { %v71_v19 = vld [vmem:[%s2335_s1 + $0x168] sm:$0xff]  ;;  %v290_v22 = vcombine.high %v18_v16, %v18_v16  ;;  %v291_v23 = vcombine.high %v19_v17, %v19_v17  ;;  %v89_v25 = vld [vmem:[%s2335_s1 + $0x1f8] sm:$0xff]  ;;  %v40_v29 = vld [vmem:[%s2335_s1 + $0x70] sm:$0xff] }
  0x16   :  { %1198 = vmatpush3.bf16.msra.mxu0 %v1197_v62  ;;  %v1237_v27 = vpack.c.bf16 %v71_v19, %v70_v15  ;;  %v41_v30 = vld [vmem:[%s2335_s1 + $0x78] sm:$0xff]  ;;  %v72_v31 = vld [vmem:[%s2335_s1 + $0x170] sm:$0xff]  ;;  %v1239_v32 = vpack.c.bf16 %v89_v25, %v88_v24  ;;  %v106_v34 = vld [vmem:[%s2335_s1 + $0x280] sm:$0xff] }
  0x17   :  { %1230 = vmatpush3.bf16.msra.mxu1 %v1229_v63  ;;  %1200 = vmatprep.subr.bf16.mxu0 %v1199_v0  ;;  %v73_v33 = vld [vmem:[%s2335_s1 + $0x178] sm:$0xff]  ;;  %v107_v35 = vld [vmem:[%s2335_s1 + $0x288] sm:$0xff]  ;;  %v138_v36 = vld [vmem:[%s2335_s1 + $0x380] sm:$0xff]  ;;  %v1209_v38 = vpack.c.bf16 %v41_v30, %v40_v29 }
  0x18   :  { %1232 = vmatprep.subr.bf16.mxu1 %v1231_v4  ;;  %370 = vmatprep.mubr.f32.mxu0 %v290_v22  ;;  %v139_v37 = vld [vmem:[%s2335_s1 + $0x388] sm:$0xff]  ;;  %v1241_v39 = vpack.c.bf16 %v73_v33, %v72_v31  ;;  %v1243_v40 = vpack.c.bf16 %v107_v35, %v106_v34  ;;  %v90_v41 = vld [vmem:[%s2335_s1 + $0x200] sm:$0xff]  ;;  %v108_v46 = vld [vmem:[%s2335_s1 + $0x290] sm:$0xff] }
  0x19   :  { %440 = vmatprep.mubr.f32.mxu1 %v291_v23  ;;  %v91_v42 = vld [vmem:[%s2335_s1 + $0x208] sm:$0xff]  ;;  %v122_v43 = vld [vmem:[%s2335_s1 + $0x300] sm:$0xff]  ;;  %v1275_v44 = vpack.c.bf16 %v139_v37, %v138_v36  ;;  %v109_v47 = vld [vmem:[%s2335_s1 + $0x298] sm:$0xff] }
  0x1a   :  { %1202 = vmatpush3.bf16.msra.mxu0 %v1201_v10  ;;  %v123_v45 = vld [vmem:[%s2335_s1 + $0x308] sm:$0xff]  ;;  %v140_v48 = vld [vmem:[%s2335_s1 + $0x390] sm:$0xff]  ;;  %v141_v49 = vld [vmem:[%s2335_s1 + $0x398] sm:$0xff]  ;;  %v1245_v50 = vpack.c.bf16 %v91_v42, %v90_v41  ;;  %v1247_v52 = vpack.c.bf16 %v109_v47, %v108_v46 }
  0x1b   :  { %1234 = vmatpush3.bf16.msra.mxu1 %v1233_v13  ;;  %1204 = vmatprep.subr.bf16.mxu0 %v1203_v14  ;;  %v1277_v51 = vpack.c.bf16 %v123_v45, %v122_v43  ;;  %v92_v53 = vld [vmem:[%s2335_s1 + $0x210] sm:$0xff]  ;;  %v93_v54 = vld [vmem:[%s2335_s1 + $0x218] sm:$0xff]  ;;  %v1279_v56 = vpack.c.bf16 %v141_v49, %v140_v48  ;;  %v110_v58 = vld [vmem:[%s2335_s1 + $0x2a0] sm:$0xff] }
  0x1c   :  { %1236 = vmatprep.subr.bf16.mxu1 %v1235_v18  ;;  %v124_v55 = vld [vmem:[%s2335_s1 + $0x310] sm:$0xff]  ;;  %v125_v57 = vld [vmem:[%s2335_s1 + $0x318] sm:$0xff]  ;;  %v111_v59 = vld [vmem:[%s2335_s1 + $0x2a8] sm:$0xff]  ;;  %v1249_v62 = vpack.c.bf16 %v93_v54, %v92_v53 }
  0x1d   :  { %v142_v60 = vld [vmem:[%s2335_s1 + $0x3a0] sm:$0xff]  ;;  %v143_v61 = vld [vmem:[%s2335_s1 + $0x3a8] sm:$0xff]  ;;  %v1281_v63 = vpack.c.bf16 %v125_v57, %v124_v55  ;;  %v1251_v0 = vpack.c.bf16 %v111_v59, %v110_v58  ;;  %v112_v6 = vld [vmem:[%s2335_s1 + $0x2b0] sm:$0xff] }
  0x1e   :  { %1206 = vmatpush3.bf16.msra.mxu0 %v1205_v26  ;;  %v94_v1 = vld [vmem:[%s2335_s1 + $0x220] sm:$0xff]  ;;  %v95_v2 = vld [vmem:[%s2335_s1 + $0x228] sm:$0xff]  ;;  %v1283_v4 = vpack.c.bf16 %v143_v61, %v142_v60  ;;  %v113_v7 = vld [vmem:[%s2335_s1 + $0x2b8] sm:$0xff] }
  0x1f   :  { %1238 = vmatpush3.bf16.msra.mxu1 %v1237_v27  ;;  %1208 = vmatprep.subr.bf16.mxu0 %v1207_v28  ;;  %v126_v3 = vld [vmem:[%s2335_s1 + $0x320] sm:$0xff]  ;;  %v127_v5 = vld [vmem:[%s2335_s1 + $0x328] sm:$0xff]  ;;  %v144_v8 = vld [vmem:[%s2335_s1 + $0x3b0] sm:$0xff]  ;;  %v1253_v10 = vpack.c.bf16 %v95_v2, %v94_v1  ;;  %v1255_v12 = vpack.c.bf16 %v113_v7, %v112_v6 }
  0x20   :  { %1240 = vmatprep.subr.bf16.mxu1 %v1239_v32  ;;  %v145_v9 = vld [vmem:[%s2335_s1 + $0x3b8] sm:$0xff]  ;;  %v1285_v11 = vpack.c.bf16 %v127_v5, %v126_v3  ;;  %v96_v13 = vld [vmem:[%s2335_s1 + $0x230] sm:$0xff]  ;;  %v114_v18 = vld [vmem:[%s2335_s1 + $0x2c0] sm:$0xff] }
  0x21   :  { %v97_v14 = vld [vmem:[%s2335_s1 + $0x238] sm:$0xff]  ;;  %v128_v15 = vld [vmem:[%s2335_s1 + $0x330] sm:$0xff]  ;;  %v115_v19 = vld [vmem:[%s2335_s1 + $0x2c8] sm:$0xff] }
  0x22   :  { %1210 = vmatpush3.bf16.msra.mxu0 %v1209_v38  ;;  %v146_v20 = vld [vmem:[%s2335_s1 + $0x3c0] sm:$0xff]  ;;  %v147_v21 = vld [vmem:[%s2335_s1 + $0x3c8] sm:$0xff]  ;;  %v1803_v22 = vld [vmem:[%s2334_s0 + $0x10] sm:$0xff]  ;;  %v1257_v23 = vpack.c.bf16 %v97_v14, %v96_v13  ;;  %v1259_v27 = vpack.c.bf16 %v115_v19, %v114_v18 }
  0x23   :  { %1242 = vmatpush3.bf16.msra.mxu1 %v1241_v39  ;;  %1244 = vmatprep.subr.bf16.mxu0 %v1243_v40  ;;  %v292_v24 = vcombine.high %v1803_v22, %v1803_v22  ;;  %v1810_v25 = vld [vmem:[%s2334_s0 + $0x18] sm:$0xff]  ;;  %v98_v28 = vld [vmem:[%s2335_s1 + $0x240] sm:$0xff]  ;;  %v99_v29 = vld [vmem:[%s2335_s1 + $0x248] sm:$0xff]  ;;  %v1291_v32 = vpack.c.bf16 %v147_v21, %v146_v20 }
  0x24   :  { %1276 = vmatprep.subr.bf16.mxu1 %v1275_v44  ;;  %v130_v30 = vld [vmem:[%s2335_s1 + $0x340] sm:$0xff]  ;;  %v293_v31 = vcombine.high %v1810_v25, %v1810_v25  ;;  %v131_v33 = vld [vmem:[%s2335_s1 + $0x348] sm:$0xff]  ;;  %v116_v34 = vld [vmem:[%s2335_s1 + $0x2d0] sm:$0xff]  ;;  %v1261_v38 = vpack.c.bf16 %v99_v29, %v98_v28 }
  0x25   :  { %371 = vmatmul.mubr.f32.vlgmr.msra.gmra.mrb[0].mxu0 %v18_v16  ;;  %v1287_v16 = vpack.c.bf16 %v145_v9, %v144_v8  ;;  %v117_v35 = vld [vmem:[%s2335_s1 + $0x2d8] sm:$0xff]  ;;  %v148_v36 = vld [vmem:[%s2335_s1 + $0x3d0] sm:$0xff]  ;;  %v1293_v39 = vpack.c.bf16 %v131_v33, %v130_v30  ;;  %v118_v46 = vld [vmem:[%s2335_s1 + $0x2e0] sm:$0xff] }
  0x26   :  { %441 = vmatmul.mubr.f32.vlgmr.msra.gmra.mrb[0].mxu1 %v19_v17  ;;  %1246 = vmatpush3.bf16.msra.mxu0 %v1245_v50  ;;  %v129_v17 = vld [vmem:[%s2335_s1 + $0x338] sm:$0xff]  ;;  %v1263_v40 = vpack.c.bf16 %v117_v35, %v116_v34  ;;  %v100_v41 = vld [vmem:[%s2335_s1 + $0x250] sm:$0xff]  ;;  %v119_v47 = vld [vmem:[%s2335_s1 + $0x2e8] sm:$0xff] }
  0x27   :  { %1278 = vmatpush3.bf16.msra.mxu1 %v1277_v51  ;;  %1248 = vmatprep.subr.bf16.mxu0 %v1247_v52  ;;  %v1289_v26 = vpack.c.bf16 %v129_v17, %v128_v15  ;;  %v149_v37 = vld [vmem:[%s2335_s1 + $0x3d8] sm:$0xff]  ;;  %v132_v43 = vld [vmem:[%s2335_s1 + $0x350] sm:$0xff]  ;;  %v150_v48 = vld [vmem:[%s2335_s1 + $0x3e0] sm:$0xff]  ;;  %v1267_v52 = vpack.c.bf16 %v119_v47, %v118_v46 }
  0x28   :  { %1280 = vmatprep.subr.bf16.mxu1 %v1279_v56  ;;  %510 = vmatprep.mubr.f32.mxu0 %v292_v24  ;;  %v101_v42 = vld [vmem:[%s2335_s1 + $0x258] sm:$0xff]  ;;  %v1295_v44 = vpack.c.bf16 %v149_v37, %v148_v36  ;;  %v151_v49 = vld [vmem:[%s2335_s1 + $0x3e8] sm:$0xff]  ;;  %v102_v53 = vld [vmem:[%s2335_s1 + $0x260] sm:$0xff] }
  0x29   :  { %580 = vmatprep.mubr.f32.mxu1 %v293_v31  ;;  %v133_v45 = vld [vmem:[%s2335_s1 + $0x358] sm:$0xff]  ;;  %v1265_v50 = vpack.c.bf16 %v101_v42, %v100_v41  ;;  %v103_v54 = vld [vmem:[%s2335_s1 + $0x268] sm:$0xff]  ;;  %v134_v55 = vld [vmem:[%s2335_s1 + $0x360] sm:$0xff]  ;;  %v1299_v56 = vpack.c.bf16 %v151_v49, %v150_v48 }
  0x2a   :  { %1250 = vmatpush3.bf16.msra.mxu0 %v1249_v62  ;;  %v1297_v51 = vpack.c.bf16 %v133_v45, %v132_v43  ;;  %v135_v57 = vld [vmem:[%s2335_s1 + $0x368] sm:$0xff]  ;;  %v120_v58 = vld [vmem:[%s2335_s1 + $0x2f0] sm:$0xff]  ;;  %v121_v59 = vld [vmem:[%s2335_s1 + $0x2f8] sm:$0xff]  ;;  %v1269_v62 = vpack.c.bf16 %v103_v54, %v102_v53 }
  0x2b   :  { %1282 = vmatpush3.bf16.msra.mxu1 %v1281_v63  ;;  %1252 = vmatprep.subr.bf16.mxu0 %v1251_v0  ;;  %v152_v60 = vld [vmem:[%s2335_s1 + $0x3f0] sm:$0xff]  ;;  %v153_v61 = vld [vmem:[%s2335_s1 + $0x3f8] sm:$0xff]  ;;  %v1301_v63 = vpack.c.bf16 %v135_v57, %v134_v55  ;;  %v1271_v0 = vpack.c.bf16 %v121_v59, %v120_v58  ;;  %v170_v6 = vld [vmem:[%s2335_s1 + $0x480] sm:$0xff] }
  0x2c   :  { %1284 = vmatprep.subr.bf16.mxu1 %v1283_v4  ;;  %v104_v1 = vld [vmem:[%s2335_s1 + $0x270] sm:$0xff]  ;;  %v105_v2 = vld [vmem:[%s2335_s1 + $0x278] sm:$0xff]  ;;  %v1303_v4 = vpack.c.bf16 %v153_v61, %v152_v60  ;;  %v171_v7 = vld [vmem:[%s2335_s1 + $0x488] sm:$0xff] }
  0x2d   :  { %v136_v3 = vld [vmem:[%s2335_s1 + $0x370] sm:$0xff]  ;;  %v137_v5 = vld [vmem:[%s2335_s1 + $0x378] sm:$0xff]  ;;  %v202_v8 = vld [vmem:[%s2335_s1 + $0x580] sm:$0xff] }
  0x2e   :  { %1254 = vmatpush3.bf16.msra.mxu0 %v1253_v10  ;;  %v203_v9 = vld [vmem:[%s2335_s1 + $0x588] sm:$0xff]  ;;  %v1273_v10 = vpack.c.bf16 %v105_v2, %v104_v1  ;;  %v154_v13 = vld [vmem:[%s2335_s1 + $0x400] sm:$0xff]  ;;  %v172_v18 = vld [vmem:[%s2335_s1 + $0x490] sm:$0xff] }
  0x2f   :  { %1286 = vmatpush3.bf16.msra.mxu1 %v1285_v11  ;;  %1256 = vmatprep.subr.bf16.mxu0 %v1255_v12  ;;  %v1305_v11 = vpack.c.bf16 %v137_v5, %v136_v3  ;;  %v1307_v12 = vpack.c.bf16 %v171_v7, %v170_v6  ;;  %v155_v14 = vld [vmem:[%s2335_s1 + $0x408] sm:$0xff]  ;;  %v186_v15 = vld [vmem:[%s2335_s1 + $0x500] sm:$0xff]  ;;  %v173_v19 = vld [vmem:[%s2335_s1 + $0x498] sm:$0xff] }
  0x30   :  { %1288 = vmatprep.subr.bf16.mxu1 %v1287_v16  ;;  %v1339_v16 = vpack.c.bf16 %v203_v9, %v202_v8  ;;  %v187_v17 = vld [vmem:[%s2335_s1 + $0x508] sm:$0xff]  ;;  %v204_v20 = vld [vmem:[%s2335_s1 + $0x590] sm:$0xff]  ;;  %v205_v21 = vld [vmem:[%s2335_s1 + $0x598] sm:$0xff]  ;;  %v1311_v28 = vpack.c.bf16 %v173_v19, %v172_v18 }
  0x31   :  { %v156_v24 = vld [vmem:[%s2335_s1 + $0x410] sm:$0xff]  ;;  %v189_v30 = vld [vmem:[%s2335_s1 + $0x518] sm:$0xff]  ;;  %v1949_v31 = vld [vmem:[%s2334_s0 + $0x20] sm:$0xff] }
  0x32   :  { %1258 = vmatpush3.bf16.msra.mxu0 %v1257_v23  ;;  %v1309_v23 = vpack.c.bf16 %v155_v14, %v154_v13  ;;  %v188_v29 = vld [vmem:[%s2335_s1 + $0x510] sm:$0xff]  ;;  %v174_v33 = vld [vmem:[%s2335_s1 + $0x4a0] sm:$0xff]  ;;  %v175_v34 = vld [vmem:[%s2335_s1 + $0x4a8] sm:$0xff]  ;;  %v294_v35 = vcombine.high %v1949_v31, %v1949_v31 }
  0x33   :  { %1290 = vmatpush3.bf16.msra.mxu1 %v1289_v26  ;;  %1260 = vmatprep.subr.bf16.mxu0 %v1259_v27  ;;  %v157_v26 = vld [vmem:[%s2335_s1 + $0x418] sm:$0xff]  ;;  %v1341_v27 = vpack.c.bf16 %v187_v17, %v186_v15  ;;  %v1962_v36 = vld [vmem:[%s2334_s0 + $0x28] sm:$0xff]  ;;  %v206_v37 = vld [vmem:[%s2335_s1 + $0x5a0] sm:$0xff]  ;;  %v1345_v41 = vpack.c.bf16 %v189_v30, %v188_v29  ;;  %v1315_v42 = vpack.c.bf16 %v175_v34, %v174_v33 }
  0x34   :  { %1292 = vmatprep.subr.bf16.mxu1 %v1291_v32  ;;  %v1343_v32 = vpack.c.bf16 %v205_v21, %v204_v20  ;;  %v159_v43 = vld [vmem:[%s2335_s1 + $0x428] sm:$0xff]  ;;  %v176_v46 = vld [vmem:[%s2335_s1 + $0x4b0] sm:$0xff]  ;;  %v177_v47 = vld [vmem:[%s2335_s1 + $0x4b8] sm:$0xff] }
  0x35   :  { %v208_v48 = vld [vmem:[%s2335_s1 + $0x5b0] sm:$0xff]  ;;  %v209_v49 = vld [vmem:[%s2335_s1 + $0x5b8] sm:$0xff]  ;;  %v178_v58 = vld [vmem:[%s2335_s1 + $0x4c0] sm:$0xff] }
  0x36   :  { %1262 = vmatpush3.bf16.msra.mxu0 %v1261_v38  ;;  %v207_v38 = vld [vmem:[%s2335_s1 + $0x5a8] sm:$0xff]  ;;  %v160_v53 = vld [vmem:[%s2335_s1 + $0x430] sm:$0xff]  ;;  %v161_v54 = vld [vmem:[%s2335_s1 + $0x438] sm:$0xff] }
  0x37   :  { %1294 = vmatpush3.bf16.msra.mxu1 %v1293_v39  ;;  %1264 = vmatprep.subr.bf16.mxu0 %v1263_v40  ;;  %v295_v39 = vcombine.high %v1962_v36, %v1962_v36  ;;  %v1313_v40 = vpack.c.bf16 %v157_v26, %v156_v24  ;;  %v1347_v45 = vpack.c.bf16 %v207_v38, %v206_v37  ;;  %v192_v55 = vld [vmem:[%s2335_s1 + $0x530] sm:$0xff]  ;;  %v193_v57 = vld [vmem:[%s2335_s1 + $0x538] sm:$0xff]  ;;  %v179_v59 = vld [vmem:[%s2335_s1 + $0x4c8] sm:$0xff] }
  0x38   :  { %1296 = vmatprep.subr.bf16.mxu1 %v1295_v44  ;;  %v190_v44 = vld [vmem:[%s2335_s1 + $0x520] sm:$0xff]  ;;  %v211_v61 = vld [vmem:[%s2335_s1 + $0x5c8] sm:$0xff]  ;;  %v180_v6 = vld [vmem:[%s2335_s1 + $0x4d0] sm:$0xff] }
  0x39   :  { %v210_v60 = vld [vmem:[%s2335_s1 + $0x5c0] sm:$0xff]  ;;  %v163_v2 = vld [vmem:[%s2335_s1 + $0x448] sm:$0xff]  ;;  %v181_v7 = vld [vmem:[%s2335_s1 + $0x4d8] sm:$0xff] }
  0x3a   :  { %1266 = vmatpush3.bf16.msra.mxu0 %v1265_v50  ;;  %v162_v1 = vld [vmem:[%s2335_s1 + $0x440] sm:$0xff]  ;;  %v195_v5 = vld [vmem:[%s2335_s1 + $0x548] sm:$0xff]  ;;  %v212_v8 = vld [vmem:[%s2335_s1 + $0x5d0] sm:$0xff] }
  0x3b   :  { %1298 = vmatpush3.bf16.msra.mxu1 %v1297_v51  ;;  %1268 = vmatprep.subr.bf16.mxu0 %v1267_v52  ;;  %v1319_v52 = vpack.c.bf16 %v177_v47, %v176_v46  ;;  %v194_v3 = vld [vmem:[%s2335_s1 + $0x540] sm:$0xff]  ;;  %v213_v9 = vld [vmem:[%s2335_s1 + $0x5d8] sm:$0xff]  ;;  %v164_v13 = vld [vmem:[%s2335_s1 + $0x450] sm:$0xff] }
  0x3c   :  { %1300 = vmatprep.subr.bf16.mxu1 %v1299_v56  ;;  %v1351_v56 = vpack.c.bf16 %v209_v49, %v208_v48  ;;  %v165_v14 = vld [vmem:[%s2335_s1 + $0x458] sm:$0xff]  ;;  %v196_v15 = vld [vmem:[%s2335_s1 + $0x550] sm:$0xff]  ;;  %v182_v18 = vld [vmem:[%s2335_s1 + $0x4e0] sm:$0xff] }
  0x3d   :  { %v197_v17 = vld [vmem:[%s2335_s1 + $0x558] sm:$0xff]  ;;  %v183_v19 = vld [vmem:[%s2335_s1 + $0x4e8] sm:$0xff]  ;;  %v214_v20 = vld [vmem:[%s2335_s1 + $0x5e0] sm:$0xff] }
  0x3e   :  { %1270 = vmatpush3.bf16.msra.mxu0 %v1269_v62  ;;  %v1321_v62 = vpack.c.bf16 %v161_v54, %v160_v53  ;;  %v215_v21 = vld [vmem:[%s2335_s1 + $0x5e8] sm:$0xff]  ;;  %v1361_v24 = vpack.c.bf16 %v197_v17, %v196_v15  ;;  %v1331_v26 = vpack.c.bf16 %v183_v19, %v182_v18  ;;  %v198_v29 = vld [vmem:[%s2335_s1 + $0x560] sm:$0xff]  ;;  %v184_v33 = vld [vmem:[%s2335_s1 + $0x4f0] sm:$0xff] }
  0x3f   :  { %1302 = vmatpush3.bf16.msra.mxu1 %v1301_v63  ;;  %1272 = vmatprep.subr.bf16.mxu0 %v1271_v0  ;;  %v1353_v63 = vpack.c.bf16 %v193_v57, %v192_v55  ;;  %v1323_v0 = vpack.c.bf16 %v179_v59, %v178_v58  ;;  %v1363_v30 = vpack.c.bf16 %v215_v21, %v214_v20  ;;  %v185_v34 = vld [vmem:[%s2335_s1 + $0x4f8] sm:$0xff] }
  0x40   :  { %1304 = vmatprep.subr.bf16.mxu1 %v1303_v4  ;;  %v1355_v4 = vpack.c.bf16 %v211_v61, %v210_v60  ;;  %v217_v37 = vld [vmem:[%s2335_s1 + $0x5f8] sm:$0xff] }
  0x42   :  { %1274 = vmatpush3.bf16.msra.mxu0 %v1273_v10  ;;  %v1325_v10 = vpack.c.bf16 %v163_v2, %v162_v1 }
  0x43   :  { %1306 = vmatpush3.bf16.msra.mxu1 %v1305_v11  ;;  %1308 = vmatprep.subr.bf16.mxu0 %v1307_v12  ;;  %v1357_v11 = vpack.c.bf16 %v195_v5, %v194_v3  ;;  %v1327_v12 = vpack.c.bf16 %v181_v7, %v180_v6 }
  0x44   :  { %1340 = vmatprep.subr.bf16.mxu1 %v1339_v16  ;;  %v1359_v16 = vpack.c.bf16 %v213_v9, %v212_v8 }
  0x45   :  { %511 = vmatmul.mubr.f32.vlgmr.msra.gmra.mrb[2].mxu0 %v1803_v22  ;;  %v158_v22 = vld [vmem:[%s2335_s1 + $0x420] sm:$0xff] }
  0x46   :  { %1310 = vmatpush3.bf16.msra.mxu0 %v1309_v23  ;;  %581 = vmatmul.mubr.f32.vlgmr.msra.gmra.mrb[2].mxu1 %v1810_v25  ;;  %v191_v25 = vld [vmem:[%s2335_s1 + $0x528] sm:$0xff]  ;;  %v1317_v50 = vpack.c.bf16 %v159_v43, %v158_v22  ;;  %v1329_v23 = vpack.c.bf16 %v165_v14, %v164_v13 }
  0x47   :  { %1342 = vmatpush3.bf16.msra.mxu1 %v1341_v27  ;;  %1312 = vmatprep.subr.bf16.mxu0 %v1311_v28  ;;  %v1349_v51 = vpack.c.bf16 %v191_v25, %v190_v44  ;;  %v166_v27 = vld [vmem:[%s2335_s1 + $0x460] sm:$0xff]  ;;  %v167_v28 = vld [vmem:[%s2335_s1 + $0x468] sm:$0xff] }
  0x48   :  { %1344 = vmatprep.subr.bf16.mxu1 %v1343_v32  ;;  %650 = vmatprep.mubr.f32.mxu0 %v294_v35  ;;  %v199_v32 = vld [vmem:[%s2335_s1 + $0x568] sm:$0xff]  ;;  %v216_v35 = vld [vmem:[%s2335_s1 + $0x5f0] sm:$0xff]  ;;  %v1333_v38 = vpack.c.bf16 %v167_v28, %v166_v27 }
  0x49   :  { %720 = vmatprep.mubr.f32.mxu1 %v295_v39 }
  0x4a   :  { %1314 = vmatpush3.bf16.msra.mxu0 %v1313_v40 }
  0x4b   :  { %1346 = vmatpush3.bf16.msra.mxu1 %v1345_v41  ;;  %1316 = vmatprep.subr.bf16.mxu0 %v1315_v42 }
  0x4c   :  { %1348 = vmatprep.subr.bf16.mxu1 %v1347_v45 }
  0x4e   :  { %1318 = vmatpush3.bf16.msra.mxu0 %v1317_v50 }
  0x4f   :  { %1350 = vmatpush3.bf16.msra.mxu1 %v1349_v51  ;;  %1320 = vmatprep.subr.bf16.mxu0 %v1319_v52 }
  0x50   :  { %1352 = vmatprep.subr.bf16.mxu1 %v1351_v56 }
  0x52   :  { %1322 = vmatpush3.bf16.msra.mxu0 %v1321_v62 }
  0x53   :  { %1354 = vmatpush3.bf16.msra.mxu1 %v1353_v63  ;;  %1324 = vmatprep.subr.bf16.mxu0 %v1323_v0 }
  0x54   :  { %1356 = vmatprep.subr.bf16.mxu1 %v1355_v4 }
  0x56   :  { %1326 = vmatpush3.bf16.msra.mxu0 %v1325_v10 }
  0x57   :  { %1358 = vmatpush3.bf16.msra.mxu1 %v1357_v11  ;;  %1328 = vmatprep.subr.bf16.mxu0 %v1327_v12 }
  0x58   :  { %1360 = vmatprep.subr.bf16.mxu1 %v1359_v16 }
  0x5a   :  { %1330 = vmatpush3.bf16.msra.mxu0 %v1329_v23 }
  0x5b   :  { %9 = vsyncpa [#allocation3], 0  ;;  %1362 = vmatpush3.bf16.msra.mxu1 %v1361_v24  ;;  %1332 = vmatprep.subr.bf16.mxu0 %v1331_v26  ;;  %v1365_v39 = vpack.c.bf16 %v199_v32, %v198_v29  ;;  %v1335_v40 = vpack.c.bf16 %v185_v34, %v184_v33  ;;  %v168_v41 = vld [vmem:[%s2335_s1 + $0x470] sm:$0xff]  ;;  %v169_v42 = vld [vmem:[%s2335_s1 + $0x478] sm:$0xff]  ;;  %v1367_v43 = vpack.c.bf16 %v217_v37, %v216_v35  ;;  %s1468_s22 = smov [#allocation2]  }
  0x5c   :  { %v200_v22 = vld [vmem:[%s2335_s1 + $0x570] sm:$0xff]  ;;  %1364 = vmatprep.subr.bf16.mxu1 %v1363_v30  ;;  %v201_v44 = vld [vmem:[%s2335_s1 + $0x578] sm:$0xff]  ;;  %v234_v45 = vld [vmem:[%s2335_s1 + $0x680] sm:$0xff]  ;;  %v1337_v48 = vpack.c.bf16 %v169_v42, %v168_v41  ;;  %s889_s23 = sshll.u32 %s1468_s22, 4  ;;  %s890_s23 = int_to_ptr.vmem [resolvable:$true] %s889_s23 }
  0x5d   :  { %v235_v25 = vld [vmem:[%s2335_s1 + $0x688] sm:$0xff]  ;;  %v266_v46 = vld [vmem:[%s2335_s1 + $0x780] sm:$0xff]  ;;  %v1369_v49 = vpack.c.bf16 %v201_v44, %v200_v22  ;;  %v236_v56 = vld [vmem:[%s2335_s1 + $0x690] sm:$0xff]  ;;  %s1444_s24 = scalar_lea.vmem %s890_s23, 64  ;;  %p1449_p1 = scmp.lt.s32.totalorder %s890_s23, %s890_s23 }
  0x5e   :  { %v267_v47 = vld [vmem:[%s2335_s1 + $0x788] sm:$0xff]  ;;  %1334 = vmatpush3.bf16.msra.mxu0 %v1333_v38  ;;  %v1371_v50 = vpack.c.bf16 %v235_v25, %v234_v45  ;;  %v218_v51 = vld [vmem:[%s2335_s1 + $0x600] sm:$0xff]  ;;  %v237_v57 = vld [vmem:[%s2335_s1 + $0x698] sm:$0xff]  ;;  %p1445_p0 = scmp.ne.s32.totalorder %s890_s23, %s1444_s24  ;;  %p1450_p2 = scmp.lt.s32.totalorder %s1444_s24, %s1444_s24 }
  0x5f   :  { %1366 = vmatpush3.bf16.msra.mxu1 %v1365_v39  ;;  %1336 = vmatprep.subr.bf16.mxu0 %v1335_v40  ;;  %v219_v52 = vld [vmem:[%s2335_s1 + $0x608] sm:$0xff]  ;;  %v250_v53 = vld [vmem:[%s2335_s1 + $0x700] sm:$0xff]  ;;  %v1403_v54 = vpack.c.bf16 %v267_v47, %v266_v46  ;;  %v268_v58 = vld [vmem:[%s2335_s1 + $0x790] sm:$0xff]  ;;  %v1375_v0 = vpack.c.bf16 %v237_v57, %v236_v56 }
  0x60   :  { %1368 = vmatprep.subr.bf16.mxu1 %v1367_v43  ;;  %v251_v55 = vld [vmem:[%s2335_s1 + $0x708] sm:$0xff]  ;;  %v269_v59 = vld [vmem:[%s2335_s1 + $0x798] sm:$0xff]  ;;  %v2145_v60 = vld [vmem:[%s2334_s0 + $0x30] sm:$0xff]  ;;  %v1373_v61 = vpack.c.bf16 %v219_v52, %v218_v51  ;;  %p1451_p3 = por %p1450_p2, %p1449_p1 }
  0x61   :  { %v2150_v62 = vld [vmem:[%s2334_s0 + $0x38] sm:$0xff]  ;;  %v1405_v63 = vpack.c.bf16 %v251_v55, %v250_v53  ;;  %v220_v1 = vld [vmem:[%s2335_s1 + $0x610] sm:$0xff]  ;;  %v1407_v4 = vpack.c.bf16 %v269_v59, %v268_v58  ;;  %v238_v6 = vld [vmem:[%s2335_s1 + $0x6a0] sm:$0xff]  ;;  %v296_v8 = vcombine.high %v2145_v60, %v2145_v60 }
  0x62   :  { %1338 = vmatpush3.bf16.msra.mxu0 %v1337_v48  ;;  %v221_v2 = vld [vmem:[%s2335_s1 + $0x618] sm:$0xff]  ;;  %v252_v3 = vld [vmem:[%s2335_s1 + $0x710] sm:$0xff]  ;;  %v239_v7 = vld [vmem:[%s2335_s1 + $0x6a8] sm:$0xff]  ;;  %v297_v11 = vcombine.high %v2150_v62, %v2150_v62  ;;  %p1452_p4 = pnand %p1451_p3, %p1445_p0 }
  0x63   :  { %1370 = vmatpush3.bf16.msra.mxu1 %v1369_v49  ;;  %1372 = vmatprep.subr.bf16.mxu0 %v1371_v50  ;;  %v253_v5 = vld [vmem:[%s2335_s1 + $0x718] sm:$0xff]  ;;  %v270_v9 = vld [vmem:[%s2335_s1 + $0x7a0] sm:$0xff]  ;;  %v271_v10 = vld [vmem:[%s2335_s1 + $0x7a8] sm:$0xff]  ;;  %v1377_v12 = vpack.c.bf16 %v221_v2, %v220_v1  ;;  %v1379_v14 = vpack.c.bf16 %v239_v7, %v238_v6 }
  0x64   :  { %1404 = vmatprep.subr.bf16.mxu1 %v1403_v54  ;;  %v1409_v13 = vpack.c.bf16 %v253_v5, %v252_v3  ;;  %v223_v15 = vld [vmem:[%s2335_s1 + $0x628] sm:$0xff]  ;;  %v254_v16 = vld [vmem:[%s2335_s1 + $0x720] sm:$0xff]  ;;  %v1411_v17 = vpack.c.bf16 %v271_v10, %v270_v9  ;;  %v240_v18 = vld [vmem:[%s2335_s1 + $0x6b0] sm:$0xff] }
  0x65   :  { %651 = vmatmul.mubr.f32.vlgmr.msra.gmra.mrb[4].mxu0 %v1949_v31  ;;  %v222_v31 = vld [vmem:[%s2335_s1 + $0x620] sm:$0xff]  ;;  %v241_v19 = vld [vmem:[%s2335_s1 + $0x6b8] sm:$0xff]  ;;  %v272_v20 = vld [vmem:[%s2335_s1 + $0x7b0] sm:$0xff] }
  0x66   :  { %1374 = vmatpush3.bf16.msra.mxu0 %v1373_v61  ;;  %721 = vmatmul.mubr.f32.vlgmr.msra.gmra.mrb[4].mxu1 %v1962_v36  ;;  %v255_v36 = vld [vmem:[%s2335_s1 + $0x728] sm:$0xff]  ;;  %v273_v21 = vld [vmem:[%s2335_s1 + $0x7b8] sm:$0xff]  ;;  %v1381_v23 = vpack.c.bf16 %v223_v15, %v222_v31  ;;  %v1383_v26 = vpack.c.bf16 %v241_v19, %v240_v18  ;;  %v224_v27 = vld [vmem:[%s2335_s1 + $0x630] sm:$0xff] }
  0x67   :  { %1406 = vmatpush3.bf16.msra.mxu1 %v1405_v63  ;;  %1376 = vmatprep.subr.bf16.mxu0 %v1375_v0  ;;  %v1413_v24 = vpack.c.bf16 %v255_v36, %v254_v16  ;;  %v225_v28 = vld [vmem:[%s2335_s1 + $0x638] sm:$0xff]  ;;  %v256_v29 = vld [vmem:[%s2335_s1 + $0x730] sm:$0xff]  ;;  %v1415_v30 = vpack.c.bf16 %v273_v21, %v272_v20  ;;  %v242_v33 = vld [vmem:[%s2335_s1 + $0x6c0] sm:$0xff] }
  0x68   :  { %1408 = vmatprep.subr.bf16.mxu1 %v1407_v4  ;;  %790 = vmatprep.mubr.f32.mxu0 %v296_v8  ;;  %v257_v32 = vld [vmem:[%s2335_s1 + $0x738] sm:$0xff]  ;;  %v243_v34 = vld [vmem:[%s2335_s1 + $0x6c8] sm:$0xff]  ;;  %v274_v35 = vld [vmem:[%s2335_s1 + $0x7c0] sm:$0xff]  ;;  %v1385_v38 = vpack.c.bf16 %v225_v28, %v224_v27 }
  0x69   :  { %860 = vmatprep.mubr.f32.mxu1 %v297_v11  ;;  %v275_v37 = vld [vmem:[%s2335_s1 + $0x7c8] sm:$0xff]  ;;  %v1417_v39 = vpack.c.bf16 %v257_v32, %v256_v29  ;;  %v1387_v40 = vpack.c.bf16 %v243_v34, %v242_v33  ;;  %v226_v41 = vld [vmem:[%s2335_s1 + $0x640] sm:$0xff]  ;;  %v244_v45 = vld [vmem:[%s2335_s1 + $0x6d0] sm:$0xff] }
  0x6a   :  { %1378 = vmatpush3.bf16.msra.mxu0 %v1377_v12  ;;  %v227_v42 = vld [vmem:[%s2335_s1 + $0x648] sm:$0xff]  ;;  %v258_v22 = vld [vmem:[%s2335_s1 + $0x740] sm:$0xff]  ;;  %v1419_v43 = vpack.c.bf16 %v275_v37, %v274_v35  ;;  %v245_v25 = vld [vmem:[%s2335_s1 + $0x6d8] sm:$0xff] }
  0x6b   :  { %1410 = vmatpush3.bf16.msra.mxu1 %v1409_v13  ;;  %1380 = vmatprep.subr.bf16.mxu0 %v1379_v14  ;;  %v259_v44 = vld [vmem:[%s2335_s1 + $0x748] sm:$0xff]  ;;  %v276_v46 = vld [vmem:[%s2335_s1 + $0x7d0] sm:$0xff]  ;;  %v277_v47 = vld [vmem:[%s2335_s1 + $0x7d8] sm:$0xff]  ;;  %v1389_v48 = vpack.c.bf16 %v227_v42, %v226_v41  ;;  %v1391_v50 = vpack.c.bf16 %v245_v25, %v244_v45 }
  0x6c   :  { %1412 = vmatprep.subr.bf16.mxu1 %v1411_v17  ;;  %v1421_v49 = vpack.c.bf16 %v259_v44, %v258_v22  ;;  %v228_v51 = vld [vmem:[%s2335_s1 + $0x650] sm:$0xff]  ;;  %v229_v52 = vld [vmem:[%s2335_s1 + $0x658] sm:$0xff]  ;;  %v1423_v54 = vpack.c.bf16 %v277_v47, %v276_v46  ;;  %v246_v56 = vld [vmem:[%s2335_s1 + $0x6e0] sm:$0xff] }
  0x6d   :  { %v260_v53 = vld [vmem:[%s2335_s1 + $0x750] sm:$0xff]  ;;  %v261_v55 = vld [vmem:[%s2335_s1 + $0x758] sm:$0xff]  ;;  %v247_v57 = vld [vmem:[%s2335_s1 + $0x6e8] sm:$0xff]  ;;  %v1393_v61 = vpack.c.bf16 %v229_v52, %v228_v51 }
  0x6e   :  { %1382 = vmatpush3.bf16.msra.mxu0 %v1381_v23  ;;  %v278_v58 = vld [vmem:[%s2335_s1 + $0x7e0] sm:$0xff]  ;;  %v279_v59 = vld [vmem:[%s2335_s1 + $0x7e8] sm:$0xff]  ;;  %v1425_v63 = vpack.c.bf16 %v261_v55, %v260_v53  ;;  %v1395_v0 = vpack.c.bf16 %v247_v57, %v246_v56  ;;  %v248_v6 = vld [vmem:[%s2335_s1 + $0x6f0] sm:$0xff] }
  0x6f   :  { %1414 = vmatpush3.bf16.msra.mxu1 %v1413_v24  ;;  %1384 = vmatprep.subr.bf16.mxu0 %v1383_v26  ;;  %v230_v1 = vld [vmem:[%s2335_s1 + $0x660] sm:$0xff]  ;;  %v231_v2 = vld [vmem:[%s2335_s1 + $0x668] sm:$0xff]  ;;  %v1427_v4 = vpack.c.bf16 %v279_v59, %v278_v58  ;;  %v249_v7 = vld [vmem:[%s2335_s1 + $0x6f8] sm:$0xff] }
  0x70   :  { %1416 = vmatprep.subr.bf16.mxu1 %v1415_v30  ;;  %v262_v3 = vld [vmem:[%s2335_s1 + $0x760] sm:$0xff]  ;;  %v263_v5 = vld [vmem:[%s2335_s1 + $0x768] sm:$0xff]  ;;  %v280_v8 = vld [vmem:[%s2335_s1 + $0x7f0] sm:$0xff]  ;;  %v1397_v10 = vpack.c.bf16 %v231_v2, %v230_v1  ;;  %v1399_v12 = vpack.c.bf16 %v249_v7, %v248_v6 }
  0x71   :  { %v281_v9 = vld [vmem:[%s2335_s1 + $0x7f8] sm:$0xff]  ;;  %v1429_v11 = vpack.c.bf16 %v263_v5, %v262_v3  ;;  %v232_v13 = vld [vmem:[%s2335_s1 + $0x670] sm:$0xff] }
  0x72   :  { %1386 = vmatpush3.bf16.msra.mxu0 %v1385_v38  ;;  %v233_v14 = vld [vmem:[%s2335_s1 + $0x678] sm:$0xff]  ;;  %v1431_v31 = vpack.c.bf16 %v281_v9, %v280_v8  ;;  %v264_v15 = vld [vmem:[%s2335_s1 + $0x770] sm:$0xff] }
  0x73   :  { %1418 = vmatpush3.bf16.msra.mxu1 %v1417_v39  ;;  %1388 = vmatprep.subr.bf16.mxu0 %v1387_v40  ;;  %v265_v16 = vld [vmem:[%s2335_s1 + $0x778] sm:$0xff]  ;;  %v1401_v17 = vpack.c.bf16 %v233_v14, %v232_v13 }
  0x74   :  { %1420 = vmatprep.subr.bf16.mxu1 %v1419_v43  ;;  %v1433_v36 = vpack.c.bf16 %v265_v16, %v264_v15 }
  0x76   :  { %1390 = vmatpush3.bf16.msra.mxu0 %v1389_v48  ;;  %v897_v48 = vld [vmem:[%s2336_s2] ss:$0 sm:$0xff] }
  0x77   :  { %1422 = vmatpush3.bf16.msra.mxu1 %v1421_v49  ;;  %1392 = vmatprep.subr.bf16.mxu0 %v1391_v50  ;;  %v898_v50 = vld [vmem:[%s2337_s3] ss:$0 sm:$0xff] }
  0x78   :  { %1424 = vmatprep.subr.bf16.mxu1 %v1423_v54 }
  0x7a   :  { %1394 = vmatpush3.bf16.msra.mxu0 %v1393_v61 }
  0x7b   :  { %1426 = vmatpush3.bf16.msra.mxu1 %v1425_v63  ;;  %1396 = vmatprep.subr.bf16.mxu0 %v1395_v0 }
  0x7c   :  { %1428 = vmatprep.subr.bf16.mxu1 %v1427_v4 }
  0x7e   :  { %1398 = vmatpush3.bf16.msra.mxu0 %v1397_v10 }
  0x7f   :  { %1430 = vmatpush3.bf16.msra.mxu1 %v1429_v11  ;;  %1400 = vmatprep.subr.bf16.mxu0 %v1399_v12 }
  0x80   :  { %1432 = vmatprep.subr.bf16.mxu1 %v1431_v31 }
  0x82   :  { %1402 = vmatpush3.bf16.msra.mxu0 %v1401_v17 }
  0x83   :  { %1434 = vmatpush3.bf16.msra.mxu1 %v1433_v36 }
  0x85   :  { %791 = vmatmul.mubr.f32.vlgmr.msra.gmra.mrb[6].mxu0 %v2145_v60 }
  0x86   :  { %861 = vmatmul.mubr.f32.vlgmr.msra.gmra.mrb[6].mxu1 %v2150_v62 }
  0xf8   :  { %v931_v18 = vpop.f32.mrb[0].mxu0 }
  0xf9   :  { %v966_v19 = vpop.f32.mrb[0].mxu1  ;;  %v932_v20 = vpop.f32.mrb[1].mxu0 }
  0xfa   :  { %v933_v21 = vadd.f32 %v932_v20, %v931_v18  ;;  %v967_v23 = vpop.f32.mrb[1].mxu1 }
  0xfb   :  { %v968_v24 = vadd.f32 %v967_v23, %v966_v19 }
  0xfd   :  { %v443_v26 = vadd.f32 %v968_v24, %v933_v21 }
 0x118   :  { %v1001_v27 = vpop.f32.mrb[2].mxu0 }
 0x119   :  { %v1002_v28 = vpop.f32.mrb[3].mxu0  ;;  %v1036_v29 = vpop.f32.mrb[2].mxu1 }
 0x11a   :  { %v1003_v30 = vadd.f32 %v1002_v28, %v1001_v27  ;;  %v1037_v32 = vpop.f32.mrb[3].mxu1 }
 0x11b   :  { %v1038_v33 = vadd.f32 %v1037_v32, %v1036_v29 }
 0x11c   :  { %v513_v34 = vadd.f32 %v1003_v30, %v443_v26 }
 0x11e   :  { %v583_v35 = vadd.f32 %v1038_v33, %v513_v34 }
 0x138   :  { %v1071_v37 = vpop.f32.mrb[4].mxu0 }
 0x139   :  { %v1072_v38 = vpop.f32.mrb[5].mxu0  ;;  %v1106_v60 = vpop.f32.mrb[4].mxu1 }
 0x13a   :  { %v1073_v39 = vadd.f32 %v1072_v38, %v1071_v37  ;;  %v1107_v62 = vpop.f32.mrb[5].mxu1 }
 0x13b   :  { %v1108_v40 = vadd.f32 %v1107_v62, %v1106_v60 }
 0x13c   :  { %v653_v41 = vadd.f32 %v1073_v39, %v583_v35 }
 0x13e   :  { %v723_v42 = vadd.f32 %v1108_v40, %v653_v41 }
 0x158   :  { %v1141_v22 = vpop.f32.mrb[6].mxu0 }
 0x159   :  { %v1142_v43 = vpop.f32.mrb[7].mxu0  ;;  %v1176_v44 = vpop.f32.mrb[6].mxu1 }
 0x15a   :  { %v1143_v45 = vadd.f32 %v1142_v43, %v1141_v22  ;;  %v1177_v25 = vpop.f32.mrb[7].mxu1 }
 0x15b   :  { %v1178_v46 = vadd.f32 %v1177_v25, %v1176_v44 }
 0x15c   :  { %v793_v47 = vadd.f32 %v1143_v45, %v723_v42 }
 0x15e   :  { %v863_v49 = vadd.f32 %v1178_v46, %v793_v47 }
 0x160   :  { %v873_v51 = vmul.f32 %v897_v48, %v863_v49 }
 0x162   :  { %v881_v52 = vadd.f32 %v898_v50, %v873_v51 }
 0x164   :  { %882 = vst [vmem:[#allocation2] sm:$0xf] %v881_v52 }
 0x165   :  { %1455 = shalt.err (!%p1452_p4)
}
 0x166   :  { %s1456_s26 = scalar_lea.hbm %s2338_s4, 64 }
 0x167   :  { %p1457_p5 = scmp.ne.s32.totalorder %s2338_s4, %s1456_s26  ;;  %p1460_p6 = scmp.lt.u32.totalorder %s1456_s26, %s2338_s4 }
 0x169   :  { %p1462_p7 = pnand %p1460_p6, %p1457_p5 }
 0x16b   :  { %1465 = shalt.err (!%p1462_p7)
}
 0x16c   :  { %892 = dma.vmem_to_hbm [thread:$0]  %s890_s23, 64, %s2338_s4, [#allocation3]  }
 0x16d   :  { %1466 = dma.done.wait [#allocation3], 64  }
 0x16e   :  { %1467 = vsyncadd [#allocation3], 4294967232 }
 0x16f   :  { %896 = vsyncpa [#allocation3], 1 }

</bundles_post_ra>
